<compile_context>
chip_gen: v7x
topology: tpu7x:2x2x1
jax: 0.10.0
libtpu: 0.0.40
codegen_flags: <defaults>
</compile_context>

<pallas_src>
import math
import functools
from typing import NamedTuple, Optional, Tuple

import jax
import jax.numpy as jnp
from jax.experimental import pallas as pl
from jax.experimental.pallas import tpu as pltpu


# ----------------------------------------------------------------------------- config
VOCAB_SIZE = 256
D_MODEL = 128          # hidden_size of JointModel
N_HEAD = 4
D_HEAD = D_MODEL // N_HEAD
D_FF = 512
N_LAYER = 2
MAX_POS = 64
N_LABELS = 3
LANE = 128
NEG_INF = -1e9

assert D_MODEL % N_HEAD == 0
# fused layer kernel assumes lane-multiple projection widths (no in-kernel pad slicing)
assert D_MODEL % LANE == 0 and (3 * D_MODEL) % LANE == 0
assert D_FF % LANE == 0 and VOCAB_SIZE % LANE == 0


def round_up(x, m):
    return ((x + m - 1) // m) * m


# ----------------------------------------------------------------------------- in-kernel helpers
def _ln(x, wb_ref, eps=1e-5):
    """LayerNorm over the last axis. wb_ref: (2, D) f32 with row 0 = gamma, row 1 = beta."""
    g = wb_ref[0:1, :]
    b = wb_ref[1:2, :]
    mu = jnp.mean(x, axis=-1, keepdims=True)
    var = jnp.mean(jnp.square(x - mu), axis=-1, keepdims=True)
    return (x - mu) * jax.lax.rsqrt(var + eps) * g + b


def _softmax_rows(s):
    m = jnp.max(s, axis=-1, keepdims=True)
    p = jnp.exp(s - m)
    # EUP reciprocal rides a free bundle slot; ~1e-3 rel error in probs (fine for inference).
    return p * pl.reciprocal(jnp.sum(p, axis=-1, keepdims=True), approx=True)


# ----------------------------------------------------------------------------- fused layer kernel
def _layer_kernel(h_ref, bias_ref, ln1_ref, qkv_w_ref, qkv_b_ref,
                  out_w_ref, out_b_ref, ln2_ref, fc1_w_ref, fc1_b_ref,
                  fc2_w_ref, fc2_b_ref, o_ref):
    """One full transformer layer for one batch element; everything stays in VMEM."""
    D, H, Dh = D_MODEL, N_HEAD, D_HEAD

    h = h_ref[...]                                             # (Lp, D) f32 residual stream

    # ---- pre-LN 1 + fused QKV projection (bias fused in epilogue) ----
    x = _ln(h, ln1_ref).astype(jnp.bfloat16)
    qkv = jnp.dot(x, qkv_w_ref[...], preferred_element_type=jnp.float32)
    qkv = (qkv + qkv_b_ref[...]).astype(jnp.bfloat16)          # (Lp, 3D); 1/sqrt(Dh) folded in Wq

    bias = bias_ref[...]                                       # (Lp, Lp) causal + key-pad, f32

    # ---- multi-head attention, all heads in this grid step, scores never leave VMEM ----
    ctx_heads = []
    for hd in range(H):                                        # H = 4, statically unrolled
        q = qkv[:, hd * Dh:(hd + 1) * Dh]
        k = qkv[:, D + hd * Dh:D + (hd + 1) * Dh]
        v = qkv[:, 2 * D + hd * Dh:2 * D + (hd + 1) * Dh]
        # QK^T by contracting the shared head dim — no materialized K transpose.
        s = jax.lax.dot_general(q, k, (((1,), (1,)), ((), ())),
                                preferred_element_type=jnp.float32)   # (Lp, Lp)
        p = _softmax_rows(s + bias)
        ctx_heads.append(jnp.dot(p.astype(jnp.bfloat16), v,
                                 preferred_element_type=jnp.float32))  # (Lp, Dh)
    ctx = jnp.concatenate(ctx_heads, axis=-1).astype(jnp.bfloat16)     # lane-dense (Lp, 128)

    # ---- output projection (+bias) + residual ----
    attn_out = jnp.dot(ctx, out_w_ref[...], preferred_element_type=jnp.float32)
    h = h + attn_out + out_b_ref[...]

    # ---- pre-LN 2 + FFN (bias + GELU fused in the matmul epilogues) ----
    x = _ln(h, ln2_ref).astype(jnp.bfloat16)
    f = jnp.dot(x, fc1_w_ref[...], preferred_element_type=jnp.float32) + fc1_b_ref[...]
    f = jax.nn.gelu(f, approximate=True).astype(jnp.bfloat16)
    f = jnp.dot(f, fc2_w_ref[...], preferred_element_type=jnp.float32) + fc2_b_ref[...]

    o_ref[...] = h + f                                          # (Lp, D) f32


def transformer_layer(h, attn_bias, lp):
    """h: (B, Lp, D) f32, attn_bias: (B, Lp, Lp) f32 -> (B, Lp, D) f32. One pallas_call."""
    B, Lp, D = h.shape

    hspec = pl.BlockSpec((pl.Squeezed(), Lp, D), lambda b: (b, 0, 0))
    bspec = pl.BlockSpec((pl.Squeezed(), Lp, Lp), lambda b: (b, 0, 0))

    def rep(shape):
        zeros = (0,) * len(shape)
        return pl.BlockSpec(shape, lambda b, _z=zeros: _z)      # same block every step -> no re-DMA

    return pl.pallas_call(
        _layer_kernel,
        out_shape=jax.ShapeDtypeStruct((B, Lp, D), jnp.float32),
        grid_spec=pltpu.PrefetchScalarGridSpec(
            num_scalar_prefetch=0,
            grid=(B,),
            in_specs=[
                hspec, bspec,
                rep((2, D)),                                    # ln1 gamma/beta
                rep((D, 3 * D)), rep((1, 3 * D)),               # qkv
                rep((D, D)), rep((1, D)),                       # out proj
                rep((2, D)),                                    # ln2 gamma/beta
                rep((D, D_FF)), rep((1, D_FF)),                 # fc1
                rep((D_FF, D)), rep((1, D)),                    # fc2
            ],
            out_specs=hspec,
        ),
        compiler_params=pltpu.CompilerParams(
            dimension_semantics=("parallel",)),                 # >=2 steps -> both TCs on v7x
    )(h, attn_bias,
      lp["ln1"], lp["qkv_w"], lp["qkv_b"], lp["out_w"], lp["out_b"],
      lp["ln2"], lp["fc1_w"], lp["fc1_b"], lp["fc2_w"], lp["fc2_b"])


# ----------------------------------------------------------------------------- final LN + LM head
def _head_kernel(h_ref, lnf_ref, lm_w_ref, hs_ref, logits_ref):
    hn = _ln(h_ref[...], lnf_ref)                               # (Lp, D) f32 post-LN hidden
    hs_ref[...] = hn
    logits_ref[...] = jnp.dot(hn.astype(jnp.bfloat16), lm_w_ref[...],
                              preferred_element_type=jnp.float32)


def lm_head_and_norm(h, lnf, lm_w):
    B, Lp, D = h.shape
    V = lm_w.shape[1]
    hspec = pl.BlockSpec((pl.Squeezed(), Lp, D), lambda b: (b, 0, 0))
    return pl.pallas_call(
        _head_kernel,
        out_shape=(jax.ShapeDtypeStruct((B, Lp, D), jnp.float32),
                   jax.ShapeDtypeStruct((B, Lp, V), jnp.float32)),
        grid_spec=pltpu.PrefetchScalarGridSpec(
            num_scalar_prefetch=0,
            grid=(B,),
            in_specs=[hspec,
                      pl.BlockSpec((2, D), lambda b: (0, 0)),
                      pl.BlockSpec((D, V), lambda b: (0, 0))],
            out_specs=[hspec,
                       pl.BlockSpec((pl.Squeezed(), Lp, V), lambda b: (b, 0, 0))],
        ),
        compiler_params=pltpu.CompilerParams(dimension_semantics=("parallel",)),
    )(h, lnf, lm_w)


# ----------------------------------------------------------------------------- base LM (stand-in)
class LMOutput(NamedTuple):
    loss: Optional[jnp.ndarray]
    logits: jnp.ndarray
    hidden_states: Optional[Tuple[jnp.ndarray, ...]]


def base_lm_forward(p, input_ids, attention_mask, labels, output_hidden_states):
    B, L = input_ids.shape
    D = D_MODEL
    Lp = round_up(L, 16)                                        # bf16 packs 2 rows / sublane

    # ---- embeddings (XLA gather glue) ----
    pos = jnp.arange(L)
    h = p["wte"][input_ids] + p["wpe"][pos][None, :, :]         # (B, L, D) f32
    if Lp != L:
        h = jnp.pad(h, ((0, 0), (0, Lp - L), (0, 0)))

    # ---- combined causal + key-padding additive bias, built ONCE per forward ----
    key_bias = (attention_mask.astype(jnp.float32) - 1.0) * 1e9       # 0 valid / -1e9 pad
    if Lp != L:
        key_bias = jnp.pad(key_bias, ((0, 0), (0, Lp - L)), constant_values=NEG_INF)
    row = jnp.arange(Lp)[:, None]
    col = jnp.arange(Lp)[None, :]
    causal = jnp.where(col <= row, 0.0, NEG_INF).astype(jnp.float32)  # (Lp, Lp)
    attn_bias = causal[None, :, :] + key_bias[:, None, :]             # (B, Lp, Lp)

    all_hidden = [h[:, :L, :]] if output_hidden_states else None

    for lp_ in p["layers"]:                                     # one pallas_call per layer
        h = transformer_layer(h, attn_bias, lp_)
        if output_hidden_states:
            all_hidden.append(h[:, :L, :])

    hs, logits = lm_head_and_norm(h, p["lnf"], p["lm_head_w"])  # one pallas_call
    logits = logits[:, :L, :VOCAB_SIZE]
    if output_hidden_states:
        all_hidden.append(hs[:, :L, :])

    loss = None
    if labels is not None:
        # HF causal-LM convention: shift by one, ignore label == -100
        shift_logits = logits[:, :-1, :]
        shift_labels = labels[:, 1:]
        logp = jax.nn.log_softmax(shift_logits, axis=-1)
        valid = shift_labels >= 0
        safe = jnp.where(valid, shift_labels, 0)
        nll = -jnp.take_along_axis(logp, safe[..., None], axis=-1)[..., 0]
        loss = jnp.sum(nll * valid) / jnp.maximum(jnp.sum(valid), 1)

    return LMOutput(loss=loss, logits=logits,
                    hidden_states=tuple(all_hidden) if output_hidden_states else None)


# ----------------------------------------------------------------------------- JointModel forward
@functools.partial(
    jax.jit,
    static_argnames=("output_hidden_states", "return_dict", "do_classification",
                     "classifier_positions"),
)
def joint_model_forward(params, input_ids, attention_mask=None, labels=None,
                        output_hidden_states=False, return_dict=False,
                        do_classification=False, classifier_positions="last_token"):
    del return_dict  # lm_outputs is always a NamedTuple with .loss/.logits/.hidden_states
    if attention_mask is None:
        attention_mask = jnp.ones_like(input_ids)

    lm_outputs = base_lm_forward(params["lm"], input_ids, attention_mask, labels,
                                 output_hidden_states)

    clf_logits = None
    if do_classification:
        if not output_hidden_states:
            raise ValueError("If do_classification=True, must set output_hidden_states=True.")
        hidden_states = lm_outputs.hidden_states[-1]
        if classifier_positions == "last_token":
            pooled_emb = hidden_states[:, -1, :]
        else:
            pooled_emb = hidden_states.mean(axis=1)
        # degenerate M=B matmul: XLA fuses it for free; a pallas_call here is pure launch cost
        clf_logits = pooled_emb @ params["clf_w"] + params["clf_b"][None, :]
    return lm_outputs, clf_logits


# ----------------------------------------------------------------------------- params
def init_params(key):
    keys = iter(jax.random.split(key, 64))

    def w(shape, scale=0.02):
        return scale * jax.random.normal(next(keys), shape, jnp.float32)

    def ln_wb():
        return jnp.stack([jnp.ones((D_MODEL,), jnp.float32),
                          jnp.zeros((D_MODEL,), jnp.float32)], axis=0)   # (2, D)

    def bias2d(n):
        return jnp.zeros((1, n), jnp.float32)

    def cast_w(m):
        # dims are asserted lane-multiples; single cast at init, no per-call pad/astype copies
        # TODO(synk): int8 per-output-channel weight path for v5e/v6e MXU (v7x is fp8-only).
        return m.astype(jnp.bfloat16)

    q_scale = 1.0 / math.sqrt(D_HEAD)
    layers = []
    for _ in range(N_LAYER):
        qkv_w = w((D_MODEL, 3 * D_MODEL))
        # fold the 1/sqrt(Dh) attention scale into the Q projection (zero runtime cost)
        qkv_w = qkv_w.at[:, :D_MODEL].multiply(q_scale)
        layers.append(dict(
            ln1=ln_wb(), ln2=ln_wb(),
            qkv_w=cast_w(qkv_w), qkv_b=bias2d(3 * D_MODEL),
            out_w=cast_w(w((D_MODEL, D_MODEL))), out_b=bias2d(D_MODEL),
            fc1_w=cast_w(w((D_MODEL, D_FF))), fc1_b=bias2d(D_FF),
            fc2_w=cast_w(w((D_FF, D_MODEL))), fc2_b=bias2d(D_MODEL),
        ))

    lm = dict(
        wte=w((VOCAB_SIZE, D_MODEL)),
        wpe=w((MAX_POS, D_MODEL), 0.01),
        layers=layers,
        lnf=ln_wb(),
        lm_head_w=cast_w(w((D_MODEL, VOCAB_SIZE))),
    )
    return dict(
        lm=lm,
        clf_w=w((D_MODEL, N_LABELS)),     # tiny classifier head stays f32 in XLA
        clf_b=jnp.zeros((N_LABELS,), jnp.float32),
    )


# ----------------------------------------------------------------------------- demo
if __name__ == "__main__":
    key = jax.random.PRNGKey(0)
    kp, kids = jax.random.split(key, 2)
    params = init_params(kp)

    B, L = 2, 8
    input_ids = jax.random.randint(kids, (B, L), 0, VOCAB_SIZE, dtype=jnp.int32)
    attention_mask = jnp.ones((B, L), jnp.int32).at[1, L - 2:].set(0)   # pad tail of sample 1
    labels = jnp.where(attention_mask > 0, input_ids, -100)

    lm_outputs, clf_logits = joint_model_forward(
        params, input_ids, attention_mask, labels,
        output_hidden_states=True, return_dict=True,
        do_classification=True, classifier_positions="last_token")

    jax.block_until_ready(lm_outputs.logits)
    jax.block_until_ready(lm_outputs.loss)
    jax.block_until_ready(clf_logits)

    assert lm_outputs.logits.shape == (B, L, VOCAB_SIZE)
    assert lm_outputs.loss.shape == ()
    assert len(lm_outputs.hidden_states) == N_LAYER + 2
    assert lm_outputs.hidden_states[-1].shape == (B, L, D_MODEL)
    assert clf_logits.shape == (B, N_LABELS)
    assert bool(jnp.isfinite(lm_outputs.loss))
    assert bool(jnp.all(jnp.isfinite(lm_outputs.logits)))
    assert bool(jnp.all(jnp.isfinite(clf_logits)))

    # mean-pooling classification path
    lm2, clf2 = joint_model_forward(
        params, input_ids, attention_mask, labels,
        output_hidden_states=True, return_dict=True,
        do_classification=True, classifier_positions="mean")
    jax.block_until_ready(clf2)
    assert clf2.shape == (B, N_LABELS)
    assert bool(jnp.all(jnp.isfinite(clf2)))

    print("KERNEL_OK")
</pallas_src>

<mosaic_0001>
module attributes {stable_mosaic.version = 11 : i64} {
  func.func @_head_kernel(%arg0: i32, %arg1: memref<1x16x128xf32, #tpu.memory_space<vmem>>, %arg2: memref<2x128xf32, #tpu.memory_space<vmem>>, %arg3: memref<128x256xbf16, #tpu.memory_space<vmem>>, %arg4: memref<1x16x128xf32, #tpu.memory_space<vmem>>, %arg5: memref<1x16x256xf32, #tpu.memory_space<vmem>>) attributes {dimension_semantics = [#tpu.dimension_semantics<parallel>], iteration_bounds = array<i64: 2>, scalar_prefetch = 0 : i64, scratch_operands = 0 : i64, tpu.core_type = #tpu.core_type<tc>, window_params = [{transform_indices = @transform_0, window_bounds = array<i64: 1, 16, 128>}, {pipeline_mode = #tpu.pipeline_mode<synchronous>, transform_indices = @transform_1, window_bounds = array<i64: 2, 128>}, {pipeline_mode = #tpu.pipeline_mode<synchronous>, transform_indices = @transform_2, window_bounds = array<i64: 128, 256>}, {transform_indices = @transform_3, window_bounds = array<i64: 1, 16, 128>}, {transform_indices = @transform_4, window_bounds = array<i64: 1, 16, 256>}]} {
    %c0 = arith.constant 0 : index
    %c0_0 = arith.constant 0 : index
    %c0_1 = arith.constant 0 : index
    %0 = vector.load %arg1[%c0, %c0_0, %c0_1] : memref<1x16x128xf32, #tpu.memory_space<vmem>>, vector<1x16x128xf32>
    %1 = vector.shape_cast %0 : vector<1x16x128xf32> to vector<16x128xf32>
    %c0_2 = arith.constant 0 : index
    %c0_3 = arith.constant 0 : index
    %2 = vector.load %arg2[%c0_2, %c0_3] : memref<2x128xf32, #tpu.memory_space<vmem>>, vector<1x128xf32>
    %c1 = arith.constant 1 : index
    %c0_4 = arith.constant 0 : index
    %3 = vector.load %arg2[%c1, %c0_4] : memref<2x128xf32, #tpu.memory_space<vmem>>, vector<1x128xf32>
    %cst = arith.constant dense<0.000000e+00> : vector<16xf32>
    %4 = vector.multi_reduction <add>, %1, %cst [1] : vector<16x128xf32> to vector<16xf32>
    %5 = vector.shape_cast %4 : vector<16xf32> to vector<16x1xf32>
    %cst_5 = arith.constant 1.280000e+02 : f32
    %6 = vector.broadcast %cst_5 : f32 to vector<16x1xf32>
    %7 = arith.divf %5, %6 : vector<16x1xf32>
    %8 = vector.broadcast %7 : vector<16x1xf32> to vector<16x128xf32>
    %9 = arith.subf %1, %8 : vector<16x128xf32>
    %10 = arith.mulf %9, %9 : vector<16x128xf32>
    %cst_6 = arith.constant dense<0.000000e+00> : vector<16xf32>
    %11 = vector.multi_reduction <add>, %10, %cst_6 [1] : vector<16x128xf32> to vector<16xf32>
    %12 = vector.shape_cast %11 : vector<16xf32> to vector<16x1xf32>
    %cst_7 = arith.constant 1.280000e+02 : f32
    %13 = vector.broadcast %cst_7 : f32 to vector<16x1xf32>
    %14 = arith.divf %12, %13 : vector<16x1xf32>
    %15 = vector.broadcast %7 : vector<16x1xf32> to vector<16x128xf32>
    %16 = arith.subf %1, %15 : vector<16x128xf32>
    %cst_8 = arith.constant 9.99999974E-6 : f32
    %17 = vector.broadcast %cst_8 : f32 to vector<16x1xf32>
    %18 = arith.addf %14, %17 : vector<16x1xf32>
    %19 = math.rsqrt %18 : vector<16x1xf32>
    %20 = vector.broadcast %19 : vector<16x1xf32> to vector<16x128xf32>
    %21 = arith.mulf %16, %20 : vector<16x128xf32>
    %22 = vector.broadcast %2 : vector<1x128xf32> to vector<16x128xf32>
    %23 = arith.mulf %21, %22 : vector<16x128xf32>
    %24 = vector.broadcast %3 : vector<1x128xf32> to vector<16x128xf32>
    %25 = arith.addf %23, %24 : vector<16x128xf32>
    %c0_9 = arith.constant 0 : index
    %c0_10 = arith.constant 0 : index
    %c0_11 = arith.constant 0 : index
    %26 = vector.load %arg4[%c0_9, %c0_10, %c0_11] : memref<1x16x128xf32, #tpu.memory_space<vmem>>, vector<1x16x128xf32>
    %27 = vector.shape_cast %26 : vector<1x16x128xf32> to vector<16x128xf32>
    %28 = vector.shape_cast %25 : vector<16x128xf32> to vector<1x16x128xf32>
    tpu.vector_store %arg4[%c0_9, %c0_10, %c0_11], %28 {strides = array<i32>} : memref<1x16x128xf32, #tpu.memory_space<vmem>>, vector<1x16x128xf32>,
    %29 = arith.truncf %25 : vector<16x128xf32> to vector<16x128xbf16>
    %c0_12 = arith.constant 0 : index
    %c0_13 = arith.constant 0 : index
    %30 = vector.load %arg3[%c0_12, %c0_13] : memref<128x256xbf16, #tpu.memory_space<vmem>>, vector<128x256xbf16>
    %cst_14 = arith.constant dense<0.000000e+00> : vector<16x256xf32>
    %31 = tpu.matmul %29, %30, %cst_14 {dimension_numbers = #tpu.dot_dimension_numbers<[1], [0], [0], [1], [0, 0, 1, 1], [], []>} : vector<16x128xbf16>, vector<128x256xbf16>, vector<16x256xf32> -> vector<16x256xf32>
    %c0_15 = arith.constant 0 : index
    %c0_16 = arith.constant 0 : index
    %c0_17 = arith.constant 0 : index
    %32 = vector.load %arg5[%c0_15, %c0_16, %c0_17] : memref<1x16x256xf32, #tpu.memory_space<vmem>>, vector<1x16x256xf32>
    %33 = vector.shape_cast %32 : vector<1x16x256xf32> to vector<16x256xf32>
    %34 = vector.shape_cast %31 : vector<16x256xf32> to vector<1x16x256xf32>
    tpu.vector_store %arg5[%c0_15, %c0_16, %c0_17], %34 {strides = array<i32>} : memref<1x16x256xf32, #tpu.memory_space<vmem>>, vector<1x16x256xf32>,
    return
  }
  func.func @transform_0(%arg0: i32) -> (i32, i32, i32) {
    %c0_i32 = arith.constant 0 : i32
    %c0_i32_0 = arith.constant 0 : i32
    %c0_i32_1 = arith.constant 0 : i32
    return %arg0, %c0_i32, %c0_i32_0 : i32, i32, i32
  }
  func.func @transform_1(%arg0: i32) -> (i32, i32) {
    %c0_i32 = arith.constant 0 : i32
    %c0_i32_0 = arith.constant 0 : i32
    %c0_i32_1 = arith.constant 0 : i32
    return %c0_i32, %c0_i32_0 : i32, i32
  }
  func.func @transform_2(%arg0: i32) -> (i32, i32) {
    %c0_i32 = arith.constant 0 : i32
    %c0_i32_0 = arith.constant 0 : i32
    %c0_i32_1 = arith.constant 0 : i32
    return %c0_i32, %c0_i32_0 : i32, i32
  }
  func.func @transform_3(%arg0: i32) -> (i32, i32, i32) {
    %c0_i32 = arith.constant 0 : i32
    %c0_i32_0 = arith.constant 0 : i32
    %c0_i32_1 = arith.constant 0 : i32
    return %arg0, %c0_i32, %c0_i32_0 : i32, i32, i32
  }
  func.func @transform_4(%arg0: i32) -> (i32, i32, i32) {
    %c0_i32 = arith.constant 0 : i32
    %c0_i32_0 = arith.constant 0 : i32
    %c0_i32_1 = arith.constant 0 : i32
    return %arg0, %c0_i32, %c0_i32_0 : i32, i32, i32
  }
}

module attributes {stable_mosaic.version = 11 : i64} {
  func.func @_layer_kernel(%arg0: i32, %arg1: memref<1x16x128xf32, #tpu.memory_space<vmem>>, %arg2: memref<1x16x16xf32, #tpu.memory_space<vmem>>, %arg3: memref<2x128xf32, #tpu.memory_space<vmem>>, %arg4: memref<128x384xbf16, #tpu.memory_space<vmem>>, %arg5: memref<1x384xf32, #tpu.memory_space<vmem>>, %arg6: memref<128x128xbf16, #tpu.memory_space<vmem>>, %arg7: memref<1x128xf32, #tpu.memory_space<vmem>>, %arg8: memref<2x128xf32, #tpu.memory_space<vmem>>, %arg9: memref<128x512xbf16, #tpu.memory_space<vmem>>, %arg10: memref<1x512xf32, #tpu.memory_space<vmem>>, %arg11: memref<512x128xbf16, #tpu.memory_space<vmem>>, %arg12: memref<1x128xf32, #tpu.memory_space<vmem>>, %arg13: memref<1x16x128xf32, #tpu.memory_space<vmem>>) attributes {dimension_semantics = [#tpu.dimension_semantics<parallel>], iteration_bounds = array<i64: 2>, scalar_prefetch = 0 : i64, scratch_operands = 0 : i64, tpu.core_type = #tpu.core_type<tc>, window_params = [{transform_indices = @transform_0, window_bounds = array<i64: 1, 16, 128>}, {transform_indices = @transform_1, window_bounds = array<i64: 1, 16, 16>}, {pipeline_mode = #tpu.pipeline_mode<synchronous>, transform_indices = @transform_2, window_bounds = array<i64: 2, 128>}, {pipeline_mode = #tpu.pipeline_mode<synchronous>, transform_indices = @transform_3, window_bounds = array<i64: 128, 384>}, {pipeline_mode = #tpu.pipeline_mode<synchronous>, transform_indices = @transform_4, window_bounds = array<i64: 1, 384>}, {pipeline_mode = #tpu.pipeline_mode<synchronous>, transform_indices = @transform_5, window_bounds = array<i64: 128, 128>}, {pipeline_mode = #tpu.pipeline_mode<synchronous>, transform_indices = @transform_6, window_bounds = array<i64: 1, 128>}, {pipeline_mode = #tpu.pipeline_mode<synchronous>, transform_indices = @transform_7, window_bounds = array<i64: 2, 128>}, {pipeline_mode = #tpu.pipeline_mode<synchronous>, transform_indices = @transform_8, window_bounds = array<i64: 128, 512>}, {pipeline_mode = #tpu.pipeline_mode<synchronous>, transform_indices = @transform_9, window_bounds = array<i64: 1, 512>}, {pipeline_mode = #tpu.pipeline_mode<synchronous>, transform_indices = @transform_10, window_bounds = array<i64: 512, 128>}, {pipeline_mode = #tpu.pipeline_mode<synchronous>, transform_indices = @transform_11, window_bounds = array<i64: 1, 128>}, {transform_indices = @transform_12, window_bounds = array<i64: 1, 16, 128>}]} {
    %c0 = arith.constant 0 : index
    %c0_0 = arith.constant 0 : index
    %c0_1 = arith.constant 0 : index
    %0 = vector.load %arg1[%c0, %c0_0, %c0_1] : memref<1x16x128xf32, #tpu.memory_space<vmem>>, vector<1x16x128xf32>
    %1 = vector.shape_cast %0 : vector<1x16x128xf32> to vector<16x128xf32>
    %c0_2 = arith.constant 0 : index
    %c0_3 = arith.constant 0 : index
    %2 = vector.load %arg3[%c0_2, %c0_3] : memref<2x128xf32, #tpu.memory_space<vmem>>, vector<1x128xf32>
    %c1 = arith.constant 1 : index
    %c0_4 = arith.constant 0 : index
    %3 = vector.load %arg3[%c1, %c0_4] : memref<2x128xf32, #tpu.memory_space<vmem>>, vector<1x128xf32>
    %cst = arith.constant dense<0.000000e+00> : vector<16xf32>
    %4 = vector.multi_reduction <add>, %1, %cst [1] : vector<16x128xf32> to vector<16xf32>
    %5 = vector.shape_cast %4 : vector<16xf32> to vector<16x1xf32>
    %cst_5 = arith.constant 1.280000e+02 : f32
    %6 = vector.broadcast %cst_5 : f32 to vector<16x1xf32>
    %7 = arith.divf %5, %6 : vector<16x1xf32>
    %8 = vector.broadcast %7 : vector<16x1xf32> to vector<16x128xf32>
    %9 = arith.subf %1, %8 : vector<16x128xf32>
    %10 = arith.mulf %9, %9 : vector<16x128xf32>
    %cst_6 = arith.constant dense<0.000000e+00> : vector<16xf32>
    %11 = vector.multi_reduction <add>, %10, %cst_6 [1] : vector<16x128xf32> to vector<16xf32>
    %12 = vector.shape_cast %11 : vector<16xf32> to vector<16x1xf32>
    %cst_7 = arith.constant 1.280000e+02 : f32
    %13 = vector.broadcast %cst_7 : f32 to vector<16x1xf32>
    %14 = arith.divf %12, %13 : vector<16x1xf32>
    %15 = vector.broadcast %7 : vector<16x1xf32> to vector<16x128xf32>
    %16 = arith.subf %1, %15 : vector<16x128xf32>
    %cst_8 = arith.constant 9.99999974E-6 : f32
    %17 = vector.broadcast %cst_8 : f32 to vector<16x1xf32>
    %18 = arith.addf %14, %17 : vector<16x1xf32>
    %19 = math.rsqrt %18 : vector<16x1xf32>
    %20 = vector.broadcast %19 : vector<16x1xf32> to vector<16x128xf32>
    %21 = arith.mulf %16, %20 : vector<16x128xf32>
    %22 = vector.broadcast %2 : vector<1x128xf32> to vector<16x128xf32>
    %23 = arith.mulf %21, %22 : vector<16x128xf32>
    %24 = vector.broadcast %3 : vector<1x128xf32> to vector<16x128xf32>
    %25 = arith.addf %23, %24 : vector<16x128xf32>
    %26 = arith.truncf %25 : vector<16x128xf32> to vector<16x128xbf16>
    %c0_9 = arith.constant 0 : index
    %c0_10 = arith.constant 0 : index
    %27 = vector.load %arg4[%c0_9, %c0_10] : memref<128x384xbf16, #tpu.memory_space<vmem>>, vector<128x384xbf16>
    %cst_11 = arith.constant dense<0.000000e+00> : vector<16x384xf32>
    %28 = tpu.matmul %26, %27, %cst_11 {dimension_numbers = #tpu.dot_dimension_numbers<[1], [0], [0], [1], [0, 0, 1, 1], [], []>} : vector<16x128xbf16>, vector<128x384xbf16>, vector<16x384xf32> -> vector<16x384xf32>
    %c0_12 = arith.constant 0 : index
    %c0_13 = arith.constant 0 : index
    %29 = vector.load %arg5[%c0_12, %c0_13] : memref<1x384xf32, #tpu.memory_space<vmem>>, vector<1x384xf32>
    %30 = vector.broadcast %29 : vector<1x384xf32> to vector<16x384xf32>
    %31 = arith.addf %28, %30 : vector<16x384xf32>
    %32 = arith.truncf %31 : vector<16x384xf32> to vector<16x384xbf16>
    %c0_14 = arith.constant 0 : index
    %c0_15 = arith.constant 0 : index
    %c0_16 = arith.constant 0 : index
    %33 = vector.load %arg2[%c0_14, %c0_15, %c0_16] : memref<1x16x16xf32, #tpu.memory_space<vmem>>, vector<1x16x16xf32>
    %34 = vector.shape_cast %33 : vector<1x16x16xf32> to vector<16x16xf32>
    %35 = vector.extract_strided_slice %32 {offsets = [0, 0], sizes = [16, 32], strides = [1, 1]} : vector<16x384xbf16> to vector<16x32xbf16>
    %36 = vector.extract_strided_slice %32 {offsets = [0, 128], sizes = [16, 32], strides = [1, 1]} : vector<16x384xbf16> to vector<16x32xbf16>
    %37 = vector.extract_strided_slice %32 {offsets = [0, 256], sizes = [16, 32], strides = [1, 1]} : vector<16x384xbf16> to vector<16x32xbf16>
    %cst_17 = arith.constant dense<0.000000e+00> : vector<16x16xf32>
    %38 = tpu.matmul %35, %36, %cst_17 {dimension_numbers = #tpu.dot_dimension_numbers<[1], [1], [0], [0], [0, 0, 1, 0], [], []>} : vector<16x32xbf16>, vector<16x32xbf16>, vector<16x16xf32> -> vector<16x16xf32>
    %39 = arith.addf %38, %34 : vector<16x16xf32>
    %cst_18 = arith.constant dense<0xFF800000> : vector<16xf32>
    %40 = vector.multi_reduction <maximumf>, %39, %cst_18 [1] : vector<16x16xf32> to vector<16xf32>
    %41 = vector.shape_cast %40 : vector<16xf32> to vector<16x1xf32>
    %42 = vector.broadcast %41 : vector<16x1xf32> to vector<16x16xf32>
    %43 = arith.subf %39, %42 : vector<16x16xf32>
    %44 = math.exp %43 : vector<16x16xf32>
    %cst_19 = arith.constant dense<0.000000e+00> : vector<16xf32>
    %45 = vector.multi_reduction <add>, %44, %cst_19 [1] : vector<16x16xf32> to vector<16xf32>
    %46 = vector.shape_cast %45 : vector<16xf32> to vector<16x1xf32>
    %47 = tpu.reciprocal %46 {approx = true} : vector<16x1xf32> -> vector<16x1xf32>
    %48 = vector.broadcast %47 : vector<16x1xf32> to vector<16x16xf32>
    %49 = arith.mulf %44, %48 : vector<16x16xf32>
    %50 = arith.truncf %49 : vector<16x16xf32> to vector<16x16xbf16>
    %cst_20 = arith.constant dense<0.000000e+00> : vector<16x32xf32>
    %51 = tpu.matmul %50, %37, %cst_20 {dimension_numbers = #tpu.dot_dimension_numbers<[1], [0], [0], [1], [0, 0, 1, 1], [], []>} : vector<16x16xbf16>, vector<16x32xbf16>, vector<16x32xf32> -> vector<16x32xf32>
    %52 = vector.extract_strided_slice %32 {offsets = [0, 32], sizes = [16, 32], strides = [1, 1]} : vector<16x384xbf16> to vector<16x32xbf16>
    %53 = vector.extract_strided_slice %32 {offsets = [0, 160], sizes = [16, 32], strides = [1, 1]} : vector<16x384xbf16> to vector<16x32xbf16>
    %54 = vector.extract_strided_slice %32 {offsets = [0, 288], sizes = [16, 32], strides = [1, 1]} : vector<16x384xbf16> to vector<16x32xbf16>
    %cst_21 = arith.constant dense<0.000000e+00> : vector<16x16xf32>
    %55 = tpu.matmul %52, %53, %cst_21 {dimension_numbers = #tpu.dot_dimension_numbers<[1], [1], [0], [0], [0, 0, 1, 0], [], []>} : vector<16x32xbf16>, vector<16x32xbf16>, vector<16x16xf32> -> vector<16x16xf32>
    %56 = arith.addf %55, %34 : vector<16x16xf32>
    %cst_22 = arith.constant dense<0xFF800000> : vector<16xf32>
    %57 = vector.multi_reduction <maximumf>, %56, %cst_22 [1] : vector<16x16xf32> to vector<16xf32>
    %58 = vector.shape_cast %57 : vector<16xf32> to vector<16x1xf32>
    %59 = vector.broadcast %58 : vector<16x1xf32> to vector<16x16xf32>
    %60 = arith.subf %56, %59 : vector<16x16xf32>
    %61 = math.exp %60 : vector<16x16xf32>
    %cst_23 = arith.constant dense<0.000000e+00> : vector<16xf32>
    %62 = vector.multi_reduction <add>, %61, %cst_23 [1] : vector<16x16xf32> to vector<16xf32>
    %63 = vector.shape_cast %62 : vector<16xf32> to vector<16x1xf32>
    %64 = tpu.reciprocal %63 {approx = true} : vector<16x1xf32> -> vector<16x1xf32>
    %65 = vector.broadcast %64 : vector<16x1xf32> to vector<16x16xf32>
    %66 = arith.mulf %61, %65 : vector<16x16xf32>
    %67 = arith.truncf %66 : vector<16x16xf32> to vector<16x16xbf16>
    %cst_24 = arith.constant dense<0.000000e+00> : vector<16x32xf32>
    %68 = tpu.matmul %67, %54, %cst_24 {dimension_numbers = #tpu.dot_dimension_numbers<[1], [0], [0], [1], [0, 0, 1, 1], [], []>} : vector<16x16xbf16>, vector<16x32xbf16>, vector<16x32xf32> -> vector<16x32xf32>
    %69 = vector.extract_strided_slice %32 {offsets = [0, 64], sizes = [16, 32], strides = [1, 1]} : vector<16x384xbf16> to vector<16x32xbf16>
    %70 = vector.extract_strided_slice %32 {offsets = [0, 192], sizes = [16, 32], strides = [1, 1]} : vector<16x384xbf16> to vector<16x32xbf16>
    %71 = vector.extract_strided_slice %32 {offsets = [0, 320], sizes = [16, 32], strides = [1, 1]} : vector<16x384xbf16> to vector<16x32xbf16>
    %cst_25 = arith.constant dense<0.000000e+00> : vector<16x16xf32>
    %72 = tpu.matmul %69, %70, %cst_25 {dimension_numbers = #tpu.dot_dimension_numbers<[1], [1], [0], [0], [0, 0, 1, 0], [], []>} : vector<16x32xbf16>, vector<16x32xbf16>, vector<16x16xf32> -> vector<16x16xf32>
    %73 = arith.addf %72, %34 : vector<16x16xf32>
    %cst_26 = arith.constant dense<0xFF800000> : vector<16xf32>
    %74 = vector.multi_reduction <maximumf>, %73, %cst_26 [1] : vector<16x16xf32> to vector<16xf32>
    %75 = vector.shape_cast %74 : vector<16xf32> to vector<16x1xf32>
    %76 = vector.broadcast %75 : vector<16x1xf32> to vector<16x16xf32>
    %77 = arith.subf %73, %76 : vector<16x16xf32>
    %78 = math.exp %77 : vector<16x16xf32>
    %cst_27 = arith.constant dense<0.000000e+00> : vector<16xf32>
    %79 = vector.multi_reduction <add>, %78, %cst_27 [1] : vector<16x16xf32> to vector<16xf32>
    %80 = vector.shape_cast %79 : vector<16xf32> to vector<16x1xf32>
    %81 = tpu.reciprocal %80 {approx = true} : vector<16x1xf32> -> vector<16x1xf32>
    %82 = vector.broadcast %81 : vector<16x1xf32> to vector<16x16xf32>
    %83 = arith.mulf %78, %82 : vector<16x16xf32>
    %84 = arith.truncf %83 : vector<16x16xf32> to vector<16x16xbf16>
    %cst_28 = arith.constant dense<0.000000e+00> : vector<16x32xf32>
    %85 = tpu.matmul %84, %71, %cst_28 {dimension_numbers = #tpu.dot_dimension_numbers<[1], [0], [0], [1], [0, 0, 1, 1], [], []>} : vector<16x16xbf16>, vector<16x32xbf16>, vector<16x32xf32> -> vector<16x32xf32>
    %86 = vector.extract_strided_slice %32 {offsets = [0, 96], sizes = [16, 32], strides = [1, 1]} : vector<16x384xbf16> to vector<16x32xbf16>
    %87 = vector.extract_strided_slice %32 {offsets = [0, 224], sizes = [16, 32], strides = [1, 1]} : vector<16x384xbf16> to vector<16x32xbf16>
    %88 = vector.extract_strided_slice %32 {offsets = [0, 352], sizes = [16, 32], strides = [1, 1]} : vector<16x384xbf16> to vector<16x32xbf16>
    %cst_29 = arith.constant dense<0.000000e+00> : vector<16x16xf32>
    %89 = tpu.matmul %86, %87, %cst_29 {dimension_numbers = #tpu.dot_dimension_numbers<[1], [1], [0], [0], [0, 0, 1, 0], [], []>} : vector<16x32xbf16>, vector<16x32xbf16>, vector<16x16xf32> -> vector<16x16xf32>
    %90 = arith.addf %89, %34 : vector<16x16xf32>
    %cst_30 = arith.constant dense<0xFF800000> : vector<16xf32>
    %91 = vector.multi_reduction <maximumf>, %90, %cst_30 [1] : vector<16x16xf32> to vector<16xf32>
    %92 = vector.shape_cast %91 : vector<16xf32> to vector<16x1xf32>
    %93 = vector.broadcast %92 : vector<16x1xf32> to vector<16x16xf32>
    %94 = arith.subf %90, %93 : vector<16x16xf32>
    %95 = math.exp %94 : vector<16x16xf32>
    %cst_31 = arith.constant dense<0.000000e+00> : vector<16xf32>
    %96 = vector.multi_reduction <add>, %95, %cst_31 [1] : vector<16x16xf32> to vector<16xf32>
    %97 = vector.shape_cast %96 : vector<16xf32> to vector<16x1xf32>
    %98 = tpu.reciprocal %97 {approx = true} : vector<16x1xf32> -> vector<16x1xf32>
    %99 = vector.broadcast %98 : vector<16x1xf32> to vector<16x16xf32>
    %100 = arith.mulf %95, %99 : vector<16x16xf32>
    %101 = arith.truncf %100 : vector<16x16xf32> to vector<16x16xbf16>
    %cst_32 = arith.constant dense<0.000000e+00> : vector<16x32xf32>
    %102 = tpu.matmul %101, %88, %cst_32 {dimension_numbers = #tpu.dot_dimension_numbers<[1], [0], [0], [1], [0, 0, 1, 1], [], []>} : vector<16x16xbf16>, vector<16x32xbf16>, vector<16x32xf32> -> vector<16x32xf32>
    %103 = tpu.concatenate %51, %68, %85, %102 in 1 : vector<16x32xf32>, vector<16x32xf32>, vector<16x32xf32>, vector<16x32xf32> -> vector<16x128xf32>
    %104 = arith.truncf %103 : vector<16x128xf32> to vector<16x128xbf16>
    %c0_33 = arith.constant 0 : index
    %c0_34 = arith.constant 0 : index
    %105 = vector.load %arg6[%c0_33, %c0_34] : memref<128x128xbf16, #tpu.memory_space<vmem>>, vector<128x128xbf16>
    %cst_35 = arith.constant dense<0.000000e+00> : vector<16x128xf32>
    %106 = tpu.matmul %104, %105, %cst_35 {dimension_numbers = #tpu.dot_dimension_numbers<[1], [0], [0], [1], [0, 0, 1, 1], [], []>} : vector<16x128xbf16>, vector<128x128xbf16>, vector<16x128xf32> -> vector<16x128xf32>
    %107 = arith.addf %1, %106 : vector<16x128xf32>
    %c0_36 = arith.constant 0 : index
    %c0_37 = arith.constant 0 : index
    %108 = vector.load %arg7[%c0_36, %c0_37] : memref<1x128xf32, #tpu.memory_space<vmem>>, vector<1x128xf32>
    %109 = vector.broadcast %108 : vector<1x128xf32> to vector<16x128xf32>
    %110 = arith.addf %107, %109 : vector<16x128xf32>
    %c0_38 = arith.constant 0 : index
    %c0_39 = arith.constant 0 : index
    %111 = vector.load %arg8[%c0_38, %c0_39] : memref<2x128xf32, #tpu.memory_space<vmem>>, vector<1x128xf32>
    %c1_40 = arith.constant 1 : index
    %c0_41 = arith.constant 0 : index
    %112 = vector.load %arg8[%c1_40, %c0_41] : memref<2x128xf32, #tpu.memory_space<vmem>>, vector<1x128xf32>
    %cst_42 = arith.constant dense<0.000000e+00> : vector<16xf32>
    %113 = vector.multi_reduction <add>, %110, %cst_42 [1] : vector<16x128xf32> to vector<16xf32>
    %114 = vector.shape_cast %113 : vector<16xf32> to vector<16x1xf32>
    %cst_43 = arith.constant 1.280000e+02 : f32
    %115 = vector.broadcast %cst_43 : f32 to vector<16x1xf32>
    %116 = arith.divf %114, %115 : vector<16x1xf32>
    %117 = vector.broadcast %116 : vector<16x1xf32> to vector<16x128xf32>
    %118 = arith.subf %110, %117 : vector<16x128xf32>
    %119 = arith.mulf %118, %118 : vector<16x128xf32>
    %cst_44 = arith.constant dense<0.000000e+00> : vector<16xf32>
    %120 = vector.multi_reduction <add>, %119, %cst_44 [1] : vector<16x128xf32> to vector<16xf32>
    %121 = vector.shape_cast %120 : vector<16xf32> to vector<16x1xf32>
    %cst_45 = arith.constant 1.280000e+02 : f32
    %122 = vector.broadcast %cst_45 : f32 to vector<16x1xf32>
    %123 = arith.divf %121, %122 : vector<16x1xf32>
    %124 = vector.broadcast %116 : vector<16x1xf32> to vector<16x128xf32>
    %125 = arith.subf %110, %124 : vector<16x128xf32>
    %cst_46 = arith.constant 9.99999974E-6 : f32
    %126 = vector.broadcast %cst_46 : f32 to vector<16x1xf32>
    %127 = arith.addf %123, %126 : vector<16x1xf32>
    %128 = math.rsqrt %127 : vector<16x1xf32>
    %129 = vector.broadcast %128 : vector<16x1xf32> to vector<16x128xf32>
    %130 = arith.mulf %125, %129 : vector<16x128xf32>
    %131 = vector.broadcast %111 : vector<1x128xf32> to vector<16x128xf32>
    %132 = arith.mulf %130, %131 : vector<16x128xf32>
    %133 = vector.broadcast %112 : vector<1x128xf32> to vector<16x128xf32>
    %134 = arith.addf %132, %133 : vector<16x128xf32>
    %135 = arith.truncf %134 : vector<16x128xf32> to vector<16x128xbf16>
    %c0_47 = arith.constant 0 : index
    %c0_48 = arith.constant 0 : index
    %136 = vector.load %arg9[%c0_47, %c0_48] : memref<128x512xbf16, #tpu.memory_space<vmem>>, vector<128x512xbf16>
    %cst_49 = arith.constant dense<0.000000e+00> : vector<16x512xf32>
    %137 = tpu.matmul %135, %136, %cst_49 {dimension_numbers = #tpu.dot_dimension_numbers<[1], [0], [0], [1], [0, 0, 1, 1], [], []>} : vector<16x128xbf16>, vector<128x512xbf16>, vector<16x512xf32> -> vector<16x512xf32>
    %c0_50 = arith.constant 0 : index
    %c0_51 = arith.constant 0 : index
    %138 = vector.load %arg10[%c0_50, %c0_51] : memref<1x512xf32, #tpu.memory_space<vmem>>, vector<1x512xf32>
    %139 = vector.broadcast %138 : vector<1x512xf32> to vector<16x512xf32>
    %140 = arith.addf %137, %139 : vector<16x512xf32>
    %141 = arith.mulf %140, %140 : vector<16x512xf32>
    %142 = arith.mulf %140, %141 : vector<16x512xf32>
    %cst_52 = arith.constant 4.471500e-02 : f32
    %143 = vector.broadcast %cst_52 : f32 to vector<16x512xf32>
    %144 = arith.mulf %143, %142 : vector<16x512xf32>
    %145 = arith.addf %140, %144 : vector<16x512xf32>
    %cst_53 = arith.constant 0.797884583 : f32
    %146 = vector.broadcast %cst_53 : f32 to vector<16x512xf32>
    %147 = arith.mulf %146, %145 : vector<16x512xf32>
    %148 = math.tanh %147 : vector<16x512xf32>
    %cst_54 = arith.constant 1.000000e+00 : f32
    %149 = vector.broadcast %cst_54 : f32 to vector<16x512xf32>
    %150 = arith.addf %149, %148 : vector<16x512xf32>
    %cst_55 = arith.constant 5.000000e-01 : f32
    %151 = vector.broadcast %cst_55 : f32 to vector<16x512xf32>
    %152 = arith.mulf %151, %150 : vector<16x512xf32>
    %153 = arith.mulf %140, %152 : vector<16x512xf32>
    %154 = arith.truncf %153 : vector<16x512xf32> to vector<16x512xbf16>
    %c0_56 = arith.constant 0 : index
    %c0_57 = arith.constant 0 : index
    %155 = vector.load %arg11[%c0_56, %c0_57] : memref<512x128xbf16, #tpu.memory_space<vmem>>, vector<512x128xbf16>
    %cst_58 = arith.constant dense<0.000000e+00> : vector<16x128xf32>
    %156 = tpu.matmul %154, %155, %cst_58 {dimension_numbers = #tpu.dot_dimension_numbers<[1], [0], [0], [1], [0, 0, 1, 1], [], []>} : vector<16x512xbf16>, vector<512x128xbf16>, vector<16x128xf32> -> vector<16x128xf32>
    %c0_59 = arith.constant 0 : index
    %c0_60 = arith.constant 0 : index
    %157 = vector.load %arg12[%c0_59, %c0_60] : memref<1x128xf32, #tpu.memory_space<vmem>>, vector<1x128xf32>
    %158 = vector.broadcast %157 : vector<1x128xf32> to vector<16x128xf32>
    %159 = arith.addf %156, %158 : vector<16x128xf32>
    %160 = arith.addf %110, %159 : vector<16x128xf32>
    %c0_61 = arith.constant 0 : index
    %c0_62 = arith.constant 0 : index
    %c0_63 = arith.constant 0 : index
    %161 = vector.load %arg13[%c0_61, %c0_62, %c0_63] : memref<1x16x128xf32, #tpu.memory_space<vmem>>, vector<1x16x128xf32>
    %162 = vector.shape_cast %161 : vector<1x16x128xf32> to vector<16x128xf32>
    %163 = vector.shape_cast %160 : vector<16x128xf32> to vector<1x16x128xf32>
    tpu.vector_store %arg13[%c0_61, %c0_62, %c0_63], %163 {strides = array<i32>} : memref<1x16x128xf32, #tpu.memory_space<vmem>>, vector<1x16x128xf32>,
    return
  }
  func.func @transform_0(%arg0: i32) -> (i32, i32, i32) {
    %c0_i32 = arith.constant 0 : i32
    %c0_i32_0 = arith.constant 0 : i32
    %c0_i32_1 = arith.constant 0 : i32
    return %arg0, %c0_i32, %c0_i32_0 : i32, i32, i32
  }
  func.func @transform_1(%arg0: i32) -> (i32, i32, i32) {
    %c0_i32 = arith.constant 0 : i32
    %c0_i32_0 = arith.constant 0 : i32
    %c0_i32_1 = arith.constant 0 : i32
    return %arg0, %c0_i32, %c0_i32_0 : i32, i32, i32
  }
  func.func @transform_2(%arg0: i32) -> (i32, i32) {
    %c0_i32 = arith.constant 0 : i32
    %c0_i32_0 = arith.constant 0 : i32
    %c0_i32_1 = arith.constant 0 : i32
    return %c0_i32, %c0_i32_0 : i32, i32
  }
  func.func @transform_3(%arg0: i32) -> (i32, i32) {
    %c0_i32 = arith.constant 0 : i32
    %c0_i32_0 = arith.constant 0 : i32
    %c0_i32_1 = arith.constant 0 : i32
    return %c0_i32, %c0_i32_0 : i32, i32
  }
  func.func @transform_4(%arg0: i32) -> (i32, i32) {
    %c0_i32 = arith.constant 0 : i32
    %c0_i32_0 = arith.constant 0 : i32
    %c0_i32_1 = arith.constant 0 : i32
    return %c0_i32, %c0_i32_0 : i32, i32
  }
  func.func @transform_5(%arg0: i32) -> (i32, i32) {
    %c0_i32 = arith.constant 0 : i32
    %c0_i32_0 = arith.constant 0 : i32
    %c0_i32_1 = arith.constant 0 : i32
    return %c0_i32, %c0_i32_0 : i32, i32
  }
  func.func @transform_6(%arg0: i32) -> (i32, i32) {
    %c0_i32 = arith.constant 0 : i32
    %c0_i32_0 = arith.constant 0 : i32
    %c0_i32_1 = arith.constant 0 : i32
    return %c0_i32, %c0_i32_0 : i32, i32
  }
  func.func @transform_7(%arg0: i32) -> (i32, i32) {
    %c0_i32 = arith.constant 0 : i32
    %c0_i32_0 = arith.constant 0 : i32
    %c0_i32_1 = arith.constant 0 : i32
    return %c0_i32, %c0_i32_0 : i32, i32
  }
  func.func @transform_8(%arg0: i32) -> (i32, i32) {
    %c0_i32 = arith.constant 0 : i32
    %c0_i32_0 = arith.constant 0 : i32
    %c0_i32_1 = arith.constant 0 : i32
    return %c0_i32, %c0_i32_0 : i32, i32
  }
  func.func @transform_9(%arg0: i32) -> (i32, i32) {
    %c0_i32 = arith.constant 0 : i32
    %c0_i32_0 = arith.constant 0 : i32
    %c0_i32_1 = arith.constant 0 : i32
    return %c0_i32, %c0_i32_0 : i32, i32
  }
  func.func @transform_10(%arg0: i32) -> (i32, i32) {
    %c0_i32 = arith.constant 0 : i32
    %c0_i32_0 = arith.constant 0 : i32
    %c0_i32_1 = arith.constant 0 : i32
    return %c0_i32, %c0_i32_0 : i32, i32
  }
  func.func @transform_11(%arg0: i32) -> (i32, i32) {
    %c0_i32 = arith.constant 0 : i32
    %c0_i32_0 = arith.constant 0 : i32
    %c0_i32_1 = arith.constant 0 : i32
    return %c0_i32, %c0_i32_0 : i32, i32
  }
  func.func @transform_12(%arg0: i32) -> (i32, i32, i32) {
    %c0_i32 = arith.constant 0 : i32
    %c0_i32_0 = arith.constant 0 : i32
    %c0_i32_1 = arith.constant 0 : i32
    return %arg0, %c0_i32, %c0_i32_0 : i32, i32, i32
  }
}

module attributes {stable_mosaic.version = 11 : i64} {
  func.func @_layer_kernel(%arg0: i32, %arg1: memref<1x16x128xf32, #tpu.memory_space<vmem>>, %arg2: memref<1x16x16xf32, #tpu.memory_space<vmem>>, %arg3: memref<2x128xf32, #tpu.memory_space<vmem>>, %arg4: memref<128x384xbf16, #tpu.memory_space<vmem>>, %arg5: memref<1x384xf32, #tpu.memory_space<vmem>>, %arg6: memref<128x128xbf16, #tpu.memory_space<vmem>>, %arg7: memref<1x128xf32, #tpu.memory_space<vmem>>, %arg8: memref<2x128xf32, #tpu.memory_space<vmem>>, %arg9: memref<128x512xbf16, #tpu.memory_space<vmem>>, %arg10: memref<1x512xf32, #tpu.memory_space<vmem>>, %arg11: memref<512x128xbf16, #tpu.memory_space<vmem>>, %arg12: memref<1x128xf32, #tpu.memory_space<vmem>>, %arg13: memref<1x16x128xf32, #tpu.memory_space<vmem>>) attributes {dimension_semantics = [#tpu.dimension_semantics<parallel>], iteration_bounds = array<i64: 2>, scalar_prefetch = 0 : i64, scratch_operands = 0 : i64, tpu.core_type = #tpu.core_type<tc>, window_params = [{transform_indices = @transform_0, window_bounds = array<i64: 1, 16, 128>}, {transform_indices = @transform_1, window_bounds = array<i64: 1, 16, 16>}, {pipeline_mode = #tpu.pipeline_mode<synchronous>, transform_indices = @transform_2, window_bounds = array<i64: 2, 128>}, {pipeline_mode = #tpu.pipeline_mode<synchronous>, transform_indices = @transform_3, window_bounds = array<i64: 128, 384>}, {pipeline_mode = #tpu.pipeline_mode<synchronous>, transform_indices = @transform_4, window_bounds = array<i64: 1, 384>}, {pipeline_mode = #tpu.pipeline_mode<synchronous>, transform_indices = @transform_5, window_bounds = array<i64: 128, 128>}, {pipeline_mode = #tpu.pipeline_mode<synchronous>, transform_indices = @transform_6, window_bounds = array<i64: 1, 128>}, {pipeline_mode = #tpu.pipeline_mode<synchronous>, transform_indices = @transform_7, window_bounds = array<i64: 2, 128>}, {pipeline_mode = #tpu.pipeline_mode<synchronous>, transform_indices = @transform_8, window_bounds = array<i64: 128, 512>}, {pipeline_mode = #tpu.pipeline_mode<synchronous>, transform_indices = @transform_9, window_bounds = array<i64: 1, 512>}, {pipeline_mode = #tpu.pipeline_mode<synchronous>, transform_indices = @transform_10, window_bounds = array<i64: 512, 128>}, {pipeline_mode = #tpu.pipeline_mode<synchronous>, transform_indices = @transform_11, window_bounds = array<i64: 1, 128>}, {transform_indices = @transform_12, window_bounds = array<i64: 1, 16, 128>}]} {
    %c0 = arith.constant 0 : index
    %c0_0 = arith.constant 0 : index
    %c0_1 = arith.constant 0 : index
    %0 = vector.load %arg1[%c0, %c0_0, %c0_1] : memref<1x16x128xf32, #tpu.memory_space<vmem>>, vector<1x16x128xf32>
    %1 = vector.shape_cast %0 : vector<1x16x128xf32> to vector<16x128xf32>
    %c0_2 = arith.constant 0 : index
    %c0_3 = arith.constant 0 : index
    %2 = vector.load %arg3[%c0_2, %c0_3] : memref<2x128xf32, #tpu.memory_space<vmem>>, vector<1x128xf32>
    %c1 = arith.constant 1 : index
    %c0_4 = arith.constant 0 : index
    %3 = vector.load %arg3[%c1, %c0_4] : memref<2x128xf32, #tpu.memory_space<vmem>>, vector<1x128xf32>
    %cst = arith.constant dense<0.000000e+00> : vector<16xf32>
    %4 = vector.multi_reduction <add>, %1, %cst [1] : vector<16x128xf32> to vector<16xf32>
    %5 = vector.shape_cast %4 : vector<16xf32> to vector<16x1xf32>
    %cst_5 = arith.constant 1.280000e+02 : f32
    %6 = vector.broadcast %cst_5 : f32 to vector<16x1xf32>
    %7 = arith.divf %5, %6 : vector<16x1xf32>
    %8 = vector.broadcast %7 : vector<16x1xf32> to vector<16x128xf32>
    %9 = arith.subf %1, %8 : vector<16x128xf32>
    %10 = arith.mulf %9, %9 : vector<16x128xf32>
    %cst_6 = arith.constant dense<0.000000e+00> : vector<16xf32>
    %11 = vector.multi_reduction <add>, %10, %cst_6 [1] : vector<16x128xf32> to vector<16xf32>
    %12 = vector.shape_cast %11 : vector<16xf32> to vector<16x1xf32>
    %cst_7 = arith.constant 1.280000e+02 : f32
    %13 = vector.broadcast %cst_7 : f32 to vector<16x1xf32>
    %14 = arith.divf %12, %13 : vector<16x1xf32>
    %15 = vector.broadcast %7 : vector<16x1xf32> to vector<16x128xf32>
    %16 = arith.subf %1, %15 : vector<16x128xf32>
    %cst_8 = arith.constant 9.99999974E-6 : f32
    %17 = vector.broadcast %cst_8 : f32 to vector<16x1xf32>
    %18 = arith.addf %14, %17 : vector<16x1xf32>
    %19 = math.rsqrt %18 : vector<16x1xf32>
    %20 = vector.broadcast %19 : vector<16x1xf32> to vector<16x128xf32>
    %21 = arith.mulf %16, %20 : vector<16x128xf32>
    %22 = vector.broadcast %2 : vector<1x128xf32> to vector<16x128xf32>
    %23 = arith.mulf %21, %22 : vector<16x128xf32>
    %24 = vector.broadcast %3 : vector<1x128xf32> to vector<16x128xf32>
    %25 = arith.addf %23, %24 : vector<16x128xf32>
    %26 = arith.truncf %25 : vector<16x128xf32> to vector<16x128xbf16>
    %c0_9 = arith.constant 0 : index
    %c0_10 = arith.constant 0 : index
    %27 = vector.load %arg4[%c0_9, %c0_10] : memref<128x384xbf16, #tpu.memory_space<vmem>>, vector<128x384xbf16>
    %cst_11 = arith.constant dense<0.000000e+00> : vector<16x384xf32>
    %28 = tpu.matmul %26, %27, %cst_11 {dimension_numbers = #tpu.dot_dimension_numbers<[1], [0], [0], [1], [0, 0, 1, 1], [], []>} : vector<16x128xbf16>, vector<128x384xbf16>, vector<16x384xf32> -> vector<16x384xf32>
    %c0_12 = arith.constant 0 : index
    %c0_13 = arith.constant 0 : index
    %29 = vector.load %arg5[%c0_12, %c0_13] : memref<1x384xf32, #tpu.memory_space<vmem>>, vector<1x384xf32>
    %30 = vector.broadcast %29 : vector<1x384xf32> to vector<16x384xf32>
    %31 = arith.addf %28, %30 : vector<16x384xf32>
    %32 = arith.truncf %31 : vector<16x384xf32> to vector<16x384xbf16>
    %c0_14 = arith.constant 0 : index
    %c0_15 = arith.constant 0 : index
    %c0_16 = arith.constant 0 : index
    %33 = vector.load %arg2[%c0_14, %c0_15, %c0_16] : memref<1x16x16xf32, #tpu.memory_space<vmem>>, vector<1x16x16xf32>
    %34 = vector.shape_cast %33 : vector<1x16x16xf32> to vector<16x16xf32>
    %35 = vector.extract_strided_slice %32 {offsets = [0, 0], sizes = [16, 32], strides = [1, 1]} : vector<16x384xbf16> to vector<16x32xbf16>
    %36 = vector.extract_strided_slice %32 {offsets = [0, 128], sizes = [16, 32], strides = [1, 1]} : vector<16x384xbf16> to vector<16x32xbf16>
    %37 = vector.extract_strided_slice %32 {offsets = [0, 256], sizes = [16, 32], strides = [1, 1]} : vector<16x384xbf16> to vector<16x32xbf16>
    %cst_17 = arith.constant dense<0.000000e+00> : vector<16x16xf32>
    %38 = tpu.matmul %35, %36, %cst_17 {dimension_numbers = #tpu.dot_dimension_numbers<[1], [1], [0], [0], [0, 0, 1, 0], [], []>} : vector<16x32xbf16>, vector<16x32xbf16>, vector<16x16xf32> -> vector<16x16xf32>
    %39 = arith.addf %38, %34 : vector<16x16xf32>
    %cst_18 = arith.constant dense<0xFF800000> : vector<16xf32>
    %40 = vector.multi_reduction <maximumf>, %39, %cst_18 [1] : vector<16x16xf32> to vector<16xf32>
    %41 = vector.shape_cast %40 : vector<16xf32> to vector<16x1xf32>
    %42 = vector.broadcast %41 : vector<16x1xf32> to vector<16x16xf32>
    %43 = arith.subf %39, %42 : vector<16x16xf32>
    %44 = math.exp %43 : vector<16x16xf32>
    %cst_19 = arith.constant dense<0.000000e+00> : vector<16xf32>
    %45 = vector.multi_reduction <add>, %44, %cst_19 [1] : vector<16x16xf32> to vector<16xf32>
    %46 = vector.shape_cast %45 : vector<16xf32> to vector<16x1xf32>
    %47 = tpu.reciprocal %46 {approx = true} : vector<16x1xf32> -> vector<16x1xf32>
    %48 = vector.broadcast %47 : vector<16x1xf32> to vector<16x16xf32>
    %49 = arith.mulf %44, %48 : vector<16x16xf32>
    %50 = arith.truncf %49 : vector<16x16xf32> to vector<16x16xbf16>
    %cst_20 = arith.constant dense<0.000000e+00> : vector<16x32xf32>
    %51 = tpu.matmul %50, %37, %cst_20 {dimension_numbers = #tpu.dot_dimension_numbers<[1], [0], [0], [1], [0, 0, 1, 1], [], []>} : vector<16x16xbf16>, vector<16x32xbf16>, vector<16x32xf32> -> vector<16x32xf32>
    %52 = vector.extract_strided_slice %32 {offsets = [0, 32], sizes = [16, 32], strides = [1, 1]} : vector<16x384xbf16> to vector<16x32xbf16>
    %53 = vector.extract_strided_slice %32 {offsets = [0, 160], sizes = [16, 32], strides = [1, 1]} : vector<16x384xbf16> to vector<16x32xbf16>
    %54 = vector.extract_strided_slice %32 {offsets = [0, 288], sizes = [16, 32], strides = [1, 1]} : vector<16x384xbf16> to vector<16x32xbf16>
    %cst_21 = arith.constant dense<0.000000e+00> : vector<16x16xf32>
    %55 = tpu.matmul %52, %53, %cst_21 {dimension_numbers = #tpu.dot_dimension_numbers<[1], [1], [0], [0], [0, 0, 1, 0], [], []>} : vector<16x32xbf16>, vector<16x32xbf16>, vector<16x16xf32> -> vector<16x16xf32>
    %56 = arith.addf %55, %34 : vector<16x16xf32>
    %cst_22 = arith.constant dense<0xFF800000> : vector<16xf32>
    %57 = vector.multi_reduction <maximumf>, %56, %cst_22 [1] : vector<16x16xf32> to vector<16xf32>
    %58 = vector.shape_cast %57 : vector<16xf32> to vector<16x1xf32>
    %59 = vector.broadcast %58 : vector<16x1xf32> to vector<16x16xf32>
    %60 = arith.subf %56, %59 : vector<16x16xf32>
    %61 = math.exp %60 : vector<16x16xf32>
    %cst_23 = arith.constant dense<0.000000e+00> : vector<16xf32>
    %62 = vector.multi_reduction <add>, %61, %cst_23 [1] : vector<16x16xf32> to vector<16xf32>
    %63 = vector.shape_cast %62 : vector<16xf32> to vector<16x1xf32>
    %64 = tpu.reciprocal %63 {approx = true} : vector<16x1xf32> -> vector<16x1xf32>
    %65 = vector.broadcast %64 : vector<16x1xf32> to vector<16x16xf32>
    %66 = arith.mulf %61, %65 : vector<16x16xf32>
    %67 = arith.truncf %66 : vector<16x16xf32> to vector<16x16xbf16>
    %cst_24 = arith.constant dense<0.000000e+00> : vector<16x32xf32>
    %68 = tpu.matmul %67, %54, %cst_24 {dimension_numbers = #tpu.dot_dimension_numbers<[1], [0], [0], [1], [0, 0, 1, 1], [], []>} : vector<16x16xbf16>, vector<16x32xbf16>, vector<16x32xf32> -> vector<16x32xf32>
    %69 = vector.extract_strided_slice %32 {offsets = [0, 64], sizes = [16, 32], strides = [1, 1]} : vector<16x384xbf16> to vector<16x32xbf16>
    %70 = vector.extract_strided_slice %32 {offsets = [0, 192], sizes = [16, 32], strides = [1, 1]} : vector<16x384xbf16> to vector<16x32xbf16>
    %71 = vector.extract_strided_slice %32 {offsets = [0, 320], sizes = [16, 32], strides = [1, 1]} : vector<16x384xbf16> to vector<16x32xbf16>
    %cst_25 = arith.constant dense<0.000000e+00> : vector<16x16xf32>
    %72 = tpu.matmul %69, %70, %cst_25 {dimension_numbers = #tpu.dot_dimension_numbers<[1], [1], [0], [0], [0, 0, 1, 0], [], []>} : vector<16x32xbf16>, vector<16x32xbf16>, vector<16x16xf32> -> vector<16x16xf32>
    %73 = arith.addf %72, %34 : vector<16x16xf32>
    %cst_26 = arith.constant dense<0xFF800000> : vector<16xf32>
    %74 = vector.multi_reduction <maximumf>, %73, %cst_26 [1] : vector<16x16xf32> to vector<16xf32>
    %75 = vector.shape_cast %74 : vector<16xf32> to vector<16x1xf32>
    %76 = vector.broadcast %75 : vector<16x1xf32> to vector<16x16xf32>
    %77 = arith.subf %73, %76 : vector<16x16xf32>
    %78 = math.exp %77 : vector<16x16xf32>
    %cst_27 = arith.constant dense<0.000000e+00> : vector<16xf32>
    %79 = vector.multi_reduction <add>, %78, %cst_27 [1] : vector<16x16xf32> to vector<16xf32>
    %80 = vector.shape_cast %79 : vector<16xf32> to vector<16x1xf32>
    %81 = tpu.reciprocal %80 {approx = true} : vector<16x1xf32> -> vector<16x1xf32>
    %82 = vector.broadcast %81 : vector<16x1xf32> to vector<16x16xf32>
    %83 = arith.mulf %78, %82 : vector<16x16xf32>
    %84 = arith.truncf %83 : vector<16x16xf32> to vector<16x16xbf16>
    %cst_28 = arith.constant dense<0.000000e+00> : vector<16x32xf32>
    %85 = tpu.matmul %84, %71, %cst_28 {dimension_numbers = #tpu.dot_dimension_numbers<[1], [0], [0], [1], [0, 0, 1, 1], [], []>} : vector<16x16xbf16>, vector<16x32xbf16>, vector<16x32xf32> -> vector<16x32xf32>
    %86 = vector.extract_strided_slice %32 {offsets = [0, 96], sizes = [16, 32], strides = [1, 1]} : vector<16x384xbf16> to vector<16x32xbf16>
    %87 = vector.extract_strided_slice %32 {offsets = [0, 224], sizes = [16, 32], strides = [1, 1]} : vector<16x384xbf16> to vector<16x32xbf16>
    %88 = vector.extract_strided_slice %32 {offsets = [0, 352], sizes = [16, 32], strides = [1, 1]} : vector<16x384xbf16> to vector<16x32xbf16>
    %cst_29 = arith.constant dense<0.000000e+00> : vector<16x16xf32>
    %89 = tpu.matmul %86, %87, %cst_29 {dimension_numbers = #tpu.dot_dimension_numbers<[1], [1], [0], [0], [0, 0, 1, 0], [], []>} : vector<16x32xbf16>, vector<16x32xbf16>, vector<16x16xf32> -> vector<16x16xf32>
    %90 = arith.addf %89, %34 : vector<16x16xf32>
    %cst_30 = arith.constant dense<0xFF800000> : vector<16xf32>
    %91 = vector.multi_reduction <maximumf>, %90, %cst_30 [1] : vector<16x16xf32> to vector<16xf32>
    %92 = vector.shape_cast %91 : vector<16xf32> to vector<16x1xf32>
    %93 = vector.broadcast %92 : vector<16x1xf32> to vector<16x16xf32>
    %94 = arith.subf %90, %93 : vector<16x16xf32>
    %95 = math.exp %94 : vector<16x16xf32>
    %cst_31 = arith.constant dense<0.000000e+00> : vector<16xf32>
    %96 = vector.multi_reduction <add>, %95, %cst_31 [1] : vector<16x16xf32> to vector<16xf32>
    %97 = vector.shape_cast %96 : vector<16xf32> to vector<16x1xf32>
    %98 = tpu.reciprocal %97 {approx = true} : vector<16x1xf32> -> vector<16x1xf32>
    %99 = vector.broadcast %98 : vector<16x1xf32> to vector<16x16xf32>
    %100 = arith.mulf %95, %99 : vector<16x16xf32>
    %101 = arith.truncf %100 : vector<16x16xf32> to vector<16x16xbf16>
    %cst_32 = arith.constant dense<0.000000e+00> : vector<16x32xf32>
    %102 = tpu.matmul %101, %88, %cst_32 {dimension_numbers = #tpu.dot_dimension_numbers<[1], [0], [0], [1], [0, 0, 1, 1], [], []>} : vector<16x16xbf16>, vector<16x32xbf16>, vector<16x32xf32> -> vector<16x32xf32>
    %103 = tpu.concatenate %51, %68, %85, %102 in 1 : vector<16x32xf32>, vector<16x32xf32>, vector<16x32xf32>, vector<16x32xf32> -> vector<16x128xf32>
    %104 = arith.truncf %103 : vector<16x128xf32> to vector<16x128xbf16>
    %c0_33 = arith.constant 0 : index
    %c0_34 = arith.constant 0 : index
    %105 = vector.load %arg6[%c0_33, %c0_34] : memref<128x128xbf16, #tpu.memory_space<vmem>>, vector<128x128xbf16>
    %cst_35 = arith.constant dense<0.000000e+00> : vector<16x128xf32>
    %106 = tpu.matmul %104, %105, %cst_35 {dimension_numbers = #tpu.dot_dimension_numbers<[1], [0], [0], [1], [0, 0, 1, 1], [], []>} : vector<16x128xbf16>, vector<128x128xbf16>, vector<16x128xf32> -> vector<16x128xf32>
    %107 = arith.addf %1, %106 : vector<16x128xf32>
    %c0_36 = arith.constant 0 : index
    %c0_37 = arith.constant 0 : index
    %108 = vector.load %arg7[%c0_36, %c0_37] : memref<1x128xf32, #tpu.memory_space<vmem>>, vector<1x128xf32>
    %109 = vector.broadcast %108 : vector<1x128xf32> to vector<16x128xf32>
    %110 = arith.addf %107, %109 : vector<16x128xf32>
    %c0_38 = arith.constant 0 : index
    %c0_39 = arith.constant 0 : index
    %111 = vector.load %arg8[%c0_38, %c0_39] : memref<2x128xf32, #tpu.memory_space<vmem>>, vector<1x128xf32>
    %c1_40 = arith.constant 1 : index
    %c0_41 = arith.constant 0 : index
    %112 = vector.load %arg8[%c1_40, %c0_41] : memref<2x128xf32, #tpu.memory_space<vmem>>, vector<1x128xf32>
    %cst_42 = arith.constant dense<0.000000e+00> : vector<16xf32>
    %113 = vector.multi_reduction <add>, %110, %cst_42 [1] : vector<16x128xf32> to vector<16xf32>
    %114 = vector.shape_cast %113 : vector<16xf32> to vector<16x1xf32>
    %cst_43 = arith.constant 1.280000e+02 : f32
    %115 = vector.broadcast %cst_43 : f32 to vector<16x1xf32>
    %116 = arith.divf %114, %115 : vector<16x1xf32>
    %117 = vector.broadcast %116 : vector<16x1xf32> to vector<16x128xf32>
    %118 = arith.subf %110, %117 : vector<16x128xf32>
    %119 = arith.mulf %118, %118 : vector<16x128xf32>
    %cst_44 = arith.constant dense<0.000000e+00> : vector<16xf32>
    %120 = vector.multi_reduction <add>, %119, %cst_44 [1] : vector<16x128xf32> to vector<16xf32>
    %121 = vector.shape_cast %120 : vector<16xf32> to vector<16x1xf32>
    %cst_45 = arith.constant 1.280000e+02 : f32
    %122 = vector.broadcast %cst_45 : f32 to vector<16x1xf32>
    %123 = arith.divf %121, %122 : vector<16x1xf32>
    %124 = vector.broadcast %116 : vector<16x1xf32> to vector<16x128xf32>
    %125 = arith.subf %110, %124 : vector<16x128xf32>
    %cst_46 = arith.constant 9.99999974E-6 : f32
    %126 = vector.broadcast %cst_46 : f32 to vector<16x1xf32>
    %127 = arith.addf %123, %126 : vector<16x1xf32>
    %128 = math.rsqrt %127 : vector<16x1xf32>
    %129 = vector.broadcast %128 : vector<16x1xf32> to vector<16x128xf32>
    %130 = arith.mulf %125, %129 : vector<16x128xf32>
    %131 = vector.broadcast %111 : vector<1x128xf32> to vector<16x128xf32>
    %132 = arith.mulf %130, %131 : vector<16x128xf32>
    %133 = vector.broadcast %112 : vector<1x128xf32> to vector<16x128xf32>
    %134 = arith.addf %132, %133 : vector<16x128xf32>
    %135 = arith.truncf %134 : vector<16x128xf32> to vector<16x128xbf16>
    %c0_47 = arith.constant 0 : index
    %c0_48 = arith.constant 0 : index
    %136 = vector.load %arg9[%c0_47, %c0_48] : memref<128x512xbf16, #tpu.memory_space<vmem>>, vector<128x512xbf16>
    %cst_49 = arith.constant dense<0.000000e+00> : vector<16x512xf32>
    %137 = tpu.matmul %135, %136, %cst_49 {dimension_numbers = #tpu.dot_dimension_numbers<[1], [0], [0], [1], [0, 0, 1, 1], [], []>} : vector<16x128xbf16>, vector<128x512xbf16>, vector<16x512xf32> -> vector<16x512xf32>
    %c0_50 = arith.constant 0 : index
    %c0_51 = arith.constant 0 : index
    %138 = vector.load %arg10[%c0_50, %c0_51] : memref<1x512xf32, #tpu.memory_space<vmem>>, vector<1x512xf32>
    %139 = vector.broadcast %138 : vector<1x512xf32> to vector<16x512xf32>
    %140 = arith.addf %137, %139 : vector<16x512xf32>
    %141 = arith.mulf %140, %140 : vector<16x512xf32>
    %142 = arith.mulf %140, %141 : vector<16x512xf32>
    %cst_52 = arith.constant 4.471500e-02 : f32
    %143 = vector.broadcast %cst_52 : f32 to vector<16x512xf32>
    %144 = arith.mulf %143, %142 : vector<16x512xf32>
    %145 = arith.addf %140, %144 : vector<16x512xf32>
    %cst_53 = arith.constant 0.797884583 : f32
    %146 = vector.broadcast %cst_53 : f32 to vector<16x512xf32>
    %147 = arith.mulf %146, %145 : vector<16x512xf32>
    %148 = math.tanh %147 : vector<16x512xf32>
    %cst_54 = arith.constant 1.000000e+00 : f32
    %149 = vector.broadcast %cst_54 : f32 to vector<16x512xf32>
    %150 = arith.addf %149, %148 : vector<16x512xf32>
    %cst_55 = arith.constant 5.000000e-01 : f32
    %151 = vector.broadcast %cst_55 : f32 to vector<16x512xf32>
    %152 = arith.mulf %151, %150 : vector<16x512xf32>
    %153 = arith.mulf %140, %152 : vector<16x512xf32>
    %154 = arith.truncf %153 : vector<16x512xf32> to vector<16x512xbf16>
    %c0_56 = arith.constant 0 : index
    %c0_57 = arith.constant 0 : index
    %155 = vector.load %arg11[%c0_56, %c0_57] : memref<512x128xbf16, #tpu.memory_space<vmem>>, vector<512x128xbf16>
    %cst_58 = arith.constant dense<0.000000e+00> : vector<16x128xf32>
    %156 = tpu.matmul %154, %155, %cst_58 {dimension_numbers = #tpu.dot_dimension_numbers<[1], [0], [0], [1], [0, 0, 1, 1], [], []>} : vector<16x512xbf16>, vector<512x128xbf16>, vector<16x128xf32> -> vector<16x128xf32>
    %c0_59 = arith.constant 0 : index
    %c0_60 = arith.constant 0 : index
    %157 = vector.load %arg12[%c0_59, %c0_60] : memref<1x128xf32, #tpu.memory_space<vmem>>, vector<1x128xf32>
    %158 = vector.broadcast %157 : vector<1x128xf32> to vector<16x128xf32>
    %159 = arith.addf %156, %158 : vector<16x128xf32>
    %160 = arith.addf %110, %159 : vector<16x128xf32>
    %c0_61 = arith.constant 0 : index
    %c0_62 = arith.constant 0 : index
    %c0_63 = arith.constant 0 : index
    %161 = vector.load %arg13[%c0_61, %c0_62, %c0_63] : memref<1x16x128xf32, #tpu.memory_space<vmem>>, vector<1x16x128xf32>
    %162 = vector.shape_cast %161 : vector<1x16x128xf32> to vector<16x128xf32>
    %163 = vector.shape_cast %160 : vector<16x128xf32> to vector<1x16x128xf32>
    tpu.vector_store %arg13[%c0_61, %c0_62, %c0_63], %163 {strides = array<i32>} : memref<1x16x128xf32, #tpu.memory_space<vmem>>, vector<1x16x128xf32>,
    return
  }
  func.func @transform_0(%arg0: i32) -> (i32, i32, i32) {
    %c0_i32 = arith.constant 0 : i32
    %c0_i32_0 = arith.constant 0 : i32
    %c0_i32_1 = arith.constant 0 : i32
    return %arg0, %c0_i32, %c0_i32_0 : i32, i32, i32
  }
  func.func @transform_1(%arg0: i32) -> (i32, i32, i32) {
    %c0_i32 = arith.constant 0 : i32
    %c0_i32_0 = arith.constant 0 : i32
    %c0_i32_1 = arith.constant 0 : i32
    return %arg0, %c0_i32, %c0_i32_0 : i32, i32, i32
  }
  func.func @transform_2(%arg0: i32) -> (i32, i32) {
    %c0_i32 = arith.constant 0 : i32
    %c0_i32_0 = arith.constant 0 : i32
    %c0_i32_1 = arith.constant 0 : i32
    return %c0_i32, %c0_i32_0 : i32, i32
  }
  func.func @transform_3(%arg0: i32) -> (i32, i32) {
    %c0_i32 = arith.constant 0 : i32
    %c0_i32_0 = arith.constant 0 : i32
    %c0_i32_1 = arith.constant 0 : i32
    return %c0_i32, %c0_i32_0 : i32, i32
  }
  func.func @transform_4(%arg0: i32) -> (i32, i32) {
    %c0_i32 = arith.constant 0 : i32
    %c0_i32_0 = arith.constant 0 : i32
    %c0_i32_1 = arith.constant 0 : i32
    return %c0_i32, %c0_i32_0 : i32, i32
  }
  func.func @transform_5(%arg0: i32) -> (i32, i32) {
    %c0_i32 = arith.constant 0 : i32
    %c0_i32_0 = arith.constant 0 : i32
    %c0_i32_1 = arith.constant 0 : i32
    return %c0_i32, %c0_i32_0 : i32, i32
  }
  func.func @transform_6(%arg0: i32) -> (i32, i32) {
    %c0_i32 = arith.constant 0 : i32
    %c0_i32_0 = arith.constant 0 : i32
    %c0_i32_1 = arith.constant 0 : i32
    return %c0_i32, %c0_i32_0 : i32, i32
  }
  func.func @transform_7(%arg0: i32) -> (i32, i32) {
    %c0_i32 = arith.constant 0 : i32
    %c0_i32_0 = arith.constant 0 : i32
    %c0_i32_1 = arith.constant 0 : i32
    return %c0_i32, %c0_i32_0 : i32, i32
  }
  func.func @transform_8(%arg0: i32) -> (i32, i32) {
    %c0_i32 = arith.constant 0 : i32
    %c0_i32_0 = arith.constant 0 : i32
    %c0_i32_1 = arith.constant 0 : i32
    return %c0_i32, %c0_i32_0 : i32, i32
  }
  func.func @transform_9(%arg0: i32) -> (i32, i32) {
    %c0_i32 = arith.constant 0 : i32
    %c0_i32_0 = arith.constant 0 : i32
    %c0_i32_1 = arith.constant 0 : i32
    return %c0_i32, %c0_i32_0 : i32, i32
  }
  func.func @transform_10(%arg0: i32) -> (i32, i32) {
    %c0_i32 = arith.constant 0 : i32
    %c0_i32_0 = arith.constant 0 : i32
    %c0_i32_1 = arith.constant 0 : i32
    return %c0_i32, %c0_i32_0 : i32, i32
  }
  func.func @transform_11(%arg0: i32) -> (i32, i32) {
    %c0_i32 = arith.constant 0 : i32
    %c0_i32_0 = arith.constant 0 : i32
    %c0_i32_1 = arith.constant 0 : i32
    return %c0_i32, %c0_i32_0 : i32, i32
  }
  func.func @transform_12(%arg0: i32) -> (i32, i32, i32) {
    %c0_i32 = arith.constant 0 : i32
    %c0_i32_0 = arith.constant 0 : i32
    %c0_i32_1 = arith.constant 0 : i32
    return %arg0, %c0_i32, %c0_i32_0 : i32, i32, i32
  }
}

</mosaic_0001>

<bundles_post_ra>
// kernel: joint_model_forward.5
= control target key start
LH: loop header
LB: loop body
LE: loop exit
PB: predicated region body
PF: predicated region fallthrough
CT: control target
= control target key end

     0   :  { %s590_s15 = smov 0   ;;  %s672_s0 = inlined_call_operand.vmem [shape: f32[2,16,128], index: 0, kind: input, shape index: {}]   ;;  %s673_s1 = inlined_call_operand.vmem [shape: f32[2,128], index: 1, kind: input, shape index: {}]   ;;  %s674_s2 = inlined_call_operand.vmem [shape: bf16[128,256], index: 2, kind: input, shape index: {}]   ;;  %s675_s3 = inlined_call_operand.vmem [shape: f32[2,16,128], index: 3, kind: output, shape index: {0}]   ;;  %s676_s4 = inlined_call_operand.vmem [shape: f32[2,16,256], index: 4, kind: output, shape index: {1}]  }
   0x1 LB: > { %s485_s16 = sadd.s32 4294967295, %s562_s15   ;;  %p489_p0 = scmp.ge.s32.totalorder %s562_s15, 1  ;;  %s562_s15 = sphi %s590_s15, %s15_s15  }
   0x2   : > { %p165_p1 = scmp.lt.s32.totalorder %s562_s15, 3 }
   0x4   : > { %p166_p2 = pnand %p489_p0, %p165_p1 }
   0x5   : > { %p196_p3 = scmp.lt.s32.totalorder (!%p166_p2), %s485_s16, 1  ;;  %v528_v2 = vld [vmem:[%s674_s2 + $0x4] ss:$8 sps:$4 sm:$0xff] (!%p166_p2)   ;;  %v530_v3 = vld [vmem:[%s674_s2] ss:$8 sps:$4 sm:$0xff] (!%p166_p2)   ;;  %v564_v21 = vmov (!%p166_p2), 0  }
   0x6   : > { %169 = sbr.rel (%p166_p2) target bundleno = 550 (0x226), region = 32  ;;  %v531_v4 = vld [vmem:[%s674_s2 + $0x14] ss:$8 sps:$4 sm:$0xff] (!%p166_p2)   ;;  %350 = vmatprep.subr.bf16.mxu0 (!%p166_p2), %v528_v2  ;;  %v533_v13 = vld [vmem:[%s674_s2 + $0x10] ss:$8 sps:$4 sm:$0xff] (!%p166_p2)   ;;  %382 = vmatprep.mubr.bf16.mxu0 (!%p166_p2), %v564_v21 }
   0x7   : > { %351 = vmatpush1.bf16.msra.mxu0 (!%p166_p2), %v530_v3  ;;  %v534_v14 = vld [vmem:[%s674_s2 + $0x24] ss:$8 sps:$4 sm:$0xff] (!%p166_p2)   ;;  %v536_v15 = vld [vmem:[%s674_s2 + $0x20] ss:$8 sps:$4 sm:$0xff] (!%p166_p2)   ;;  %v537_v16 = vld [vmem:[%s674_s2 + $0x34] ss:$8 sps:$4 sm:$0xff] (!%p166_p2)  }
   0x8   : > { %352 = vmatprep.subr.bf16.mxu0 (!%p166_p2), %v531_v4  ;;  %v539_v17 = vld [vmem:[%s674_s2 + $0x30] ss:$8 sps:$4 sm:$0xff] (!%p166_p2)   ;;  %v540_v18 = vld [vmem:[%s674_s2 + $0x44] ss:$8 sps:$4 sm:$0xff] (!%p166_p2)   ;;  %v542_v19 = vld [vmem:[%s674_s2 + $0x40] ss:$8 sps:$4 sm:$0xff] (!%p166_p2)  }
   0x9   : > { %v543_v20 = vld [vmem:[%s674_s2 + $0x54] ss:$8 sps:$4 sm:$0xff] (!%p166_p2)   ;;  %v545_v22 = vld [vmem:[%s674_s2 + $0x50] ss:$8 sps:$4 sm:$0xff] (!%p166_p2)   ;;  %v546_v23 = vld [vmem:[%s674_s2 + $0x64] ss:$8 sps:$4 sm:$0xff] (!%p166_p2)  }
   0xa   : > { %v548_v24 = vld [vmem:[%s674_s2 + $0x60] ss:$8 sps:$4 sm:$0xff] (!%p166_p2)   ;;  %v549_v25 = vld [vmem:[%s674_s2 + $0x74] ss:$8 sps:$4 sm:$0xff] (!%p166_p2)   ;;  %v551_v26 = vld [vmem:[%s674_s2 + $0x70] ss:$8 sps:$4 sm:$0xff] (!%p166_p2)  }
   0xb   : > { %353 = vmatpush1.bf16.msra.mxu0 (!%p166_p2), %v533_v13  ;;  %v496_v34 = vld [vmem:[%s673_s1] ss:$0 sm:$0xff] (!%p166_p2)  ;;  %v497_v36 = vld [vmem:[%s673_s1 + $0x1] ss:$0 sm:$0xff] (!%p166_p2) }
   0xc   : > { %354 = vmatprep.subr.bf16.mxu0 (!%p166_p2), %v534_v14 }
   0xd   : > { %s678_s16 = smov (!%p196_p3, %s485_s16), 1 }
   0xe   : > { %s516_s17 = sshll.u32 %s678_s16, 4  ;;  %s518_s11 = sshll.u32 %s678_s16, 5 }
   0xf   : > { %s200_s20 = scalar_lea.vmem %s672_s0, %s516_s17  ;;  %355 = vmatpush1.bf16.msra.mxu0 %v536_v15  ;;  %s205_s10 = scalar_lea.vmem %s675_s3, %s516_s17 }
  0x10   : > { %v212_v0 = vld [vmem:[%s200_s20] sm:$0xff]  ;;  %v213_v1 = vld [vmem:[%s200_s20 + $0x8] sm:$0xff]  ;;  %356 = vmatprep.subr.bf16.mxu0 %v537_v16  ;;  %s210_s14 = scalar_lea.vmem %s676_s4, %s518_s11 }
  0x11   : > { %216 = vadd.xlane.f32.xlu0 %v212_v0 }
  0x13   : > { %357 = vmatpush1.bf16.msra.mxu0 %v539_v17 }
  0x14   : > { %358 = vmatprep.subr.bf16.mxu0 %v540_v18 }
  0x15   : > { %218 = vadd.xlane.f32.xlu0 %v213_v1 }
  0x17   : > { %359 = vmatpush1.bf16.msra.mxu0 %v542_v19 }
  0x18   : > { %360 = vmatprep.subr.bf16.mxu0 %v543_v20 }
  0x1b   : > { %361 = vmatpush1.bf16.msra.mxu0 %v545_v22 }
  0x1c   : > { %362 = vmatprep.subr.bf16.mxu0 %v546_v23 }
  0x1f   : > { %363 = vmatpush1.bf16.msra.mxu0 %v548_v24 }
  0x20   : > { %364 = vmatprep.subr.bf16.mxu0 %v549_v25 }
  0x23   : > { %365 = vmatpush1.bf16.msra.mxu0 %v551_v26 }
  0x9e   : > { %v217_v5 = vpop.xlane.xlu0 %216 }
  0x9f   : > { %v221_v6 = vmul.f32 0.0078125, %v217_v5 }
  0xa1   : > { %v223_v7 = vsub.f32 %v212_v0, %v221_v6 }
  0xa2   : > { %v219_v8 = vpop.xlane.xlu0 %218 }
  0xa3   : > { %v222_v9 = vmul.f32 0.0078125, %v219_v8  ;;  %v225_v10 = vmul.f32 %v223_v7, %v223_v7 }
  0xa5   : > { %v224_v11 = vsub.f32 %v213_v1, %v222_v9  ;;  %227 = vadd.xlane.f32.xlu1 %v225_v10 }
  0xa7   : > { %v226_v12 = vmul.f32 %v224_v11, %v224_v11 }
  0xa9   : > { %229 = vadd.xlane.f32.xlu1 %v226_v12 }
 0x132   : > { %v228_v27 = vpop.xlane.xlu1 %227 }
 0x133   : > { %v231_v28 = vmul.f32 0.0078125, %v228_v27 }
 0x135   : > { %v233_v29 = vadd.f32 1e-05, %v231_v28 }
 0x136   : > { %v230_v30 = vpop.xlane.xlu1 %229 }
 0x137   : > { %552 = vrsqrt.f32 %v233_v29  ;;  %v232_v31 = vmul.f32 0.0078125, %v230_v30 }
 0x139   : > { %v234_v32 = vadd.f32 1e-05, %v232_v31 }
 0x13b   : > { %554 = vrsqrt.f32 %v234_v32 }
 0x141   : > { %v553_v33 = vpop.eup %552 }
 0x142   : > { %v237_v35 = vmul.f32 %v553_v33, %v223_v7 }
 0x144   : > { %v243_v37 = vmul.f32 %v496_v34, %v237_v35 }
 0x145   : > { %v555_v38 = vpop.eup %554 }
 0x146   : > { %v238_v39 = vmul.f32 %v555_v38, %v224_v11  ;;  %v249_v40 = vadd.f32 %v497_v36, %v243_v37 }
 0x148   : > { %v244_v41 = vmul.f32 %v496_v34, %v238_v39  ;;  %251 = vst [vmem:[%s205_s10] sm:$0xff] %v249_v40 }
 0x14a   : > { %v250_v42 = vadd.f32 %v497_v36, %v244_v41 }
 0x14c   : > { %252 = vst [vmem:[%s205_s10 + $0x8] sm:$0xff] %v250_v42  ;;  %v253_v43 = vpack.c.bf16 %v250_v42, %v249_v40 }
 0x14e   : > { %383 = vmatmul.mubr.bf16.vlgmr.msra.gmra.mrb[0].mxu0 %v253_v43 }
 0x221   : > { %v384_v44 = vpop.f32.mrb[0].mxu0 }
 0x222   : > { %393 = vst [vmem:[%s210_s14] sm:$0xff] %v384_v44  ;;  %v386_v45 = vpop.f32.mrb[1].mxu0 }
 0x223   : > { %394 = vst [vmem:[%s210_s14 + $0x8] sm:$0xff] %v386_v45  ;;  %v388_v46 = vpop.f32.mrb[2].mxu0 }
 0x224   : > { %395 = vst [vmem:[%s210_s14 + $0x10] sm:$0xff] %v388_v46  ;;  %v390_v47 = vpop.f32.mrb[3].mxu0 }
 0x225   : > { %396 = vst [vmem:[%s210_s14 + $0x18] sm:$0xff] %v390_v47 }
 0x226 PF: > { %s15_s15 = sadd.s32 1, %s562_s15  }
 0x227   : > { %p12_p4 = scmp.ge.s32.totalorder %s15_s15, 4  }
 0x229   :  { %14 = sbr.rel (!%p12_p4) target bundleno = 1 (0x1), region = 74 }

// kernel: joint_model_forward.4
= control target key start
LH: loop header
LB: loop body
LE: loop exit
PB: predicated region body
PF: predicated region fallthrough
CT: control target
= control target key end

     0   :  { %s2779_s21 = smov 0   ;;  %s3339_s0 = inlined_call_operand.vmem [shape: f32[2,16,128], index: 0, kind: input, shape index: {}]   ;;  %s3340_s1 = inlined_call_operand.vmem [shape: f32[2,16,16], index: 1, kind: input, shape index: {}]   ;;  %s3341_s2 = inlined_call_operand.vmem [shape: f32[2,128], index: 2, kind: input, shape index: {}]   ;;  %s3342_s3 = inlined_call_operand.vmem [shape: bf16[128,384], index: 3, kind: input, shape index: {}]   ;;  %s3343_s4 = inlined_call_operand.vmem [shape: f32[1,384], index: 4, kind: input, shape index: {}]   ;;  %s3344_s5 = inlined_call_operand.vmem [shape: bf16[128,128], index: 5, kind: input, shape index: {}]   ;;  %s3345_s6 = inlined_call_operand.vmem [shape: f32[1,128], index: 6, kind: input, shape index: {}]   ;;  %s3346_s7 = inlined_call_operand.vmem [shape: f32[2,128], index: 7, kind: input, shape index: {}]   ;;  %s3347_s8 = inlined_call_operand.vmem [shape: bf16[128,512], index: 8, kind: input, shape index: {}]   ;;  %s3348_s9 = inlined_call_operand.vmem [shape: f32[1,512], index: 9, kind: input, shape index: {}]   ;;  %s3349_s10 = inlined_call_operand.vmem [shape: bf16[512,128], index: 10, kind: input, shape index: {}]   ;;  %s3350_s11 = inlined_call_operand.vmem [shape: f32[1,128], index: 11, kind: input, shape index: {}]   ;;  %s3351_s12 = inlined_call_operand.vmem [shape: f32[2,16,128], index: 12, kind: output, shape index: {}]  }
   0x1 LB: > { %s2201_s22 = sadd.s32 4294967295, %s2706_s21   ;;  %p2205_p0 = scmp.ge.s32.totalorder %s2706_s21, 1  ;;  %s2706_s21 = sphi %s2779_s21, %s22_s21  }
   0x2   : > { %p372_p1 = scmp.lt.s32.totalorder %s2706_s21, 3 }
   0x4   : > { %p373_p2 = pnand %p2205_p0, %p372_p1 }
   0x5   : > { %p419_p3 = scmp.lt.s32.totalorder (!%p373_p2), %s2201_s22, 1  ;;  %v2522_v2 = vld [vmem:[%s3342_s3 + $0x4] ss:$12 sps:$4 sm:$0xff] (!%p373_p2)   ;;  %v2524_v3 = vld [vmem:[%s3342_s3] ss:$12 sps:$4 sm:$0xff] (!%p373_p2)   ;;  %v2708_v4 = vmov (!%p373_p2), 0.0   ;;  %v509_v53 = vlaneseq (!%p373_p2) }
   0x6   : > { %376 = sbr.rel (%p373_p2) target bundleno = 3007 (0xbbf), region = 68  ;;  %2405 = vmatprep.subr.bf16.mxu1 (!%p373_p2), %v2708_v4  ;;  %v2525_v5 = vld [vmem:[%s3342_s3 + $0x8] ss:$12 sps:$4 sm:$0xff] (!%p373_p2)   ;;  %652 = vmatprep.subr.bf16.mxu0 (!%p373_p2), %v2522_v2  ;;  %v2528_v15 = vld [vmem:[%s3342_s3 + $0x18] ss:$12 sps:$4 sm:$0xff] (!%p373_p2)   ;;  %v2709_v30 = vmov (!%p373_p2), 0  }
   0x7   : > { %v2526_v6 = vld [vmem:[%s3342_s3 + $0x1c] ss:$12 sps:$4 sm:$0xff] (!%p373_p2)   ;;  %653 = vmatpush1.bf16.msra.mxu0 (!%p373_p2), %v2524_v3  ;;  %2406 = vmatpush3.bf16.msra.mxu1 (!%p373_p2), %v2525_v5  ;;  %v2529_v16 = vld [vmem:[%s3342_s3 + $0x20] ss:$12 sps:$4 sm:$0xff] (!%p373_p2)   ;;  %v2533_v19 = vld [vmem:[%s3342_s3 + $0x38] ss:$12 sps:$4 sm:$0xff] (!%p373_p2)  }
   0x8   : > { %654 = vmatprep.subr.bf16.mxu0 (!%p373_p2), %v2526_v6  ;;  %2407 = vmatprep.subr.bf16.mxu1 (!%p373_p2), %v2708_v4  ;;  %v2530_v17 = vld [vmem:[%s3342_s3 + $0x34] ss:$12 sps:$4 sm:$0xff] (!%p373_p2)   ;;  %v2532_v18 = vld [vmem:[%s3342_s3 + $0x30] ss:$12 sps:$4 sm:$0xff] (!%p373_p2)   ;;  %v2534_v20 = vld [vmem:[%s3342_s3 + $0x4c] ss:$12 sps:$4 sm:$0xff] (!%p373_p2)  }
   0x9   : > { %v2536_v21 = vld [vmem:[%s3342_s3 + $0x48] ss:$12 sps:$4 sm:$0xff] (!%p373_p2)   ;;  %v2537_v22 = vld [vmem:[%s3342_s3 + $0x50] ss:$12 sps:$4 sm:$0xff] (!%p373_p2)   ;;  %v2540_v24 = vld [vmem:[%s3342_s3 + $0x60] ss:$12 sps:$4 sm:$0xff] (!%p373_p2)   ;;  %684 = vmatprep.mubr.bf16.mxu0 (!%p373_p2), %v2709_v30 }
   0xa   : > { %v2538_v23 = vld [vmem:[%s3342_s3 + $0x64] ss:$12 sps:$4 sm:$0xff] (!%p373_p2)   ;;  %v2541_v25 = vld [vmem:[%s3342_s3 + $0x68] ss:$12 sps:$4 sm:$0xff] (!%p373_p2)   ;;  %v2545_v28 = vld [vmem:[%s3342_s3 + $0x80] ss:$12 sps:$4 sm:$0xff] (!%p373_p2)  }
   0xb   : > { %655 = vmatpush1.bf16.msra.mxu0 (!%p373_p2), %v2528_v15  ;;  %2408 = vmatpush3.bf16.msra.mxu1 (!%p373_p2), %v2529_v16  ;;  %v2542_v26 = vld [vmem:[%s3342_s3 + $0x7c] ss:$12 sps:$4 sm:$0xff] (!%p373_p2)   ;;  %v2544_v27 = vld [vmem:[%s3342_s3 + $0x78] ss:$12 sps:$4 sm:$0xff] (!%p373_p2)   ;;  %v2546_v29 = vld [vmem:[%s3342_s3 + $0x94] ss:$12 sps:$4 sm:$0xff] (!%p373_p2)  }
   0xc   : > { %2409 = vmatprep.subr.bf16.mxu1 (!%p373_p2), %v2708_v4  ;;  %656 = vmatprep.subr.bf16.mxu0 (!%p373_p2), %v2530_v17  ;;  %vm2710_vm0 = vmmov (!%p373_p2), 0   ;;  %v2548_v31 = vld [vmem:[%s3342_s3 + $0x90] ss:$12 sps:$4 sm:$0xff] (!%p373_p2)   ;;  %v2549_v32 = vld [vmem:[%s3342_s3 + $0x98] ss:$12 sps:$4 sm:$0xff] (!%p373_p2)   ;;  %v2902_v54 = vshrl.u32 (!%p373_p2), %v509_v53, 7 }
   0xd   : > { %s3353_s22 = smov (!%p419_p3, %s2201_s22), 1  ;;  %2421 = vmatprep.mubr.msk.bf16.mxu1 %vm2710_vm0, %v2708_v4  ;;  %v2550_v33 = vld [vmem:[%s3342_s3 + $0xac] ss:$12 sps:$4 sm:$0xff]   ;;  %v2552_v34 = vld [vmem:[%s3342_s3 + $0xa8] ss:$12 sps:$4 sm:$0xff]   ;;  %vm741_vm1 = vcmask 261120  }
   0xe   : > { %s2787_s23 = sshll.u32 %s3353_s22, 4  ;;  %v2553_v35 = vld [vmem:[%s3342_s3 + $0xb0] ss:$12 sps:$4 sm:$0xff]   ;;  %v2212_v44 = vld [vmem:[%s3341_s2] ss:$0 sm:$0xff]  ;;  %v511_v55 = vsub.s32 0, %v2902_v54 }
   0xf   : > { %s2793_s26 = scalar_lea.vmem %s3339_s0, %s2787_s23  ;;  %657 = vmatpush1.bf16.msra.mxu0 %v2532_v18  ;;  %2410 = vmatpush3.bf16.msra.mxu1 %v2533_v19  ;;  %v2213_v48 = vld [vmem:[%s3341_s2 + $0x1] ss:$0 sm:$0xff]  ;;  %v519_v56 = vsub.s32 2, %v2902_v54  ;;  %v515_v58 = vsub.s32 1, %v2902_v54  ;;  %s428_s20 = scalar_lea.vmem %s3340_s1, %s2787_s23  ;;  %vm789_vm2 = vcmask 130048   ;;  %vm1249_vm3 = vcmask 523264  }
  0x10   : > { %v435_v0 = vld [vmem:[%s2793_s26] sm:$0xff]  ;;  %v436_v1 = vld [vmem:[%s2793_s26 + $0x8] sm:$0xff]  ;;  %2411 = vmatprep.subr.bf16.mxu1 %v2708_v4  ;;  %658 = vmatprep.subr.bf16.mxu0 %v2534_v20  ;;  %s2711_s22 = smov 96   ;;  %s2712_s24 = smov 64   ;;  %vm1252_vm4 = vcmask 785408  }
  0x11   : > { %439 = vadd.xlane.f32.xlu0 %v435_v0  ;;  %v507_v57 = vld [vmem:[%s3343_s4] sm:$0x7]  ;;  %v2931_v19 = vld [vmem:[%s428_s20 + $0x8] sm:$0xff]  ;;  %s2713_s25 = smov 32   ;;  %s433_s27 = scalar_lea.vmem %s3351_s12, %s2787_s23 }
  0x12   : > { %v512_v59 = vrot.slane %v507_v57, %v511_v55  ;;  %v520_v60 = vrot.slane %v507_v57, %v519_v56  ;;  %v516_v63 = vrot.slane %v507_v57, %v515_v58  ;;  %v2929_v17 = vld [vmem:[%s428_s20] sm:$0xff] }
  0x13   : > { %659 = vmatpush1.bf16.msra.mxu0 %v2536_v21  ;;  %2412 = vmatpush3.bf16.msra.mxu1 %v2537_v22 }
  0x14   : > { %2413 = vmatprep.subr.bf16.mxu1 %v2708_v4  ;;  %660 = vmatprep.subr.bf16.mxu0 %v2538_v23 }
  0x15   : > { %441 = vadd.xlane.f32.xlu0 %v436_v1 }
  0x17   : > { %661 = vmatpush1.bf16.msra.mxu0 %v2540_v24  ;;  %2414 = vmatpush3.bf16.msra.mxu1 %v2541_v25 }
  0x18   : > { %662 = vmatprep.subr.bf16.mxu0 %v2542_v26  ;;  %2415 = vmatprep.subr.bf16.mxu1 %v2708_v4 }
  0x1b   : > { %663 = vmatpush1.bf16.msra.mxu0 %v2544_v27  ;;  %2416 = vmatpush3.bf16.msra.mxu1 %v2545_v28 }
  0x1c   : > { %664 = vmatprep.subr.bf16.mxu0 %v2546_v29  ;;  %2417 = vmatprep.subr.bf16.mxu1 %v2708_v4 }
  0x1f   : > { %665 = vmatpush1.bf16.msra.mxu0 %v2548_v31  ;;  %2418 = vmatpush3.bf16.msra.mxu1 %v2549_v32 }
  0x20   : > { %666 = vmatprep.subr.bf16.mxu0 %v2550_v33  ;;  %2419 = vmatprep.subr.bf16.mxu1 %v2708_v4 }
  0x23   : > { %667 = vmatpush1.bf16.msra.mxu0 %v2552_v34  ;;  %2420 = vmatpush3.bf16.msra.mxu1 %v2553_v35 }
  0x24   : > { %2425 = vmatprep.subr.bf16.mxu1 %v2708_v4  ;;  %2449 = vmatprep.subr.bf16.mxu0 %v2708_v4 }
  0x9e   : > { %v440_v7 = vpop.xlane.xlu0 %439 }
  0x9f   : > { %v444_v8 = vmul.f32 0.0078125, %v440_v7 }
  0xa1   : > { %v2811_v9 = vsub.f32 %v435_v0, %v444_v8 }
  0xa2   : > { %v442_v10 = vpop.xlane.xlu0 %441 }
  0xa3   : > { %v445_v11 = vmul.f32 0.0078125, %v442_v10  ;;  %v448_v12 = vmul.f32 %v2811_v9, %v2811_v9 }
  0xa5   : > { %v2815_v13 = vsub.f32 %v436_v1, %v445_v11  ;;  %450 = vadd.xlane.f32.xlu1 %v448_v12 }
  0xa7   : > { %v449_v14 = vmul.f32 %v2815_v13, %v2815_v13 }
  0xa9   : > { %452 = vadd.xlane.f32.xlu1 %v449_v14 }
 0x132   : > { %v451_v36 = vpop.xlane.xlu1 %450 }
 0x133   : > { %v454_v37 = vmul.f32 0.0078125, %v451_v36 }
 0x135   : > { %v456_v38 = vadd.f32 1e-05, %v454_v37 }
 0x136   : > { %v453_v39 = vpop.xlane.xlu1 %452 }
 0x137   : > { %2642 = vrsqrt.f32 %v456_v38  ;;  %v455_v40 = vmul.f32 0.0078125, %v453_v39 }
 0x139   : > { %v457_v41 = vadd.f32 1e-05, %v455_v40 }
 0x13b   : > { %2644 = vrsqrt.f32 %v457_v41 }
 0x141   : > { %v2643_v42 = vpop.eup %2642 }
 0x142   : > { %v460_v43 = vmul.f32 %v2643_v42, %v2811_v9 }
 0x144   : > { %v466_v47 = vmul.f32 %v2212_v44, %v460_v43 }
 0x145   : > { %v2645_v45 = vpop.eup %2644 }
 0x146   : > { %v461_v46 = vmul.f32 %v2645_v45, %v2815_v13  ;;  %v472_v50 = vadd.f32 %v2213_v48, %v466_v47 }
 0x148   : > { %v467_v49 = vmul.f32 %v2212_v44, %v461_v46 }
 0x14a   : > { %v473_v51 = vadd.f32 %v2213_v48, %v467_v49 }
 0x14c   : > { %v474_v52 = vpack.c.bf16 %v473_v51, %v472_v50 }
 0x14e   : > { %685 = vmatmul.mubr.bf16.vlgmr.msra.gmra.mrb[0].mxu0 %v474_v52  ;;  %2422 = vmatmul.mubr.bf16.vlgmr.msra.gmra.mrb[0].mxu1 %v474_v52 }
 0x14f   : > { %2427 = vmatprep.mubr.msk.bf16.mxu1 %vm2710_vm0, %v2708_v4  ;;  %2451 = vmatprep.mubr.msk.bf16.mxu0 %vm2710_vm0, %v2708_v4 }
 0x221   : > { %v686_v61 = vpop.f32.mrb[0].mxu0  ;;  %v729_v62 = vpop.f32.mrb[0].mxu1 }
 0x222   : > { %v688_v0 = vpop.f32.mrb[1].mxu0  ;;  %v2423_v1 = vpop.f32.mrb[1].mxu1  ;;  %v687_v5 = vadd.f32 %v686_v61, %v512_v59  ;;  %v730_v6 = vadd.f32 %v729_v62, %v520_v60 }
 0x223   : > { %v690_v2 = vpop.f32.mrb[2].mxu0  ;;  %v732_v3 = vpop.f32.mrb[2].mxu1  ;;  %v689_v11 = vadd.f32 %v688_v0, %v516_v63 }
 0x224   : > { %v691_v7 = vadd.f32 %v690_v2, %v512_v59  ;;  %v733_v8 = vadd.f32 %v732_v3, %v520_v60  ;;  %v692_v9 = vpop.f32.mrb[3].mxu0  ;;  %v2424_v10 = vpop.f32.mrb[3].mxu1 }
 0x225   : > { %v693_v12 = vadd.f32 %v692_v9, %v516_v63 }
 0x226   : > { %v736_v13 = vpack.c.bf16 %v691_v7, %v687_v5  ;;  %v2916_v14 = vpack.c.bf16 %v733_v8, %v730_v6 }
 0x227   : > { %v737_v15 = vpack.c.bf16 %v693_v12, %v689_v11 }
 0x229   : > { %v746_v16 = vsel %vm741_vm1, %v737_v15, 0 }
 0x22a   : > { %2426 = vmatpush3.bf16.xpose.msra.mxu1 %v746_v16 }
 0x22b   : > { %2431 = vmatprep.subr.bf16.mxu1 %v2708_v4 }
 0x231   : > { %2428 = vmatmul.mubr.msk.bf16.vlgmr.msra.gmra.mrb[4].mxu1 %vm741_vm1, %v736_v13 }
 0x232   : > { %2432 = vmatpush3.bf16.msra.mxu1 %v2916_v14  ;;  %2433 = vmatprep.mubr.msk.bf16.mxu1 %vm2710_vm0, %v2708_v4 }
 0x233   : > { %2437 = vmatprep.subr.bf16.mxu1 %v2708_v4 }
 0x304   : > { %v782_v18 = vpop.f32.mrb[4].mxu1 }
 0x305   : > { %v783_v20 = vadd.f32 %v782_v18, %v2929_v17  ;;  %v2429_v21 = vpop.f32.mrb[5].mxu1 }
 0x306   : > { %v785_v22 = vpop.f32.mrb[6].mxu1 }
 0x307   : > { %v786_v23 = vadd.f32 %v785_v22, %v2931_v19  ;;  %v2430_v24 = vpop.f32.mrb[7].mxu1  ;;  %v790_v25 = vsel %vm789_vm2, %v783_v20, -inf }
 0x308   : > { %791 = vmax.xlane.f32.xlu0 %v790_v25 }
 0x309   : > { %v793_v26 = vsel %vm789_vm2, %v786_v23, -inf }
 0x30a   : > { %794 = vmax.xlane.f32.xlu1 %v793_v26 }
 0x395   : > { %v792_v27 = vpop.xlane.xlu0 %791 }
 0x396   : > { %v796_v28 = vsub.f32 %v783_v20, %v792_v27 }
 0x397   : > { %v795_v29 = vpop.xlane.xlu1 %794 }
 0x398   : > { %v798_v31 = vmul.f32 1.442695, %v796_v28  ;;  %v797_v32 = vsub.f32 %v786_v23, %v795_v29 }
 0x39a   : > { %2646 = vpow2.f32 %v798_v31  ;;  %v800_v33 = vmul.f32 1.442695, %v797_v32 }
 0x39c   : > { %2648 = vpow2.f32 %v800_v33 }
 0x3a4   : > { %v2647_v34 = vpop.eup %2646 }
 0x3a5   : > { %v802_v35 = vsel %vm789_vm2, %v2647_v34, 0.0 }
 0x3a6   : > { %v2649_v36 = vpop.eup %2648  ;;  %803 = vadd.xlane.f32.xlu0 %v802_v35 }
 0x3a7   : > { %v805_v37 = vsel %vm789_vm2, %v2649_v36, 0.0 }
 0x3a8   : > { %806 = vadd.xlane.f32.xlu1 %v805_v37 }
 0x3b9   : > { %858 = vrot.lane.b32.xlu1 %v736_v13, %s2711_s22 }
 0x3bc   : > { %861 = vrot.lane.b32.xlu0 %v737_v15, %s2711_s22 }
 0x3bd   : > { %983 = vrot.lane.b32.xlu1 %v737_v15, %s2712_s24 }
 0x3c0   : > { %1104 = vrot.lane.b32.xlu0 %v737_v15, %s2713_s25 }
 0x3c1   : > { %981 = vrot.lane.b32.xlu1 %v736_v13, %s2712_s24 }
 0x3c5   : > { %1102 = vrot.lane.b32.xlu1 %v736_v13, %s2713_s25 }
 0x433   : > { %v804_v38 = vpop.xlane.xlu0 %803 }
 0x434   : > { %2650 = vrcp.f32 %v804_v38 }
 0x435   : > { %v807_v39 = vpop.xlane.xlu1 %806 }
 0x436   : > { %2652 = vrcp.f32 %v807_v39 }
 0x437   : > { %v862_v41 = vpop.permute.xlu0 %861 }
 0x438   : > { %v867_v50 = vsel %vm741_vm1, %v862_v41, 0 }
 0x439   : > { %v859_v40 = vpop.permute.xlu1 %858 }
 0x43b   : > { %v1105_v48 = vpop.permute.xlu0 %1104 }
 0x43c   : > { %v1110_v52 = vsel %vm741_vm1, %v1105_v48, 0 }
 0x43d   : > { %v984_v42 = vpop.permute.xlu1 %983 }
 0x43e   : > { %v2651_v43 = vpop.eup %2650  ;;  %v989_v44 = vsel %vm741_vm1, %v984_v42, 0 }
 0x43f   : > { %2450 = vmatpush3.bf16.xpose.msra.mxu0 %v989_v44  ;;  %v810_v46 = vmul.f32 %v2651_v43, %v2647_v34 }
 0x440   : > { %v2653_v45 = vpop.eup %2652  ;;  %2461 = vmatprep.subr.bf16.mxu0 %v2708_v4 }
 0x441   : > { %v811_v47 = vmul.f32 %v2653_v45, %v2649_v36  ;;  %v982_v51 = vpop.permute.xlu1 %981 }
 0x443   : > { %v812_v49 = vpack.c.bf16 %v811_v47, %v810_v46 }
 0x445   : > { %2434 = vmatmul.mubr.msk.bf16.vlgmr.msra.gmra.mrb[8].mxu1 %vm789_vm2, %v812_v49  ;;  %v1103_v53 = vpop.permute.xlu1 %1102 }
 0x446   : > { %2438 = vmatpush3.bf16.xpose.msra.mxu1 %v867_v50  ;;  %2452 = vmatmul.mubr.msk.bf16.vlgmr.msra.gmra.mrb[4].mxu0 %vm741_vm1, %v982_v51 }
 0x447   : > { %2462 = vmatpush3.bf16.xpose.msra.mxu0 %v1110_v52  ;;  %2439 = vmatprep.mubr.msk.bf16.mxu1 %vm2710_vm0, %v2708_v4 }
 0x448   : > { %2463 = vmatprep.mubr.msk.bf16.mxu0 %vm2710_vm0, %v2708_v4  ;;  %2443 = vmatprep.subr.bf16.mxu1 %v2708_v4 }
 0x449   : > { %2473 = vmatprep.subr.bf16.mxu0 %v2708_v4 }
 0x44d   : > { %2440 = vmatmul.mubr.msk.bf16.vlgmr.msra.gmra.mrb[12].mxu1 %vm741_vm1, %v859_v40 }
 0x44e   : > { %2464 = vmatmul.mubr.msk.bf16.vlgmr.msra.gmra.mrb[8].mxu0 %vm741_vm1, %v1103_v53  ;;  %2445 = vmatprep.mubr.msk.bf16.mxu1 %vm2710_vm0, %v2708_v4 }
 0x44f   : > { %2489 = vmatprep.mubr.msk.bf16.mxu0 %vm2710_vm0, %v2708_v4 }
 0x518   : > { %v2963_v57 = vpop.f32.mrb[8].mxu1 }
 0x519   : > { %v2435_v59 = vpop.f32.mrb[9].mxu1  ;;  %v1025_v60 = vpop.f32.mrb[4].mxu0 }
 0x51a   : > { %v2965_v61 = vpop.f32.mrb[10].mxu1  ;;  %v2453_v62 = vpop.f32.mrb[5].mxu0  ;;  %v1026_v9 = vadd.f32 %v1025_v60, %v2929_v17 }
 0x51b   : > { %v2436_v63 = vpop.f32.mrb[11].mxu1  ;;  %v1028_v0 = vpop.f32.mrb[6].mxu0 }
 0x51c   : > { %v2454_v1 = vpop.f32.mrb[7].mxu0  ;;  %v1029_v20 = vadd.f32 %v1028_v0, %v2931_v19  ;;  %v1032_v21 = vsel %vm789_vm2, %v1026_v9, -inf }
 0x51e   : > { %v1035_v24 = vsel %vm789_vm2, %v1029_v20, -inf }
 0x520   : > { %v903_v2 = vpop.f32.mrb[12].mxu1 }
 0x521   : > { %v904_v3 = vadd.f32 %v903_v2, %v2929_v17  ;;  %v2441_v5 = vpop.f32.mrb[13].mxu1  ;;  %v1146_v6 = vpop.f32.mrb[8].mxu0 }
 0x522   : > { %v906_v7 = vpop.f32.mrb[14].mxu1  ;;  %v2465_v8 = vpop.f32.mrb[9].mxu0  ;;  %v1147_v23 = vadd.f32 %v1146_v6, %v2929_v17 }
 0x523   : > { %v907_v10 = vadd.f32 %v906_v7, %v2931_v19  ;;  %v2442_v11 = vpop.f32.mrb[15].mxu1  ;;  %v1149_v12 = vpop.f32.mrb[10].mxu0  ;;  %v910_v13 = vsel %vm789_vm2, %v904_v3, -inf }
 0x524   : > { %v2466_v15 = vpop.f32.mrb[11].mxu0  ;;  %911 = vmax.xlane.f32.xlu0 %v910_v13  ;;  %v1150_v16 = vadd.f32 %v1149_v12, %v2931_v19  ;;  %v1153_v25 = vsel %vm789_vm2, %v1147_v23, -inf }
 0x525   : > { %v913_v18 = vsel %vm789_vm2, %v907_v10, -inf }
 0x526   : > { %914 = vmax.xlane.f32.xlu1 %v913_v18  ;;  %v1156_v22 = vsel %vm789_vm2, %v1150_v16, -inf }
 0x528   : > { %1033 = vmax.xlane.f32.xlu0 %v1032_v21 }
 0x52a   : > { %1157 = vmax.xlane.f32.xlu1 %v1156_v22 }
 0x52c   : > { %1036 = vmax.xlane.f32.xlu0 %v1035_v24  ;;  %v2554_v24 = vld [vmem:[%s3344_s5] sm:$0xff]  }
 0x52d   : > { %2474 = vmatpush3.bf16.msra.mxu0 %v2554_v24 }
 0x52e   : > { %2475 = vmatprep.subr.bf16.mxu0 %v2708_v4 }
 0x530   : > { %1154 = vmax.xlane.f32.xlu0 %v1153_v25  ;;  %v2555_v25 = vld [vmem:[%s3344_s5 + $0x8] sm:$0xff]  }
 0x531   : > { %2476 = vmatpush3.bf16.msra.mxu0 %v2555_v25 }
 0x532   : > { %2477 = vmatprep.subr.bf16.mxu0 %v2708_v4 }
 0x5b1   : > { %v912_v26 = vpop.xlane.xlu0 %911 }
 0x5b2   : > { %v916_v35 = vsub.f32 %v904_v3, %v912_v26  ;;  %v2556_v26 = vld [vmem:[%s3344_s5 + $0x10] sm:$0xff]  }
 0x5b3   : > { %v915_v27 = vpop.xlane.xlu1 %914  ;;  %2478 = vmatpush3.bf16.msra.mxu0 %v2556_v26 }
 0x5b4   : > { %v917_v36 = vsub.f32 %v907_v10, %v915_v27  ;;  %v918_v40 = vmul.f32 1.442695, %v916_v35  ;;  %2479 = vmatprep.subr.bf16.mxu0 %v2708_v4  ;;  %v2557_v27 = vld [vmem:[%s3344_s5 + $0x18] sm:$0xff]   ;;  %v2560_v35 = vld [vmem:[%s3344_s5 + $0x30] sm:$0xff]  }
 0x5b5   : > { %v1034_v28 = vpop.xlane.xlu0 %1033 }
 0x5b6   : > { %v1038_v29 = vsub.f32 %v1026_v9, %v1034_v28  ;;  %v920_v41 = vmul.f32 1.442695, %v917_v36  ;;  %v2558_v28 = vld [vmem:[%s3344_s5 + $0x20] sm:$0xff]  }
 0x5b7   : > { %v1158_v31 = vpop.xlane.xlu1 %1157  ;;  %2480 = vmatpush3.bf16.msra.mxu0 %v2557_v27 }
 0x5b8   : > { %v1040_v19 = vmul.f32 1.442695, %v1038_v29  ;;  %v1160_v32 = vsub.f32 %v1150_v16, %v1158_v31  ;;  %2481 = vmatprep.subr.bf16.mxu0 %v2708_v4 }
 0x5b9   : > { %v1037_v33 = vpop.xlane.xlu0 %1036 }
 0x5ba   : > { %2654 = vpow2.f32 %v1040_v19  ;;  %v1039_v34 = vsub.f32 %v1029_v20, %v1037_v33  ;;  %v1163_v37 = vmul.f32 1.442695, %v1160_v32  ;;  %v2559_v19 = vld [vmem:[%s3344_s5 + $0x28] sm:$0xff]  }
 0x5bb   : > { %2482 = vmatpush3.bf16.msra.mxu0 %v2558_v28 }
 0x5bc   : > { %v1042_v17 = vmul.f32 1.442695, %v1039_v34  ;;  %2483 = vmatprep.subr.bf16.mxu0 %v2708_v4 }
 0x5bd   : > { %v1155_v38 = vpop.xlane.xlu0 %1154 }
 0x5be   : > { %2656 = vpow2.f32 %v1042_v17  ;;  %v1159_v39 = vsub.f32 %v1147_v23, %v1155_v38  ;;  %v2561_v17 = vld [vmem:[%s3344_s5 + $0x38] sm:$0xff]  }
 0x5bf   : > { %2658 = vpow2.f32 %v1163_v37  ;;  %2484 = vmatpush3.bf16.msra.mxu0 %v2559_v19  ;;  %v2579_v19 = vld [vmem:[%s3347_s8 + $0x4c] ss:$16 sps:$4 sm:$0xff]  }
 0x5c0   : > { %v1161_v42 = vmul.f32 1.442695, %v1159_v39  ;;  %2485 = vmatprep.subr.bf16.mxu0 %v2708_v4 }
 0x5c2   : > { %2660 = vpow2.f32 %v1161_v42 }
 0x5c3   : > { %2662 = vpow2.f32 %v918_v40  ;;  %2486 = vmatpush3.bf16.msra.mxu0 %v2560_v35  ;;  %v2585_v35 = vld [vmem:[%s3347_s8 + $0x6c] ss:$16 sps:$4 sm:$0xff]  }
 0x5c4   : > { %v2655_v43 = vpop.eup %2654  ;;  %2664 = vpow2.f32 %v920_v41  ;;  %2487 = vmatprep.subr.bf16.mxu0 %v2708_v4 }
 0x5c5   : > { %v1044_v44 = vsel %vm789_vm2, %v2655_v43, 0.0 }
 0x5c6   : > { %1045 = vadd.xlane.f32.xlu0 %v1044_v44 }
 0x5c7   : > { %2488 = vmatpush3.bf16.msra.mxu0 %v2561_v17  ;;  %v2588_v17 = vld [vmem:[%s3347_s8 + $0x84] ss:$16 sps:$4 sm:$0xff]  }
 0x5c8   : > { %v2657_v45 = vpop.eup %2656 }
 0x5c9   : > { %v1047_v46 = vsel %vm789_vm2, %v2657_v45, 0.0  ;;  %v2659_v47 = vpop.eup %2658 }
 0x5ca   : > { %1048 = vadd.xlane.f32.xlu1 %v1047_v46  ;;  %v1168_v51 = vsel %vm789_vm2, %v2659_v47, 0.0 }
 0x5cc   : > { %v2661_v48 = vpop.eup %2660 }
 0x5cd   : > { %v2663_v49 = vpop.eup %2662  ;;  %v1165_v50 = vsel %vm789_vm2, %v2661_v48, 0.0 }
 0x5ce   : > { %v2665_v52 = vpop.eup %2664  ;;  %1166 = vadd.xlane.f32.xlu0 %v1165_v50  ;;  %1169 = vadd.xlane.f32.xlu1 %v1168_v51  ;;  %v922_v53 = vsel %vm789_vm2, %v2663_v49, 0.0 }
 0x5cf   : > { %v925_v59 = vsel %vm789_vm2, %v2665_v52, 0.0 }
 0x5d2   : > { %923 = vadd.xlane.f32.xlu0 %v922_v53  ;;  %926 = vadd.xlane.f32.xlu1 %v925_v59 }
 0x5e3   : > { %1055 = vrot.lane.b32.xlu1 %v2916_v14, %s2712_s24 }
 0x5e7   : > { %1176 = vrot.lane.b32.xlu1 %v2916_v14, %s2713_s25 }
 0x5e8   : > { %934 = vrot.lane.b32.xlu0 %v2916_v14, %s2711_s22 }
 0x653   : > { %v1046_v60 = vpop.xlane.xlu0 %1045 }
 0x657   : > { %v1049_v62 = vpop.xlane.xlu1 %1048 }
 0x65b   : > { %v1167_v63 = vpop.xlane.xlu0 %1166  ;;  %v1170_v0 = vpop.xlane.xlu1 %1169 }
 0x65f   : > { %v924_v1 = vpop.xlane.xlu0 %923  ;;  %v927_v2 = vpop.xlane.xlu1 %926 }
 0x660   : > { %2666 = vrcp.f32 %v924_v1 }
 0x661   : > { %2668 = vrcp.f32 %v927_v2 }
 0x662   : > { %2670 = vrcp.f32 %v1049_v62 }
 0x663   : > { %v935_v3 = vpop.permute.xlu0 %934  ;;  %2672 = vrcp.f32 %v1046_v60  ;;  %v1056_v10 = vpop.permute.xlu1 %1055 }
 0x664   : > { %2444 = vmatpush3.bf16.msra.mxu1 %v935_v3  ;;  %2674 = vrcp.f32 %v1167_v63 }
 0x665   : > { %2455 = vmatprep.subr.bf16.mxu1 %v2708_v4  ;;  %2676 = vrcp.f32 %v1170_v0 }
 0x667   : > { %v1177_v20 = vpop.permute.xlu1 %1176 }
 0x66a   : > { %v2667_v5 = vpop.eup %2666 }
 0x66b   : > { %v2669_v6 = vpop.eup %2668  ;;  %v930_v7 = vmul.f32 %v2667_v5, %v2663_v49  ;;  %v2254_v5 = vld [vmem:[%s3345_s6] ss:$0 sm:$0xff] }
 0x66c   : > { %v931_v8 = vmul.f32 %v2669_v6, %v2665_v52  ;;  %v2671_v9 = vpop.eup %2670 }
 0x66d   : > { %v2673_v11 = vpop.eup %2672  ;;  %v1053_v12 = vmul.f32 %v2671_v9, %v2657_v45 }
 0x66e   : > { %v932_v14 = vpack.c.bf16 %v931_v8, %v930_v7  ;;  %v1052_v13 = vmul.f32 %v2673_v11, %v2655_v43  ;;  %v2675_v15 = vpop.eup %2674 }
 0x66f   : > { %v2677_v18 = vpop.eup %2676  ;;  %v1173_v21 = vmul.f32 %v2675_v15, %v2661_v48  ;;  %v2567_v15 = vld [vmem:[%s3347_s8 + $0xc] ss:$16 sps:$4 sm:$0xff]  }
 0x670   : > { %2446 = vmatmul.mubr.msk.bf16.vlgmr.msra.gmra.mrb[16].mxu1 %vm789_vm2, %v932_v14  ;;  %v1054_v16 = vpack.c.bf16 %v1053_v12, %v1052_v13  ;;  %v1174_v22 = vmul.f32 %v2677_v18, %v2659_v47  ;;  %v2699_v14 = vld [vmem:[%s2793_s26 + $0x8] sm:$0xff]  ;;  %v2564_v12 = vld [vmem:[%s3347_s8 + $0x4] ss:$16 sps:$4 sm:$0xff]   ;;  %1666 = vmatprep.subr.bf16.mxu0 %v2567_v15 }
 0x671   : > { %2456 = vmatpush3.bf16.msra.mxu1 %v1056_v10  ;;  %2457 = vmatprep.mubr.msk.bf16.mxu1 %vm2710_vm0, %v2708_v4  ;;  %v2565_v13 = vld [vmem:[%s3347_s8 + $0x8] ss:$16 sps:$4 sm:$0xff]   ;;  %v2573_v18 = vld [vmem:[%s3347_s8 + $0x2c] ss:$16 sps:$4 sm:$0xff]  }
 0x672   : > { %2467 = vmatprep.subr.bf16.mxu1 %v2708_v4  ;;  %v1175_v23 = vpack.c.bf16 %v1174_v22, %v1173_v21  ;;  %v2571_v21 = vld [vmem:[%s3347_s8 + $0x28] ss:$16 sps:$4 sm:$0xff]  }
 0x673   : > { %v2614_v15 = vld [vmem:[%s3349_s10 + $0x48] sm:$0xff]  }
 0x678   : > { %2458 = vmatmul.mubr.msk.bf16.vlgmr.msra.gmra.mrb[20].mxu1 %vm789_vm2, %v1054_v16  ;;  %v2570_v16 = vld [vmem:[%s3347_s8 + $0x24] ss:$16 sps:$4 sm:$0xff]  }
 0x679   : > { %2468 = vmatpush3.bf16.msra.mxu1 %v1177_v20  ;;  %2469 = vmatprep.mubr.msk.bf16.mxu1 %vm2710_vm0, %v2708_v4  ;;  %v2568_v20 = vld [vmem:[%s3347_s8 + $0x20] ss:$16 sps:$4 sm:$0xff]  }
 0x67a   : > { %1623 = vmatprep.subr.bf16.mxu1 %v2564_v12  ;;  %v2612_v12 = vld [vmem:[%s3349_s10] sm:$0xff]  }
 0x680   : > { %2470 = vmatmul.mubr.msk.bf16.vlgmr.msra.gmra.mrb[24].mxu1 %vm789_vm2, %v1175_v23 }
 0x681   : > { %1655 = vmatprep.mubr.bf16.mxu1 %v2709_v30 }
 0x743   : > { %v974_v29 = vpop.f32.mrb[16].mxu1 }
 0x744   : > { %v2447_v31 = vpop.f32.mrb[17].mxu1 }
 0x745   : > { %v977_v32 = vpop.f32.mrb[18].mxu1  ;;  %v2576_v31 = vld [vmem:[%s3347_s8 + $0x44] ss:$16 sps:$4 sm:$0xff]  }
 0x746   : > { %v2507_v33 = vpack.i.bf16 %v977_v32, %v974_v29  ;;  %v2448_v34 = vpop.f32.mrb[19].mxu1  ;;  %v2574_v32 = vld [vmem:[%s3347_s8 + $0x40] ss:$16 sps:$4 sm:$0xff]  }
 0x747   : > { %v2582_v34 = vld [vmem:[%s3347_s8 + $0x64] ss:$16 sps:$4 sm:$0xff]  }
 0x748   : > { %2508 = vrot.lane.b32.xlu1 %v2507_v33, %s2713_s25  ;;  %v2577_v33 = vld [vmem:[%s3347_s8 + $0x48] ss:$16 sps:$4 sm:$0xff]  }
 0x74b   : > { %v1095_v36 = vpop.f32.mrb[20].mxu1 }
 0x74c   : > { %v2459_v37 = vpop.f32.mrb[21].mxu1 }
 0x74d   : > { %v1098_v38 = vpop.f32.mrb[22].mxu1  ;;  %v2583_v37 = vld [vmem:[%s3347_s8 + $0x68] ss:$16 sps:$4 sm:$0xff]  }
 0x74e   : > { %v2512_v39 = vpack.i.bf16 %v1098_v38, %v1095_v36  ;;  %v2460_v40 = vpop.f32.mrb[23].mxu1  ;;  %v2580_v36 = vld [vmem:[%s3347_s8 + $0x60] ss:$16 sps:$4 sm:$0xff]   ;;  %v2591_v38 = vld [vmem:[%s3347_s8 + $0x8c] ss:$16 sps:$4 sm:$0xff]  }
 0x74f   : > { %v2589_v40 = vld [vmem:[%s3347_s8 + $0x88] ss:$16 sps:$4 sm:$0xff]  }
 0x750   : > { %2513 = vrot.lane.b32.xlu0 %v2512_v39, %s2712_s24  ;;  %v2586_v39 = vld [vmem:[%s3347_s8 + $0x80] ss:$16 sps:$4 sm:$0xff]  }
 0x753   : > { %v1216_v41 = vpop.f32.mrb[24].mxu1 }
 0x754   : > { %v2471_v42 = vpop.f32.mrb[25].mxu1 }
 0x755   : > { %v1219_v43 = vpop.f32.mrb[26].mxu1  ;;  %v2597_v42 = vld [vmem:[%s3347_s8 + $0xac] ss:$16 sps:$4 sm:$0xff]  }
 0x756   : > { %v2517_v44 = vpack.i.bf16 %v1219_v43, %v1216_v41  ;;  %v2472_v45 = vpop.f32.mrb[27].mxu1  ;;  %v2594_v41 = vld [vmem:[%s3347_s8 + $0xa4] ss:$16 sps:$4 sm:$0xff]   ;;  %v2592_v43 = vld [vmem:[%s3347_s8 + $0xa0] ss:$16 sps:$4 sm:$0xff]  }
 0x757   : > { %v2600_v45 = vld [vmem:[%s3347_s8 + $0xc4] ss:$16 sps:$4 sm:$0xff]  }
 0x758   : > { %2518 = vrot.lane.b32.xlu1 %v2517_v44, %s2711_s22  ;;  %v2595_v44 = vld [vmem:[%s3347_s8 + $0xa8] ss:$16 sps:$4 sm:$0xff]  }
 0x7ba   : > { %v2509_v46 = vpop.permute.xlu1 %2508 }
 0x7bb   : > { %v2511_v47 = vunpack.i.h.bf16 %v2509_v46  ;;  %v2510_v48 = vunpack.i.l.bf16 %v2509_v46  ;;  %v2603_v46 = vld [vmem:[%s3347_s8 + $0xcc] ss:$16 sps:$4 sm:$0xff]  }
 0x7bd   : > { %v1248_v52 = vsel %vm741_vm1, %v2965_v61, %v2511_v47  ;;  %v1247_v53 = vsel %vm741_vm1, %v2963_v57, %v2510_v48  ;;  %v2698_v61 = vld [vmem:[%s2793_s26] sm:$0xff]  ;;  %v2601_v47 = vld [vmem:[%s3347_s8 + $0xc8] ss:$16 sps:$4 sm:$0xff]  }
 0x7be   : > { %v2606_v48 = vld [vmem:[%s3347_s8 + $0xe4] ss:$16 sps:$4 sm:$0xff]  }
 0x7c2   : > { %v2514_v4 = vpop.permute.xlu0 %2513 }
 0x7c3   : > { %v2516_v49 = vunpack.i.h.bf16 %v2514_v4  ;;  %v2515_v50 = vunpack.i.l.bf16 %v2514_v4  ;;  %v2598_v4 = vld [vmem:[%s3347_s8 + $0xc0] ss:$16 sps:$4 sm:$0xff]  }
 0x7c5   : > { %v1251_v62 = vsel %vm1249_vm3, %v1248_v52, %v2516_v49  ;;  %v1250_v63 = vsel %vm1249_vm3, %v1247_v53, %v2515_v50  ;;  %v2609_v49 = vld [vmem:[%s3347_s8 + $0xec] ss:$16 sps:$4 sm:$0xff]   ;;  %v2604_v50 = vld [vmem:[%s3347_s8 + $0xe0] ss:$16 sps:$4 sm:$0xff]  }
 0x7ca   : > { %v2519_v51 = vpop.permute.xlu1 %2518 }
 0x7cb   : > { %v2521_v59 = vunpack.i.h.bf16 %v2519_v51  ;;  %v2520_v60 = vunpack.i.l.bf16 %v2519_v51  ;;  %v2607_v51 = vld [vmem:[%s3347_s8 + $0xe8] ss:$16 sps:$4 sm:$0xff]  }
 0x7cd   : > { %v1254_v0 = vsel %vm1252_vm4, %v1251_v62, %v2521_v59  ;;  %v1253_v1 = vsel %vm1252_vm4, %v1250_v63, %v2520_v60 }
 0x7ce   : > { %v1255_v2 = vpack.c.bf16 %v1254_v0, %v1253_v1 }
 0x7d0   : > { %2490 = vmatmul.mubr.bf16.vlgmr.msra.gmra.mrb[12].mxu0 %v1255_v2  ;;  %v2255_v2 = vld [vmem:[%s3346_s7] ss:$0 sm:$0xff] }
 0x7d1   : > { %1698 = vmatprep.mubr.bf16.mxu0 %v2709_v30  ;;  %v2562_v30 = vld [vmem:[%s3347_s8] ss:$16 sps:$4 sm:$0xff]   ;;  %1667 = vmatpush1.bf16.msra.mxu0 %v2565_v13 }
 0x7d2   : > { %1624 = vmatpush1.bf16.msra.mxu1 %v2562_v30  ;;  %1668 = vmatprep.subr.bf16.mxu0 %v2573_v18  ;;  %v2611_v30 = vld [vmem:[%s3349_s10 + $0xc0] sm:$0xff]   ;;  %v2616_v18 = vld [vmem:[%s3349_s10 + $0x8] sm:$0xff]  }
 0x7d3   : > { %1625 = vmatprep.subr.bf16.mxu1 %v2570_v16  ;;  %v2613_v13 = vld [vmem:[%s3349_s10 + $0x80] sm:$0xff]   ;;  %v2615_v16 = vld [vmem:[%s3349_s10 + $0xc8] sm:$0xff]  }
 0x7d5   : > { %1669 = vmatpush1.bf16.msra.mxu0 %v2571_v21  ;;  %v2618_v21 = vld [vmem:[%s3349_s10 + $0x50] sm:$0xff]  }
 0x7d6   : > { %1626 = vmatpush1.bf16.msra.mxu1 %v2568_v20  ;;  %1670 = vmatprep.subr.bf16.mxu0 %v2579_v19  ;;  %v2617_v20 = vld [vmem:[%s3349_s10 + $0x88] sm:$0xff]   ;;  %v2628_v19 = vld [vmem:[%s3349_s10 + $0x20] sm:$0xff]  }
 0x7d7   : > { %1627 = vmatprep.subr.bf16.mxu1 %v2576_v31  ;;  %v2627_v31 = vld [vmem:[%s3349_s10 + $0xe0] sm:$0xff]  }
 0x7d9   : > { %1671 = vmatpush1.bf16.msra.mxu0 %v2577_v33  ;;  %v2630_v33 = vld [vmem:[%s3349_s10 + $0x68] sm:$0xff]  }
 0x7da   : > { %1628 = vmatpush1.bf16.msra.mxu1 %v2574_v32  ;;  %1672 = vmatprep.subr.bf16.mxu0 %v2585_v35  ;;  %v2629_v32 = vld [vmem:[%s3349_s10 + $0xa0] sm:$0xff]   ;;  %v2632_v35 = vld [vmem:[%s3349_s10 + $0x28] sm:$0xff]  }
 0x7db   : > { %1629 = vmatprep.subr.bf16.mxu1 %v2582_v34  ;;  %v2631_v34 = vld [vmem:[%s3349_s10 + $0xe8] sm:$0xff]  }
 0x7dd   : > { %1673 = vmatpush1.bf16.msra.mxu0 %v2583_v37  ;;  %v2634_v37 = vld [vmem:[%s3349_s10 + $0x70] sm:$0xff]  }
 0x7de   : > { %1630 = vmatpush1.bf16.msra.mxu1 %v2580_v36  ;;  %1674 = vmatprep.subr.bf16.mxu0 %v2591_v38  ;;  %v2633_v36 = vld [vmem:[%s3349_s10 + $0xa8] sm:$0xff]   ;;  %v2636_v38 = vld [vmem:[%s3349_s10 + $0x30] sm:$0xff]  }
 0x7df   : > { %1631 = vmatprep.subr.bf16.mxu1 %v2588_v17  ;;  %v2635_v17 = vld [vmem:[%s3349_s10 + $0xf0] sm:$0xff]  }
 0x7e1   : > { %1675 = vmatpush1.bf16.msra.mxu0 %v2589_v40  ;;  %v2638_v40 = vld [vmem:[%s3349_s10 + $0x78] sm:$0xff]  }
 0x7e2   : > { %1632 = vmatpush1.bf16.msra.mxu1 %v2586_v39  ;;  %1676 = vmatprep.subr.bf16.mxu0 %v2597_v42  ;;  %v2637_v39 = vld [vmem:[%s3349_s10 + $0xb0] sm:$0xff]   ;;  %v2640_v42 = vld [vmem:[%s3349_s10 + $0x38] sm:$0xff]  }
 0x7e3   : > { %1633 = vmatprep.subr.bf16.mxu1 %v2594_v41  ;;  %v2639_v41 = vld [vmem:[%s3349_s10 + $0xf8] sm:$0xff]  }
 0x7e5   : > { %1677 = vmatpush1.bf16.msra.mxu0 %v2595_v44  ;;  %v1441_v44 = vld [vmem:[%s3348_s9] sm:$0xf] }
 0x7e6   : > { %1634 = vmatpush1.bf16.msra.mxu1 %v2592_v43  ;;  %1678 = vmatprep.subr.bf16.mxu0 %v2603_v46  ;;  %v2641_v43 = vld [vmem:[%s3349_s10 + $0xb8] sm:$0xff]   ;;  %v1446_v46 = vrot.slane %v1441_v44, %v511_v55 }
 0x7e7   : > { %1635 = vmatprep.subr.bf16.mxu1 %v2600_v45  ;;  %v1457_v45 = vsub.s32 3, %v2902_v54 }
 0x7e9   : > { %1679 = vmatpush1.bf16.msra.mxu0 %v2601_v47  ;;  %v1450_v47 = vrot.slane %v1441_v44, %v515_v58 }
 0x7ea   : > { %1636 = vmatpush1.bf16.msra.mxu1 %v2598_v4  ;;  %1680 = vmatprep.subr.bf16.mxu0 %v2609_v49  ;;  %v1454_v4 = vrot.slane %v1441_v44, %v519_v56 }
 0x7eb   : > { %1637 = vmatprep.subr.bf16.mxu1 %v2606_v48  ;;  %v1458_v48 = vrot.slane %v1441_v44, %v1457_v45 }
 0x7ed   : > { %1681 = vmatpush1.bf16.msra.mxu0 %v2607_v51 }
 0x7ee   : > { %1638 = vmatpush1.bf16.msra.mxu1 %v2604_v50  ;;  %2383 = vmatprep.subr.bf16.mxu0 %v2611_v30 }
 0x8a3   : > { %v1354_v3 = vpop.f32.mrb[12].mxu0 }
 0x8a4   : > { %v1361_v6 = vadd.f32 %v2698_v61, %v1354_v3  ;;  %v2491_v7 = vpop.f32.mrb[13].mxu0 }
 0x8a5   : > { %v1357_v57 = vpop.f32.mrb[14].mxu0 }
 0x8a6   : > { %v3044_v8 = vadd.f32 %v2254_v5, %v1361_v6  ;;  %v1362_v9 = vadd.f32 %v2699_v14, %v1357_v57  ;;  %v2492_v10 = vpop.f32.mrb[15].mxu0  ;;  %v2256_v6 = vld [vmem:[%s3346_s7 + $0x1] ss:$0 sm:$0xff] }
 0x8a7   : > { %v2610_v10 = vld [vmem:[%s3349_s10 + $0x40] sm:$0xff]  }
 0x8a8   : > { %v3047_v11 = vadd.f32 %v2254_v5, %v1362_v9  ;;  %1374 = vadd.xlane.f32.xlu0 %v3044_v8  ;;  %2361 = vmatprep.subr.bf16.mxu1 %v2610_v10 }
 0x8aa   : > { %1376 = vadd.xlane.f32.xlu1 %v3047_v11 }
 0x935   : > { %v1375_v22 = vpop.xlane.xlu0 %1374 }
 0x936   : > { %v1378_v23 = vmul.f32 0.0078125, %v1375_v22  ;;  %v2619_v22 = vld [vmem:[%s3349_s10 + $0xd0] sm:$0xff]  }
 0x937   : > { %v1377_v24 = vpop.xlane.xlu1 %1376 }
 0x938   : > { %v3076_v25 = vsub.f32 %v3044_v8, %v1378_v23  ;;  %v1379_v26 = vmul.f32 0.0078125, %v1377_v24  ;;  %v2620_v23 = vld [vmem:[%s3349_s10 + $0x10] sm:$0xff]  }
 0x939   : > { %v2621_v24 = vld [vmem:[%s3349_s10 + $0x90] sm:$0xff]  }
 0x93a   : > { %v3079_v27 = vsub.f32 %v3047_v11, %v1379_v26  ;;  %v1382_v28 = vmul.f32 %v3076_v25, %v3076_v25  ;;  %v2623_v26 = vld [vmem:[%s3349_s10 + $0xd8] sm:$0xff]  }
 0x93c   : > { %1384 = vadd.xlane.f32.xlu0 %v1382_v28  ;;  %v1383_v29 = vmul.f32 %v3079_v27, %v3079_v27  ;;  %v2625_v28 = vld [vmem:[%s3349_s10 + $0x98] sm:$0xff]  }
 0x940   : > { %1386 = vadd.xlane.f32.xlu0 %v1383_v29  ;;  %v2626_v29 = vld [vmem:[%s3349_s10 + $0x60] sm:$0xff]  }
 0x9c9   : > { %v1385_v52 = vpop.xlane.xlu0 %1384 }
 0x9ca   : > { %v1388_v53 = vmul.f32 0.0078125, %v1385_v52 }
 0x9cc   : > { %v1390_v59 = vadd.f32 1e-05, %v1388_v53 }
 0x9cd   : > { %v1387_v60 = vpop.xlane.xlu0 %1386 }
 0x9ce   : > { %2678 = vrsqrt.f32 %v1390_v59  ;;  %v1389_v62 = vmul.f32 0.0078125, %v1387_v60 }
 0x9d0   : > { %v1391_v63 = vadd.f32 1e-05, %v1389_v62 }
 0x9d2   : > { %2680 = vrsqrt.f32 %v1391_v63 }
 0x9d8   : > { %v2679_v0 = vpop.eup %2678 }
 0x9d9   : > { %v1394_v1 = vmul.f32 %v2679_v0, %v3076_v25  ;;  %v2622_v25 = vld [vmem:[%s3349_s10 + $0x58] sm:$0xff]  }
 0x9db   : > { %v1400_v61 = vmul.f32 %v2255_v2, %v1394_v1 }
 0x9dc   : > { %v2681_v3 = vpop.eup %2680 }
 0x9dd   : > { %v1395_v5 = vmul.f32 %v2681_v3, %v3079_v27  ;;  %v1406_v57 = vadd.f32 %v2256_v6, %v1400_v61  ;;  %v2624_v27 = vld [vmem:[%s3349_s10 + $0x18] sm:$0xff]  }
 0x9df   : > { %v1401_v7 = vmul.f32 %v2255_v2, %v1395_v5 }
 0x9e1   : > { %v1407_v14 = vadd.f32 %v2256_v6, %v1401_v7 }
 0x9e3   : > { %v1408_v9 = vpack.c.bf16 %v1407_v14, %v1406_v57 }
 0x9e5   : > { %1656 = vmatmul.mubr.bf16.vlgmr.msra.gmra.mrb[28].mxu1 %v1408_v9  ;;  %1699 = vmatmul.mubr.bf16.vlgmr.msra.gmra.mrb[16].mxu0 %v1408_v9 }
 0x9e6   : > { %2362 = vmatpush3.bf16.msra.mxu1 %v2612_v12  ;;  %2384 = vmatpush3.bf16.msra.mxu0 %v2613_v13 }
 0x9e7   : > { %2363 = vmatprep.subr.bf16.mxu1 %v2614_v15  ;;  %2385 = vmatprep.subr.bf16.mxu0 %v2615_v16 }
 0x9ea   : > { %2364 = vmatpush3.bf16.msra.mxu1 %v2616_v18  ;;  %2386 = vmatpush3.bf16.msra.mxu0 %v2617_v20 }
 0x9eb   : > { %2365 = vmatprep.subr.bf16.mxu1 %v2618_v21  ;;  %2387 = vmatprep.subr.bf16.mxu0 %v2619_v22 }
 0x9ee   : > { %2366 = vmatpush3.bf16.msra.mxu1 %v2620_v23  ;;  %2388 = vmatpush3.bf16.msra.mxu0 %v2621_v24 }
 0x9ef   : > { %2367 = vmatprep.subr.bf16.mxu1 %v2622_v25  ;;  %2389 = vmatprep.subr.bf16.mxu0 %v2623_v26 }
 0x9f2   : > { %2368 = vmatpush3.bf16.msra.mxu1 %v2624_v27  ;;  %2390 = vmatpush3.bf16.msra.mxu0 %v2625_v28 }
 0x9f3   : > { %2369 = vmatprep.subr.bf16.mxu1 %v2626_v29  ;;  %2391 = vmatprep.subr.bf16.mxu0 %v2627_v31 }
 0x9f6   : > { %2370 = vmatpush3.bf16.msra.mxu1 %v2628_v19  ;;  %2392 = vmatpush3.bf16.msra.mxu0 %v2629_v32 }
 0x9f7   : > { %2371 = vmatprep.subr.bf16.mxu1 %v2630_v33  ;;  %2393 = vmatprep.subr.bf16.mxu0 %v2631_v34 }
 0x9fa   : > { %2372 = vmatpush3.bf16.msra.mxu1 %v2632_v35  ;;  %2394 = vmatpush3.bf16.msra.mxu0 %v2633_v36 }
 0x9fb   : > { %2373 = vmatprep.subr.bf16.mxu1 %v2634_v37  ;;  %2395 = vmatprep.subr.bf16.mxu0 %v2635_v17 }
 0x9fe   : > { %2374 = vmatpush3.bf16.msra.mxu1 %v2636_v38  ;;  %2396 = vmatpush3.bf16.msra.mxu0 %v2637_v39 }
 0x9ff   : > { %2375 = vmatprep.subr.bf16.mxu1 %v2638_v40  ;;  %2397 = vmatprep.subr.bf16.mxu0 %v2639_v41 }
 0xa02   : > { %2376 = vmatpush3.bf16.msra.mxu1 %v2640_v42  ;;  %2398 = vmatpush3.bf16.msra.mxu0 %v2641_v43 }
 0xab8   : > { %v1657_v49 = vpop.f32.mrb[28].mxu1  ;;  %v1700_v50 = vpop.f32.mrb[16].mxu0 }
 0xab9   : > { %v3271_v51 = vadd.f32 %v1657_v49, %v1446_v46  ;;  %v3273_v52 = vadd.f32 %v1700_v50, %v1454_v4  ;;  %v1659_v53 = vpop.f32.mrb[29].mxu1  ;;  %v1702_v59 = vpop.f32.mrb[17].mxu0 }
 0xaba   : > { %v3275_v60 = vadd.f32 %v1659_v53, %v1450_v47  ;;  %v3277_v62 = vadd.f32 %v1702_v59, %v1458_v48  ;;  %v1661_v55 = vpop.f32.mrb[30].mxu1  ;;  %v1704_v63 = vpop.f32.mrb[18].mxu0 }
 0xabb   : > { %v1709_v56 = vmul.f32 %v3271_v51, %v3271_v51  ;;  %v1711_v54 = vmul.f32 %v3273_v52, %v3273_v52  ;;  %v3283_v58 = vadd.f32 %v1661_v55, %v1446_v46  ;;  %v3285_v0 = vadd.f32 %v1704_v63, %v1454_v4  ;;  %v1663_v1 = vpop.f32.mrb[31].mxu1  ;;  %v1706_v2 = vpop.f32.mrb[19].mxu0 }
 0xabc   : > { %v1710_v3 = vmul.f32 %v3275_v60, %v3275_v60  ;;  %v1712_v5 = vmul.f32 %v3277_v62, %v3277_v62  ;;  %v3291_v61 = vadd.f32 %v1663_v1, %v1450_v47  ;;  %v3293_v6 = vadd.f32 %v1706_v2, %v1458_v48 }
 0xabd   : > { %v1717_v7 = vmul.f32 %v1709_v56, %v3271_v51  ;;  %v1719_v57 = vmul.f32 %v1711_v54, %v3273_v52  ;;  %v1713_v14 = vmul.f32 %v3283_v58, %v3283_v58  ;;  %v1715_v9 = vmul.f32 %v3285_v0, %v3285_v0 }
 0xabe   : > { %v1718_v10 = vmul.f32 %v1710_v3, %v3275_v60  ;;  %v1720_v30 = vmul.f32 %v1712_v5, %v3277_v62  ;;  %v1714_v12 = vmul.f32 %v3291_v61, %v3291_v61  ;;  %v1716_v13 = vmul.f32 %v3293_v6, %v3293_v6 }
 0xabf   : > { %v1725_v15 = vmul.f32 0.044715, %v1717_v7  ;;  %v1727_v16 = vmul.f32 0.044715, %v1719_v57  ;;  %v1721_v18 = vmul.f32 %v1713_v14, %v3283_v58  ;;  %v1723_v20 = vmul.f32 %v1715_v9, %v3285_v0 }
 0xac0   : > { %v1726_v21 = vmul.f32 0.044715, %v1718_v10  ;;  %v1728_v22 = vmul.f32 0.044715, %v1720_v30  ;;  %v1722_v23 = vmul.f32 %v1714_v12, %v3291_v61  ;;  %v1724_v24 = vmul.f32 %v1716_v13, %v3293_v6 }
 0xac1   : > { %v1733_v25 = vadd.f32 %v1725_v15, %v3271_v51  ;;  %v1735_v26 = vadd.f32 %v1727_v16, %v3273_v52  ;;  %v1729_v27 = vmul.f32 0.044715, %v1721_v18  ;;  %v1731_v28 = vmul.f32 0.044715, %v1723_v20 }
 0xac2   : > { %v1734_v29 = vadd.f32 %v1726_v21, %v3275_v60  ;;  %v1736_v31 = vadd.f32 %v1728_v22, %v3277_v62  ;;  %v1730_v19 = vmul.f32 0.044715, %v1722_v23  ;;  %v1732_v32 = vmul.f32 0.044715, %v1724_v24 }
 0xac3   : > { %v1741_v33 = vmul.f32 0.7978846, %v1733_v25  ;;  %v1743_v34 = vmul.f32 0.7978846, %v1735_v26  ;;  %v1737_v35 = vadd.f32 %v1729_v27, %v3283_v58  ;;  %v1739_v36 = vadd.f32 %v1731_v28, %v3285_v0 }
 0xac4   : > { %v1742_v37 = vmul.f32 0.7978846, %v1734_v29  ;;  %v1744_v17 = vmul.f32 0.7978846, %v1736_v31  ;;  %v1738_v38 = vadd.f32 %v1730_v19, %v3291_v61  ;;  %v1740_v39 = vadd.f32 %v1732_v32, %v3293_v6 }
 0xac5   : > { %2682 = vtanh.f32 %v1741_v33  ;;  %v1745_v40 = vmul.f32 0.7978846, %v1737_v35  ;;  %v1747_v41 = vmul.f32 0.7978846, %v1739_v36 }
 0xac6   : > { %2684 = vtanh.f32 %v1743_v34  ;;  %v1746_v42 = vmul.f32 0.7978846, %v1738_v38  ;;  %v1748_v43 = vmul.f32 0.7978846, %v1740_v39 }
 0xac7   : > { %2686 = vtanh.f32 %v1742_v37 }
 0xac8   : > { %2688 = vtanh.f32 %v1744_v17 }
 0xac9   : > { %2690 = vtanh.f32 %v1745_v40 }
 0xaca   : > { %2692 = vtanh.f32 %v1747_v41 }
 0xacb   : > { %2694 = vtanh.f32 %v1746_v42 }
 0xacc   : > { %2696 = vtanh.f32 %v1748_v43 }
 0xacf   : > { %v2683_v44 = vpop.eup %2682 }
 0xad0   : > { %v2685_v45 = vpop.eup %2684  ;;  %v1757_v46 = vadd.f32 1.0, %v2683_v44 }
 0xad1   : > { %v2687_v4 = vpop.eup %2686  ;;  %v1759_v47 = vadd.f32 1.0, %v2685_v45 }
 0xad2   : > { %v2689_v48 = vpop.eup %2688  ;;  %v1758_v49 = vadd.f32 1.0, %v2687_v4  ;;  %v1765_v55 = vmul.f32 0.5, %v1757_v46 }
 0xad3   : > { %v2691_v50 = vpop.eup %2690  ;;  %v1760_v53 = vadd.f32 1.0, %v2689_v48  ;;  %v1767_v54 = vmul.f32 0.5, %v1759_v47 }
 0xad4   : > { %v2693_v59 = vpop.eup %2692  ;;  %v1761_v63 = vadd.f32 1.0, %v2691_v50  ;;  %v1766_v7 = vmul.f32 0.5, %v1758_v49  ;;  %v1773_v10 = vmul.f32 %v1765_v55, %v3271_v51 }
 0xad5   : > { %v2695_v56 = vpop.eup %2694  ;;  %v1763_v1 = vadd.f32 1.0, %v2693_v59  ;;  %v1768_v9 = vmul.f32 0.5, %v1760_v53  ;;  %v1775_v13 = vmul.f32 %v1767_v54, %v3273_v52 }
 0xad6   : > { %v2697_v2 = vpop.eup %2696  ;;  %v1769_v3 = vmul.f32 0.5, %v1761_v63  ;;  %v1762_v5 = vadd.f32 1.0, %v2695_v56  ;;  %v1774_v18 = vmul.f32 %v1766_v7, %v3275_v60  ;;  %v2289_v60 = vld [vmem:[%s3350_s11] ss:$0 sm:$0xff] }
 0xad7   : > { %v1771_v57 = vmul.f32 0.5, %v1763_v1  ;;  %v1764_v14 = vadd.f32 1.0, %v2697_v2  ;;  %v1776_v22 = vmul.f32 %v1768_v9, %v3277_v62 }
 0xad8   : > { %v1777_v30 = vmul.f32 %v1769_v3, %v3283_v58  ;;  %v1770_v12 = vmul.f32 0.5, %v1762_v5 }
 0xad9   : > { %v1779_v15 = vmul.f32 %v1771_v57, %v3285_v0  ;;  %v1772_v16 = vmul.f32 0.5, %v1764_v14 }
 0xada   : > { %v1778_v20 = vmul.f32 %v1770_v12, %v3291_v61  ;;  %v1781_v21 = vpack.c.bf16 %v1777_v30, %v1773_v10 }
 0xadb   : > { %v1780_v23 = vmul.f32 %v1772_v16, %v3293_v6  ;;  %v1783_v24 = vpack.c.bf16 %v1779_v15, %v1775_v13 }
 0xadc   : > { %v1782_v25 = vpack.c.bf16 %v1778_v20, %v1774_v18 }
 0xadd   : > { %v1784_v51 = vpack.c.bf16 %v1780_v23, %v1776_v22 }
 0xade   : > { %2080 = vmatprep.mubr.bf16.mxu1 %v1782_v25 }
 0xadf   : > { %2121 = vmatprep.mubr.bf16.mxu0 %v1784_v51  ;;  %2081 = vmatmul.mubr.bf16.vlgmr.msra.gmra.mrb[32].mxu1 %v1781_v21 }
 0xae0   : > { %2122 = vmatmul.mubr.bf16.vlgmr.msra.gmra.mrb[20].mxu0 %v1783_v24 }
 0xbb2   : > { %v2377_v52 = vpop.f32.mrb[32].mxu1 }
 0xbb3   : > { %v2399_v58 = vpop.f32.mrb[20].mxu0  ;;  %v2378_v0 = vpop.f32.mrb[33].mxu1 }
 0xbb4   : > { %v2379_v61 = vadd.f32 %v2378_v0, %v2377_v52  ;;  %v2400_v26 = vpop.f32.mrb[21].mxu0  ;;  %v2380_v62 = vpop.f32.mrb[34].mxu1 }
 0xbb5   : > { %v2401_v27 = vadd.f32 %v2400_v26, %v2399_v58  ;;  %v2402_v6 = vpop.f32.mrb[22].mxu0  ;;  %v2381_v28 = vpop.f32.mrb[35].mxu1 }
 0xbb6   : > { %v2083_v29 = vadd.f32 %v2379_v61, %v2289_v60  ;;  %v2382_v31 = vadd.f32 %v2381_v28, %v2380_v62  ;;  %v2403_v19 = vpop.f32.mrb[23].mxu0 }
 0xbb7   : > { %v2404_v32 = vadd.f32 %v2403_v19, %v2402_v6 }
 0xbb8   : > { %v2124_v33 = vadd.f32 %v2401_v27, %v2083_v29  ;;  %v2086_v34 = vadd.f32 %v2382_v31, %v2289_v60 }
 0xbba   : > { %v2130_v35 = vadd.f32 %v2124_v33, %v3044_v8  ;;  %v2127_v36 = vadd.f32 %v2404_v32, %v2086_v34 }
 0xbbc   : > { %2132 = vst [vmem:[%s433_s27] sm:$0xff] %v2130_v35  ;;  %v2131_v37 = vadd.f32 %v2127_v36, %v3047_v11 }
 0xbbe   : > { %2133 = vst [vmem:[%s433_s27 + $0x8] sm:$0xff] %v2131_v37 }
 0xbbf PF: > { %s22_s21 = sadd.s32 1, %s2706_s21  }
 0xbc0   : > { %p19_p4 = scmp.ge.s32.totalorder %s22_s21, 4  }
 0xbc2   :  { %21 = sbr.rel (!%p19_p4) target bundleno = 1 (0x1), region = 101 }

// kernel: joint_model_forward.3
= control target key start
LH: loop header
LB: loop body
LE: loop exit
PB: predicated region body
PF: predicated region fallthrough
CT: control target
= control target key end

     0   :  { %17 = vsyncpa [#allocation3], 0  ;;  %s3865_s0 = inlined_call_operand.vmem [shape: f32[2,16,128], index: 0, kind: input, shape index: {}]   ;;  %s3866_s1 = inlined_call_operand.vmem [shape: f32[2,16,16], index: 1, kind: input, shape index: {}]   ;;  %s3867_s2 = inlined_call_operand.hbm [shape: f32[2,128], index: 2, kind: input, shape index: {}]   ;;  %s3868_s3 = inlined_call_operand.vmem [shape: bf16[128,384], index: 3, kind: input, shape index: {}]   ;;  %s3869_s4 = inlined_call_operand.hbm [shape: f32[1,384], index: 4, kind: input, shape index: {}]   ;;  %s3870_s5 = inlined_call_operand.hbm [shape: bf16[128,128], index: 5, kind: input, shape index: {}]   ;;  %s3871_s6 = inlined_call_operand.vmem [shape: f32[1,128], index: 6, kind: input, shape index: {}]   ;;  %s3872_s7 = inlined_call_operand.hbm [shape: f32[2,128], index: 7, kind: input, shape index: {}]   ;;  %s3873_s8 = inlined_call_operand.vmem [shape: bf16[128,512], index: 8, kind: input, shape index: {}]   ;;  %s3874_s9 = inlined_call_operand.hbm [shape: f32[1,512], index: 9, kind: input, shape index: {}]   ;;  %s3875_s10 = inlined_call_operand.hbm [shape: bf16[512,128], index: 10, kind: input, shape index: {}]   ;;  %s3876_s11 = inlined_call_operand.hbm [shape: f32[1,128], index: 11, kind: input, shape index: {}]   ;;  %s3877_s12 = inlined_call_operand.vmem [shape: f32[2,16,128], index: 12, kind: output, shape index: {}]  }
   0x1   :  { %18 = vsyncpa [#allocation5], 0 }
   0x2   :  { %19 = vsyncpa [#allocation8], 0 }
   0x3   :  { %20 = vsyncpa [#allocation11], 0  ;;  %s3248_s21 = smov 0  }
   0x4 LB: > { %s3168_s22 = smov [#allocation4]   ;;  %s3254_s24 = sadd.s32 4294967295, %s3166_s21   ;;  %s3166_s21 = sphi %s3248_s21, %s26_s21  }
   0x5   : > { %s346_s23 = sshll.u32 %s3168_s22, 4  ;;  %p2364_p0 = scmp.ge.s32.totalorder %s3166_s21, 1  ;;  %s3259_s23 = int_to_ptr.vmem [resolvable:$true] %s346_s23 }
   0x6   : > { %p319_p1 = scmp.lt.s32.totalorder %s3166_s21, 3  ;;  %p3878_p2 = scmp.eq.s32.totalorder %s3254_s24, 0 }
   0x7   : > { %s3169_s26 = smov [#allocation7]   ;;  %s3170_s29 = smov [#allocation10]  }
   0x8   : > { %p3261_p3 = pnand %p2364_p0, %p319_p1  ;;  %s373_s27 = sshll.u32 %s3169_s26, 4  ;;  %s3267_s27 = int_to_ptr.vmem [resolvable:$true] %s373_s27 }
   0x9   : > { %s397_s30 = sshll.u32 %s3170_s29, 4  ;;  %s3171_s13 = smov [#allocation2]   ;;  %s3275_s30 = int_to_ptr.vmem [resolvable:$true] %s397_s30 }
   0xa   : > { %s3882_s25 = scalar_select %p3261_p3, 1, 0 }
   0xb   : > { %p2696_p4 = pneg %p3261_p3  ;;  %s3277_s14 = sshll.u32 %s3171_s13, 4  ;;  %s333_s14 = int_to_ptr.vmem [resolvable:$true] %s3277_s14 }
   0xc   : > { %s2948_s17 = scalar_lea.hbm %s3869_s4, 48 }
   0xd   : > { %p3271_p5 = pnand %p3878_p2, %p2696_p4  ;;  %p2949_p6 = scmp.ne.s32.totalorder %s3869_s4, %s2948_s17 }
   0xe   : > { %p2955_p10 = scmp.lt.u32.totalorder %s2948_s17, %s3869_s4 }
   0xf   : > { %p3287_p7 = pneg %p3271_p5 }
  0x11   : > { %p2951_p8 = pnand %p3287_p7, %p2949_p6 }
  0x13   : > { %p2952_p9 = pneg %p2951_p8 }
  0x15   : > { %p2957_p11 = pnand %p2955_p10, %p2952_p9 }
  0x17   : > { %2960 = shalt.err (!%p2957_p11)
}
  0x18   : > { %s2961_s29 = scalar_lea.vmem %s3259_s23, 48  ;;  %s2968_s13 = scalar_lea.vmem %s3259_s23, 64 }
  0x19   : > { %p2962_p12 = scmp.ne.s32.totalorder %s3259_s23, %s2961_s29  ;;  %p2969_p1 = scmp.lt.s32.totalorder %s3259_s23, %s3259_s23 }
  0x1a   : > { %p2970_p4 = scmp.lt.s32.totalorder %s2968_s13, %s2961_s29 }
  0x1b   : > { %p2964_p13 = pnand %p2962_p12, %p3287_p7 }
  0x1c   : > { %p2971_p6 = por %p2970_p4, %p2969_p1 }
  0x1d   : > { %p2965_p0 = pneg %p2964_p13 }
  0x1f   : > { %p2972_p8 = pnand %p2971_p6, %p2965_p0 }
  0x21   : > { %2975 = shalt.err (!%p2972_p8)
}
  0x22   : > { %2702 = dma.hbm_to_vmem [thread:$0]  (!%p3271_p5), %s3869_s4, 48, %s3259_s23, [#allocation5]  }
  0x23   : > { %s2976_s19 = scalar_lea.hbm %s3872_s7, 32 }
  0x24   : > { %p2977_p9 = scmp.ne.s32.totalorder %s3872_s7, %s2976_s19  ;;  %p2983_p12 = scmp.lt.u32.totalorder %s2976_s19, %s3872_s7 }
  0x26   : > { %p2979_p10 = pnand %p2977_p9, %p3287_p7 }
  0x28   : > { %p2980_p11 = pneg %p2979_p10 }
  0x2a   : > { %p2985_p13 = pnand %p2983_p12, %p2980_p11 }
  0x2c   : > { %2988 = shalt.err (!%p2985_p13)
}
  0x2d   : > { %s2989_s23 = scalar_lea.vmem %s3267_s27, 32  ;;  %p2997_p6 = scmp.lt.s32.totalorder %s3267_s27, %s3267_s27 }
  0x2e   : > { %p2990_p0 = scmp.ne.s32.totalorder %s3267_s27, %s2989_s23  ;;  %p2998_p8 = scmp.lt.s32.totalorder %s2989_s23, %s2989_s23 }
  0x30   : > { %p2992_p1 = pnand %p2990_p0, %p3287_p7  ;;  %p2999_p9 = por %p2998_p8, %p2997_p6 }
  0x32   : > { %p2993_p4 = pneg %p2992_p1 }
  0x34   : > { %p3000_p10 = pnand %p2999_p9, %p2993_p4 }
  0x36   : > { %3003 = shalt.err (!%p3000_p10)
}
  0x37   : > { %2708 = dma.hbm_to_vmem [thread:$0]  (!%p3271_p5), %s3872_s7, 32, %s3267_s27, [#allocation8]  }
  0x38   : > { %s3004_s19 = scalar_lea.hbm %s3875_s10, 4096 }
  0x39   : > { %p3005_p11 = scmp.ne.s32.totalorder %s3875_s10, %s3004_s19  ;;  %p3011_p0 = scmp.lt.u32.totalorder %s3004_s19, %s3875_s10 }
  0x3b   : > { %p3007_p12 = pnand %p3005_p11, %p3287_p7 }
  0x3d   : > { %p3008_p13 = pneg %p3007_p12 }
  0x3f   : > { %p3013_p1 = pnand %p3011_p0, %p3008_p13 }
  0x41   : > { %3016 = shalt.err (!%p3013_p1)
}
  0x42   : > { %s3017_s27 = scalar_lea.vmem %s3275_s30, 4096  ;;  %p3025_p9 = scmp.lt.s32.totalorder %s3275_s30, %s3275_s30 }
  0x43   : > { %p3018_p4 = scmp.ne.s32.totalorder %s3275_s30, %s3017_s27  ;;  %p3026_p10 = scmp.lt.s32.totalorder %s3017_s27, %s3017_s27 }
  0x45   : > { %p3020_p6 = pnand %p3018_p4, %p3287_p7  ;;  %p3027_p11 = por %p3026_p10, %p3025_p9 }
  0x47   : > { %p3021_p8 = pneg %p3020_p6 }
  0x49   : > { %p3028_p12 = pnand %p3027_p11, %p3021_p8 }
  0x4b   : > { %3031 = shalt.err (!%p3028_p12)
}
  0x4c   : > { %s3880_s23 = smov 64   ;;  %s3881_s15 = smov 4  }
  0x4d   : > { %2714 = dma.hbm_to_vmem [thread:$0]  (!%p3271_p5), %s3875_s10, 4096, %s3275_s30, [#allocation11], %s3880_s23, %s3880_s23, %s3881_s15  }
  0x4e   : > { %s3032_s22 = scalar_lea.hbm %s3867_s2, 32 }
  0x4f   : > { %p3033_p13 = scmp.ne.s32.totalorder %s3867_s2, %s3032_s22  ;;  %p3039_p4 = scmp.lt.u32.totalorder %s3032_s22, %s3867_s2 }
  0x51   : > { %p3035_p0 = pnand %p3033_p13, %p3287_p7 }
  0x53   : > { %p3036_p1 = pneg %p3035_p0 }
  0x55   : > { %p3041_p6 = pnand %p3039_p4, %p3036_p1 }
  0x57   : > { %3044 = shalt.err (!%p3041_p6)
}
  0x58   : > { %s3045_s16 = scalar_lea.vmem %s333_s14, 32  ;;  %p3053_p11 = scmp.lt.s32.totalorder %s333_s14, %s333_s14 }
  0x59   : > { %p3046_p8 = scmp.ne.s32.totalorder %s333_s14, %s3045_s16  ;;  %p3054_p12 = scmp.lt.s32.totalorder %s3045_s16, %s3045_s16 }
  0x5b   : > { %p3048_p9 = pnand %p3046_p8, %p3287_p7  ;;  %p3055_p2 = por %p3054_p12, %p3053_p11 }
  0x5d   : > { %p3049_p10 = pneg %p3048_p9 }
  0x5f   : > { %p3056_p3 = pnand %p3055_p2, %p3049_p10 }
  0x61   : > { %3059 = shalt.err (!%p3056_p3)
}
  0x62   : > { %2699 = dma.hbm_to_vmem [thread:$0]  (!%p3271_p5), %s3867_s2, 32, %s333_s14, [#allocation3]  }
  0x63   : > { %s3174_s18 = smov [#allocation6]   ;;  %s3175_s22 = smov [#allocation9]  }
  0x64   : > { %s356_s19 = sshll.u32 %s3174_s18, 4  ;;  %s387_s26 = sshll.u32 %s3175_s22, 4  ;;  %s357_s19 = int_to_ptr.vmem [resolvable:$true] %s356_s19  ;;  %s388_s26 = int_to_ptr.vmem [resolvable:$true] %s387_s26 }
  0x65   : > { %s3060_s27 = scalar_lea.hbm %s3870_s5, 1024 }
  0x66   : > { %p3061_p2 = scmp.ne.s32.totalorder %s3870_s5, %s3060_s27  ;;  %p3067_p0 = scmp.lt.u32.totalorder %s3060_s27, %s3870_s5 }
  0x68   : > { %p3063_p3 = pnand %p3061_p2, %p3287_p7 }
  0x6a   : > { %p3064_p13 = pneg %p3063_p3 }
  0x6c   : > { %p3069_p1 = pnand %p3067_p0, %p3064_p13 }
  0x6e   : > { %3072 = shalt.err (!%p3069_p1)
}
  0x6f   : > { %s3073_s14 = scalar_lea.vmem %s357_s19, 1024  ;;  %p3081_p9 = scmp.lt.s32.totalorder %s357_s19, %s357_s19 }
  0x70   : > { %p3074_p4 = scmp.ne.s32.totalorder %s357_s19, %s3073_s14  ;;  %p3082_p10 = scmp.lt.s32.totalorder %s3073_s14, %s3073_s14 }
  0x72   : > { %p3076_p6 = pnand %p3074_p4, %p3287_p7  ;;  %p3083_p11 = por %p3082_p10, %p3081_p9 }
  0x74   : > { %p3077_p8 = pneg %p3076_p6 }
  0x76   : > { %p3084_p12 = pnand %p3083_p11, %p3077_p8 }
  0x78   : > { %3087 = shalt.err (!%p3084_p12)
}
  0x79   : > { %s3885_s23 = smov 4   ;;  %s3886_s17 = smov 64  }
  0x7a   : > { %2705 = dma.hbm_to_vmem [thread:$0]  (!%p3271_p5), %s3870_s5, 1024, %s357_s19, [#allocation5], %s3886_s17, %s3886_s17, %s3885_s23  }
  0x7b   : > { %s3088_s13 = scalar_lea.hbm %s3874_s9, 64 }
  0x7c   : > { %p3089_p2 = scmp.ne.s32.totalorder %s3874_s9, %s3088_s13  ;;  %p3095_p0 = scmp.lt.u32.totalorder %s3088_s13, %s3874_s9 }
  0x7e   : > { %p3091_p3 = pnand %p3089_p2, %p3287_p7 }
  0x80   : > { %p3092_p13 = pneg %p3091_p3 }
  0x82   : > { %p3097_p1 = pnand %p3095_p0, %p3092_p13 }
  0x84   : > { %3100 = shalt.err (!%p3097_p1)
}
  0x85   : > { %s3101_s15 = scalar_lea.vmem %s388_s26, 64  ;;  %p3109_p9 = scmp.lt.s32.totalorder %s388_s26, %s388_s26 }
  0x86   : > { %p3102_p4 = scmp.ne.s32.totalorder %s388_s26, %s3101_s15  ;;  %p3110_p10 = scmp.lt.s32.totalorder %s3101_s15, %s3101_s15 }
  0x88   : > { %p3104_p6 = pnand %p3102_p4, %p3287_p7  ;;  %p3111_p11 = por %p3110_p10, %p3109_p9 }
  0x8a   : > { %p3105_p8 = pneg %p3104_p6 }
  0x8c   : > { %p3112_p12 = pnand %p3111_p11, %p3105_p8 }
  0x8e   : > { %3115 = shalt.err (!%p3112_p12)
}
  0x8f   : > { %2711 = dma.hbm_to_vmem [thread:$0]  (!%p3271_p5), %s3874_s9, 64, %s388_s26, [#allocation8]  }
  0x90   : > { %s3176_s17 = smov [#allocation12]   ;;  %s3116_s13 = scalar_lea.hbm %s3876_s11, 16 }
  0x91   : > { %s411_s18 = sshll.u32 %s3176_s17, 4  ;;  %p3117_p2 = scmp.ne.s32.totalorder %s3876_s11, %s3116_s13  ;;  %s412_s18 = int_to_ptr.vmem [resolvable:$true] %s411_s18 }
  0x92   : > { %p3123_p0 = scmp.lt.u32.totalorder %s3116_s13, %s3876_s11 }
  0x93   : > { %p3119_p3 = pnand %p3117_p2, %p3287_p7 }
  0x95   : > { %p3120_p13 = pneg %p3119_p3 }
  0x97   : > { %p3125_p1 = pnand %p3123_p0, %p3120_p13 }
  0x99   : > { %3128 = shalt.err (!%p3125_p1)
}
  0x9a   : > { %s3129_s26 = scalar_lea.vmem %s412_s18, 16  ;;  %s3136_s15 = scalar_lea.vmem %s412_s18, 32 }
  0x9b   : > { %p3130_p4 = scmp.ne.s32.totalorder %s412_s18, %s3129_s26  ;;  %p3137_p9 = scmp.lt.s32.totalorder %s412_s18, %s412_s18 }
  0x9c   : > { %p3138_p10 = scmp.lt.s32.totalorder %s3136_s15, %s3129_s26 }
  0x9d   : > { %p3132_p6 = pnand %p3130_p4, %p3287_p7 }
  0x9e   : > { %p3139_p11 = por %p3138_p10, %p3137_p9 }
  0x9f   : > { %p3133_p8 = pneg %p3132_p6 }
  0xa1   : > { %p3140_p12 = pnand %p3139_p11, %p3133_p8 }
  0xa3   : > { %3143 = shalt.err (!%p3140_p12)
}
  0xa4   : > { %2717 = dma.hbm_to_vmem [thread:$0]  (!%p3271_p5), %s3876_s11, 16, %s412_s18, [#allocation11]  }
  0xa5   : > { %p3887_p2 = scmp.ne.s32.totalorder %s3882_s25, 0 }
  0xa6   : > { %p3888_p3 = scmp.eq.s32.totalorder (!%p3887_p2), %s3254_s24, 0 }
  0xa7   : > { %440 = sbr.rel (%p3887_p2) target bundleno = 3181 (0xc6d), region = 68 }
  0xae   : > { %3149 = dma.done.wait (%p3888_p3), [#allocation3], 32   ;;  %p3889_p7 = pmov %p3888_p3 }
  0xaf   : > { %p3890_p13 = pmov %p3888_p3 }
  0xb0   : > { %3151 = vsyncadd (%p3889_p7), [#allocation3], 4294967264 }
  0xb1   : > { %3153 = dma.done.wait (%p3890_p13), [#allocation5], 1072   ;;  %p3891_p0 = pmov %p3888_p3 }
  0xb3   : > { %3155 = vsyncadd (%p3891_p0), [#allocation5], 4294966224  ;;  %p3892_p1 = pmov %p3891_p0 }
  0xb4   : > { %p3893_p5 = pmov %p3891_p0 }
  0xb5   : > { %3157 = dma.done.wait (%p3892_p1), [#allocation8], 96  }
  0xb6   : > { %3159 = vsyncadd (%p3893_p5), [#allocation8], 4294967200  ;;  %p3894_p4 = pmov %p3891_p0 }
  0xb7   : > { %p3895_p6 = pmov %p3891_p0 }
  0xb8   : > { %3161 = dma.done.wait (%p3894_p4), [#allocation11], 4112  }
  0xb9   : > { %3163 = vsyncadd (%p3895_p6), [#allocation11], 4294963184  ;;  %p511_p8 = scmp.lt.s32.totalorder %s3254_s24, 1  ;;  %v2770_v2 = vld [vmem:[%s3868_s3 + $0x4] ss:$12 sps:$4 sm:$0xff]   ;;  %v3177_v4 = vmov 0.0   ;;  %v601_v53 = vlaneseq }
  0xba   : > { %v2772_v3 = vld [vmem:[%s3868_s3] ss:$12 sps:$4 sm:$0xff]   ;;  %2580 = vmatprep.subr.bf16.mxu1 %v3177_v4  ;;  %v2773_v5 = vld [vmem:[%s3868_s3 + $0x8] ss:$12 sps:$4 sm:$0xff]   ;;  %744 = vmatprep.subr.bf16.mxu0 %v2770_v2  ;;  %v2776_v15 = vld [vmem:[%s3868_s3 + $0x18] ss:$12 sps:$4 sm:$0xff]  }
  0xbb   : > { %s3897_s24 = smov (!%p511_p8, %s3254_s24), 1  ;;  %v2774_v6 = vld [vmem:[%s3868_s3 + $0x1c] ss:$12 sps:$4 sm:$0xff]   ;;  %745 = vmatpush1.bf16.msra.mxu0 %v2772_v3  ;;  %2581 = vmatpush3.bf16.msra.mxu1 %v2773_v5  ;;  %v2777_v16 = vld [vmem:[%s3868_s3 + $0x20] ss:$12 sps:$4 sm:$0xff]   ;;  %v3178_v30 = vmov 0  }
  0xbc   : > { %s3454_s25 = sshll.u32 %s3897_s24, 4  ;;  %746 = vmatprep.subr.bf16.mxu0 %v2774_v6  ;;  %2582 = vmatprep.subr.bf16.mxu1 %v3177_v4  ;;  %v2778_v17 = vld [vmem:[%s3868_s3 + $0x34] ss:$12 sps:$4 sm:$0xff]   ;;  %v2780_v18 = vld [vmem:[%s3868_s3 + $0x30] ss:$12 sps:$4 sm:$0xff]   ;;  %vm3179_vm0 = vmmov 0  }
  0xbd   : > { %s3460_s17 = scalar_lea.vmem %s3865_s0, %s3454_s25  ;;  %v2781_v19 = vld [vmem:[%s3868_s3 + $0x38] ss:$12 sps:$4 sm:$0xff]   ;;  %v2784_v21 = vld [vmem:[%s3868_s3 + $0x48] ss:$12 sps:$4 sm:$0xff]   ;;  %v2785_v22 = vld [vmem:[%s3868_s3 + $0x50] ss:$12 sps:$4 sm:$0xff]   ;;  %776 = vmatprep.mubr.bf16.mxu0 %v3178_v30  ;;  %2596 = vmatprep.mubr.msk.bf16.mxu1 %vm3179_vm0, %v3177_v4  ;;  %s520_s27 = scalar_lea.vmem %s3866_s1, %s3454_s25 }
  0xbe   : > { %v527_v0 = vld [vmem:[%s3460_s17] sm:$0xff]  ;;  %v528_v1 = vld [vmem:[%s3460_s17 + $0x8] sm:$0xff]  ;;  %v2796_v31 = vld [vmem:[%s3868_s3 + $0x90] ss:$12 sps:$4 sm:$0xff]   ;;  %v3563_v54 = vshrl.u32 %v601_v53, 7  ;;  %vm833_vm1 = vcmask 261120   ;;  %s525_s28 = scalar_lea.vmem %s3877_s12, %s3454_s25 }
  0xbf   : > { %531 = vadd.xlane.f32.xlu0 %v527_v0  ;;  %747 = vmatpush1.bf16.msra.mxu0 %v2776_v15  ;;  %v2782_v20 = vld [vmem:[%s3868_s3 + $0x4c] ss:$12 sps:$4 sm:$0xff]   ;;  %v2786_v23 = vld [vmem:[%s3868_s3 + $0x64] ss:$12 sps:$4 sm:$0xff]   ;;  %v2789_v25 = vld [vmem:[%s3868_s3 + $0x68] ss:$12 sps:$4 sm:$0xff]  }
  0xc0   : > { %2583 = vmatpush3.bf16.msra.mxu1 %v2777_v16  ;;  %748 = vmatprep.subr.bf16.mxu0 %v2778_v17  ;;  %v2788_v24 = vld [vmem:[%s3868_s3 + $0x60] ss:$12 sps:$4 sm:$0xff]   ;;  %v2790_v26 = vld [vmem:[%s3868_s3 + $0x7c] ss:$12 sps:$4 sm:$0xff]   ;;  %v2792_v27 = vld [vmem:[%s3868_s3 + $0x78] ss:$12 sps:$4 sm:$0xff]  }
  0xc1   : > { %2584 = vmatprep.subr.bf16.mxu1 %v3177_v4  ;;  %v2793_v28 = vld [vmem:[%s3868_s3 + $0x80] ss:$12 sps:$4 sm:$0xff]   ;;  %v2797_v32 = vld [vmem:[%s3868_s3 + $0x98] ss:$12 sps:$4 sm:$0xff]   ;;  %v2800_v34 = vld [vmem:[%s3868_s3 + $0xa8] ss:$12 sps:$4 sm:$0xff]  }
  0xc2   : > { %v2794_v29 = vld [vmem:[%s3868_s3 + $0x94] ss:$12 sps:$4 sm:$0xff]   ;;  %v2798_v33 = vld [vmem:[%s3868_s3 + $0xac] ss:$12 sps:$4 sm:$0xff]   ;;  %v2801_v35 = vld [vmem:[%s3868_s3 + $0xb0] ss:$12 sps:$4 sm:$0xff]  }
  0xc3   : > { %533 = vadd.xlane.f32.xlu0 %v528_v1  ;;  %749 = vmatpush1.bf16.msra.mxu0 %v2780_v18  ;;  %v2387_v44 = vld [vmem:[#allocation2] ss:$0 sm:$0xff]  ;;  %v2388_v48 = vld [vmem:[#allocation2 + $0x1] ss:$0 sm:$0xff]  ;;  %v603_v55 = vsub.s32 0, %v3563_v54  ;;  %v611_v56 = vsub.s32 2, %v3563_v54 }
  0xc4   : > { %2585 = vmatpush3.bf16.msra.mxu1 %v2781_v19  ;;  %750 = vmatprep.subr.bf16.mxu0 %v2782_v20  ;;  %v599_v57 = vld [vmem:[#allocation4] sm:$0x7]  ;;  %v607_v58 = vsub.s32 1, %v3563_v54  ;;  %v3589_v19 = vld [vmem:[%s520_s27 + $0x8] sm:$0xff]  ;;  %vm881_vm2 = vcmask 130048   ;;  %s3180_s16 = smov 96  }
  0xc5   : > { %2586 = vmatprep.subr.bf16.mxu1 %v3177_v4  ;;  %v604_v59 = vrot.slane %v599_v57, %v603_v55  ;;  %v612_v60 = vrot.slane %v599_v57, %v611_v56  ;;  %v3587_v17 = vld [vmem:[%s520_s27] sm:$0xff]  ;;  %s3181_s30 = smov 64   ;;  %s3182_s14 = smov 32   ;;  %vm1341_vm3 = vcmask 523264   ;;  %vm1344_vm4 = vcmask 785408  }
  0xc6   : > { %v608_v63 = vrot.slane %v599_v57, %v607_v58 }
  0xc7   : > { %751 = vmatpush1.bf16.msra.mxu0 %v2784_v21 }
  0xc8   : > { %2587 = vmatpush3.bf16.msra.mxu1 %v2785_v22  ;;  %752 = vmatprep.subr.bf16.mxu0 %v2786_v23 }
  0xc9   : > { %2588 = vmatprep.subr.bf16.mxu1 %v3177_v4 }
  0xcb   : > { %753 = vmatpush1.bf16.msra.mxu0 %v2788_v24 }
  0xcc   : > { %2589 = vmatpush3.bf16.msra.mxu1 %v2789_v25  ;;  %754 = vmatprep.subr.bf16.mxu0 %v2790_v26 }
  0xcd   : > { %2590 = vmatprep.subr.bf16.mxu1 %v3177_v4 }
  0xcf   : > { %755 = vmatpush1.bf16.msra.mxu0 %v2792_v27 }
  0xd0   : > { %2591 = vmatpush3.bf16.msra.mxu1 %v2793_v28  ;;  %756 = vmatprep.subr.bf16.mxu0 %v2794_v29 }
  0xd1   : > { %2592 = vmatprep.subr.bf16.mxu1 %v3177_v4 }
  0xd3   : > { %757 = vmatpush1.bf16.msra.mxu0 %v2796_v31 }
  0xd4   : > { %2593 = vmatpush3.bf16.msra.mxu1 %v2797_v32  ;;  %758 = vmatprep.subr.bf16.mxu0 %v2798_v33 }
  0xd5   : > { %2594 = vmatprep.subr.bf16.mxu1 %v3177_v4 }
  0xd7   : > { %759 = vmatpush1.bf16.msra.mxu0 %v2800_v34 }
  0xd8   : > { %2595 = vmatpush3.bf16.msra.mxu1 %v2801_v35  ;;  %2624 = vmatprep.subr.bf16.mxu0 %v3177_v4 }
  0xd9   : > { %2600 = vmatprep.subr.bf16.mxu1 %v3177_v4 }
 0x14c   : > { %v532_v7 = vpop.xlane.xlu0 %531 }
 0x14d   : > { %v536_v8 = vmul.f32 0.0078125, %v532_v7 }
 0x14f   : > { %v3478_v9 = vsub.f32 %v527_v0, %v536_v8 }
 0x150   : > { %v534_v10 = vpop.xlane.xlu0 %533 }
 0x151   : > { %v537_v11 = vmul.f32 0.0078125, %v534_v10  ;;  %v540_v12 = vmul.f32 %v3478_v9, %v3478_v9 }
 0x153   : > { %v3482_v13 = vsub.f32 %v528_v1, %v537_v11  ;;  %542 = vadd.xlane.f32.xlu1 %v540_v12 }
 0x155   : > { %v541_v14 = vmul.f32 %v3482_v13, %v3482_v13 }
 0x157   : > { %544 = vadd.xlane.f32.xlu1 %v541_v14 }
 0x1e0   : > { %v543_v36 = vpop.xlane.xlu1 %542 }
 0x1e1   : > { %v546_v37 = vmul.f32 0.0078125, %v543_v36 }
 0x1e3   : > { %v548_v38 = vadd.f32 1e-05, %v546_v37 }
 0x1e4   : > { %v545_v39 = vpop.xlane.xlu1 %544 }
 0x1e5   : > { %2890 = vrsqrt.f32 %v548_v38  ;;  %v547_v40 = vmul.f32 0.0078125, %v545_v39 }
 0x1e7   : > { %v549_v41 = vadd.f32 1e-05, %v547_v40 }
 0x1e9   : > { %2892 = vrsqrt.f32 %v549_v41 }
 0x1ef   : > { %v2891_v42 = vpop.eup %2890 }
 0x1f0   : > { %v552_v43 = vmul.f32 %v2891_v42, %v3478_v9 }
 0x1f2   : > { %v558_v47 = vmul.f32 %v2387_v44, %v552_v43 }
 0x1f3   : > { %v2893_v45 = vpop.eup %2892 }
 0x1f4   : > { %v553_v46 = vmul.f32 %v2893_v45, %v3482_v13  ;;  %v564_v50 = vadd.f32 %v2388_v48, %v558_v47 }
 0x1f6   : > { %v559_v49 = vmul.f32 %v2387_v44, %v553_v46 }
 0x1f8   : > { %v565_v51 = vadd.f32 %v2388_v48, %v559_v49 }
 0x1fa   : > { %v566_v52 = vpack.c.bf16 %v565_v51, %v564_v50 }
 0x1fc   : > { %777 = vmatmul.mubr.bf16.vlgmr.msra.gmra.mrb[0].mxu0 %v566_v52  ;;  %2597 = vmatmul.mubr.bf16.vlgmr.msra.gmra.mrb[0].mxu1 %v566_v52 }
 0x1fd   : > { %2602 = vmatprep.mubr.msk.bf16.mxu1 %vm3179_vm0, %v3177_v4  ;;  %2626 = vmatprep.mubr.msk.bf16.mxu0 %vm3179_vm0, %v3177_v4 }
 0x2cf   : > { %v778_v61 = vpop.f32.mrb[0].mxu0  ;;  %v821_v62 = vpop.f32.mrb[0].mxu1 }
 0x2d0   : > { %v780_v0 = vpop.f32.mrb[1].mxu0  ;;  %v2598_v1 = vpop.f32.mrb[1].mxu1  ;;  %v779_v5 = vadd.f32 %v778_v61, %v604_v59  ;;  %v822_v6 = vadd.f32 %v821_v62, %v612_v60 }
 0x2d1   : > { %v782_v2 = vpop.f32.mrb[2].mxu0  ;;  %v824_v3 = vpop.f32.mrb[2].mxu1  ;;  %v781_v11 = vadd.f32 %v780_v0, %v608_v63 }
 0x2d2   : > { %v783_v7 = vadd.f32 %v782_v2, %v604_v59  ;;  %v825_v8 = vadd.f32 %v824_v3, %v612_v60  ;;  %v784_v9 = vpop.f32.mrb[3].mxu0  ;;  %v2599_v10 = vpop.f32.mrb[3].mxu1 }
 0x2d3   : > { %v785_v12 = vadd.f32 %v784_v9, %v608_v63 }
 0x2d4   : > { %v828_v13 = vpack.c.bf16 %v783_v7, %v779_v5  ;;  %v3574_v14 = vpack.c.bf16 %v825_v8, %v822_v6 }
 0x2d5   : > { %v829_v15 = vpack.c.bf16 %v785_v12, %v781_v11 }
 0x2d7   : > { %v838_v16 = vsel %vm833_vm1, %v829_v15, 0 }
 0x2d8   : > { %2601 = vmatpush3.bf16.xpose.msra.mxu1 %v838_v16 }
 0x2d9   : > { %2606 = vmatprep.subr.bf16.mxu1 %v3177_v4 }
 0x2df   : > { %2603 = vmatmul.mubr.msk.bf16.vlgmr.msra.gmra.mrb[4].mxu1 %vm833_vm1, %v828_v13 }
 0x2e0   : > { %2607 = vmatpush3.bf16.msra.mxu1 %v3574_v14  ;;  %2608 = vmatprep.mubr.msk.bf16.mxu1 %vm3179_vm0, %v3177_v4 }
 0x2e1   : > { %2612 = vmatprep.subr.bf16.mxu1 %v3177_v4 }
 0x3b2   : > { %v874_v18 = vpop.f32.mrb[4].mxu1 }
 0x3b3   : > { %v875_v20 = vadd.f32 %v874_v18, %v3587_v17  ;;  %v2604_v21 = vpop.f32.mrb[5].mxu1 }
 0x3b4   : > { %v877_v22 = vpop.f32.mrb[6].mxu1 }
 0x3b5   : > { %v878_v23 = vadd.f32 %v877_v22, %v3589_v19  ;;  %v2605_v24 = vpop.f32.mrb[7].mxu1  ;;  %v882_v25 = vsel %vm881_vm2, %v875_v20, -inf }
 0x3b6   : > { %883 = vmax.xlane.f32.xlu0 %v882_v25 }
 0x3b7   : > { %v885_v26 = vsel %vm881_vm2, %v878_v23, -inf }
 0x3b8   : > { %886 = vmax.xlane.f32.xlu1 %v885_v26 }
 0x443   : > { %v884_v27 = vpop.xlane.xlu0 %883 }
 0x444   : > { %v888_v28 = vsub.f32 %v875_v20, %v884_v27 }
 0x445   : > { %v887_v29 = vpop.xlane.xlu1 %886 }
 0x446   : > { %v890_v31 = vmul.f32 1.442695, %v888_v28  ;;  %v889_v32 = vsub.f32 %v878_v23, %v887_v29 }
 0x448   : > { %2894 = vpow2.f32 %v890_v31  ;;  %v892_v33 = vmul.f32 1.442695, %v889_v32 }
 0x44a   : > { %2896 = vpow2.f32 %v892_v33 }
 0x452   : > { %v2895_v34 = vpop.eup %2894 }
 0x453   : > { %v894_v35 = vsel %vm881_vm2, %v2895_v34, 0.0 }
 0x454   : > { %v2897_v36 = vpop.eup %2896  ;;  %895 = vadd.xlane.f32.xlu0 %v894_v35 }
 0x455   : > { %v897_v37 = vsel %vm881_vm2, %v2897_v36, 0.0 }
 0x456   : > { %898 = vadd.xlane.f32.xlu1 %v897_v37 }
 0x467   : > { %950 = vrot.lane.b32.xlu1 %v828_v13, %s3180_s16 }
 0x46a   : > { %953 = vrot.lane.b32.xlu0 %v829_v15, %s3180_s16 }
 0x46b   : > { %1075 = vrot.lane.b32.xlu1 %v829_v15, %s3181_s30 }
 0x46e   : > { %1196 = vrot.lane.b32.xlu0 %v829_v15, %s3182_s14 }
 0x46f   : > { %1073 = vrot.lane.b32.xlu1 %v828_v13, %s3181_s30 }
 0x473   : > { %1194 = vrot.lane.b32.xlu1 %v828_v13, %s3182_s14 }
 0x4e1   : > { %v896_v38 = vpop.xlane.xlu0 %895 }
 0x4e2   : > { %2898 = vrcp.f32 %v896_v38 }
 0x4e3   : > { %v899_v39 = vpop.xlane.xlu1 %898 }
 0x4e4   : > { %2900 = vrcp.f32 %v899_v39 }
 0x4e5   : > { %v954_v41 = vpop.permute.xlu0 %953 }
 0x4e6   : > { %v959_v50 = vsel %vm833_vm1, %v954_v41, 0 }
 0x4e7   : > { %v951_v40 = vpop.permute.xlu1 %950 }
 0x4e9   : > { %v1197_v48 = vpop.permute.xlu0 %1196 }
 0x4ea   : > { %v1202_v52 = vsel %vm833_vm1, %v1197_v48, 0 }
 0x4eb   : > { %v1076_v42 = vpop.permute.xlu1 %1075 }
 0x4ec   : > { %v2899_v43 = vpop.eup %2898  ;;  %v1081_v44 = vsel %vm833_vm1, %v1076_v42, 0 }
 0x4ed   : > { %2625 = vmatpush3.bf16.xpose.msra.mxu0 %v1081_v44  ;;  %v902_v46 = vmul.f32 %v2899_v43, %v2895_v34 }
 0x4ee   : > { %v2901_v45 = vpop.eup %2900  ;;  %2636 = vmatprep.subr.bf16.mxu0 %v3177_v4 }
 0x4ef   : > { %v903_v47 = vmul.f32 %v2901_v45, %v2897_v36  ;;  %v1074_v51 = vpop.permute.xlu1 %1073 }
 0x4f1   : > { %v904_v49 = vpack.c.bf16 %v903_v47, %v902_v46 }
 0x4f3   : > { %2609 = vmatmul.mubr.msk.bf16.vlgmr.msra.gmra.mrb[8].mxu1 %vm881_vm2, %v904_v49  ;;  %v1195_v53 = vpop.permute.xlu1 %1194 }
 0x4f4   : > { %2613 = vmatpush3.bf16.xpose.msra.mxu1 %v959_v50  ;;  %2627 = vmatmul.mubr.msk.bf16.vlgmr.msra.gmra.mrb[4].mxu0 %vm833_vm1, %v1074_v51 }
 0x4f5   : > { %2637 = vmatpush3.bf16.xpose.msra.mxu0 %v1202_v52  ;;  %2614 = vmatprep.mubr.msk.bf16.mxu1 %vm3179_vm0, %v3177_v4 }
 0x4f6   : > { %2638 = vmatprep.mubr.msk.bf16.mxu0 %vm3179_vm0, %v3177_v4  ;;  %2618 = vmatprep.subr.bf16.mxu1 %v3177_v4 }
 0x4f7   : > { %2648 = vmatprep.subr.bf16.mxu0 %v3177_v4 }
 0x4fb   : > { %2615 = vmatmul.mubr.msk.bf16.vlgmr.msra.gmra.mrb[12].mxu1 %vm833_vm1, %v951_v40 }
 0x4fc   : > { %2639 = vmatmul.mubr.msk.bf16.vlgmr.msra.gmra.mrb[8].mxu0 %vm833_vm1, %v1195_v53  ;;  %2620 = vmatprep.mubr.msk.bf16.mxu1 %vm3179_vm0, %v3177_v4 }
 0x4fd   : > { %2664 = vmatprep.mubr.msk.bf16.mxu0 %vm3179_vm0, %v3177_v4 }
 0x5c6   : > { %v3621_v57 = vpop.f32.mrb[8].mxu1 }
 0x5c7   : > { %v2610_v59 = vpop.f32.mrb[9].mxu1  ;;  %v1117_v60 = vpop.f32.mrb[4].mxu0 }
 0x5c8   : > { %v3623_v61 = vpop.f32.mrb[10].mxu1  ;;  %v2628_v62 = vpop.f32.mrb[5].mxu0  ;;  %v1118_v9 = vadd.f32 %v1117_v60, %v3587_v17 }
 0x5c9   : > { %v2611_v63 = vpop.f32.mrb[11].mxu1  ;;  %v1120_v0 = vpop.f32.mrb[6].mxu0 }
 0x5ca   : > { %v2629_v1 = vpop.f32.mrb[7].mxu0  ;;  %v1121_v20 = vadd.f32 %v1120_v0, %v3589_v19  ;;  %v1124_v21 = vsel %vm881_vm2, %v1118_v9, -inf }
 0x5cc   : > { %v1127_v24 = vsel %vm881_vm2, %v1121_v20, -inf }
 0x5ce   : > { %v995_v2 = vpop.f32.mrb[12].mxu1 }
 0x5cf   : > { %v996_v3 = vadd.f32 %v995_v2, %v3587_v17  ;;  %v2616_v5 = vpop.f32.mrb[13].mxu1  ;;  %v1238_v6 = vpop.f32.mrb[8].mxu0 }
 0x5d0   : > { %v998_v7 = vpop.f32.mrb[14].mxu1  ;;  %v2640_v8 = vpop.f32.mrb[9].mxu0  ;;  %v1239_v23 = vadd.f32 %v1238_v6, %v3587_v17 }
 0x5d1   : > { %v999_v10 = vadd.f32 %v998_v7, %v3589_v19  ;;  %v2617_v11 = vpop.f32.mrb[15].mxu1  ;;  %v1241_v12 = vpop.f32.mrb[10].mxu0  ;;  %v1002_v13 = vsel %vm881_vm2, %v996_v3, -inf }
 0x5d2   : > { %v2641_v15 = vpop.f32.mrb[11].mxu0  ;;  %1003 = vmax.xlane.f32.xlu0 %v1002_v13  ;;  %v1242_v16 = vadd.f32 %v1241_v12, %v3589_v19  ;;  %v1245_v25 = vsel %vm881_vm2, %v1239_v23, -inf }
 0x5d3   : > { %v1005_v18 = vsel %vm881_vm2, %v999_v10, -inf }
 0x5d4   : > { %1006 = vmax.xlane.f32.xlu1 %v1005_v18  ;;  %v1248_v22 = vsel %vm881_vm2, %v1242_v16, -inf }
 0x5d6   : > { %1125 = vmax.xlane.f32.xlu0 %v1124_v21 }
 0x5d8   : > { %1249 = vmax.xlane.f32.xlu1 %v1248_v22 }
 0x5da   : > { %1128 = vmax.xlane.f32.xlu0 %v1127_v24  ;;  %v2802_v24 = vld [vmem:[#allocation6] sm:$0xff]  }
 0x5db   : > { %2649 = vmatpush3.bf16.msra.mxu0 %v2802_v24 }
 0x5dc   : > { %2650 = vmatprep.subr.bf16.mxu0 %v3177_v4 }
 0x5de   : > { %1246 = vmax.xlane.f32.xlu0 %v1245_v25  ;;  %v2803_v25 = vld [vmem:[#allocation6 + $0x8] sm:$0xff]  }
 0x5df   : > { %2651 = vmatpush3.bf16.msra.mxu0 %v2803_v25 }
 0x5e0   : > { %2652 = vmatprep.subr.bf16.mxu0 %v3177_v4 }
 0x65f   : > { %v1004_v26 = vpop.xlane.xlu0 %1003 }
 0x660   : > { %v1008_v35 = vsub.f32 %v996_v3, %v1004_v26  ;;  %v2804_v26 = vld [vmem:[#allocation6 + $0x10] sm:$0xff]  }
 0x661   : > { %v1007_v27 = vpop.xlane.xlu1 %1006  ;;  %2653 = vmatpush3.bf16.msra.mxu0 %v2804_v26 }
 0x662   : > { %v1009_v36 = vsub.f32 %v999_v10, %v1007_v27  ;;  %v1010_v40 = vmul.f32 1.442695, %v1008_v35  ;;  %2654 = vmatprep.subr.bf16.mxu0 %v3177_v4  ;;  %v2805_v27 = vld [vmem:[#allocation6 + $0x18] sm:$0xff]   ;;  %v2808_v35 = vld [vmem:[#allocation6 + $0x30] sm:$0xff]  }
 0x663   : > { %v1126_v28 = vpop.xlane.xlu0 %1125 }
 0x664   : > { %v1130_v29 = vsub.f32 %v1118_v9, %v1126_v28  ;;  %v1012_v41 = vmul.f32 1.442695, %v1009_v36  ;;  %v2806_v28 = vld [vmem:[#allocation6 + $0x20] sm:$0xff]  }
 0x665   : > { %v1250_v31 = vpop.xlane.xlu1 %1249  ;;  %2655 = vmatpush3.bf16.msra.mxu0 %v2805_v27 }
 0x666   : > { %v1132_v19 = vmul.f32 1.442695, %v1130_v29  ;;  %v1252_v32 = vsub.f32 %v1242_v16, %v1250_v31  ;;  %2656 = vmatprep.subr.bf16.mxu0 %v3177_v4 }
 0x667   : > { %v1129_v33 = vpop.xlane.xlu0 %1128 }
 0x668   : > { %2902 = vpow2.f32 %v1132_v19  ;;  %v1131_v34 = vsub.f32 %v1121_v20, %v1129_v33  ;;  %v1255_v37 = vmul.f32 1.442695, %v1252_v32  ;;  %v2807_v19 = vld [vmem:[#allocation6 + $0x28] sm:$0xff]  }
 0x669   : > { %2657 = vmatpush3.bf16.msra.mxu0 %v2806_v28 }
 0x66a   : > { %v1134_v17 = vmul.f32 1.442695, %v1131_v34  ;;  %2658 = vmatprep.subr.bf16.mxu0 %v3177_v4 }
 0x66b   : > { %v1247_v38 = vpop.xlane.xlu0 %1246 }
 0x66c   : > { %2904 = vpow2.f32 %v1134_v17  ;;  %v1251_v39 = vsub.f32 %v1239_v23, %v1247_v38  ;;  %v2809_v17 = vld [vmem:[#allocation6 + $0x38] sm:$0xff]  }
 0x66d   : > { %2906 = vpow2.f32 %v1255_v37  ;;  %2659 = vmatpush3.bf16.msra.mxu0 %v2807_v19  ;;  %v2827_v19 = vld [vmem:[%s3873_s8 + $0x4c] ss:$16 sps:$4 sm:$0xff]  }
 0x66e   : > { %v1253_v42 = vmul.f32 1.442695, %v1251_v39  ;;  %2660 = vmatprep.subr.bf16.mxu0 %v3177_v4 }
 0x670   : > { %2908 = vpow2.f32 %v1253_v42 }
 0x671   : > { %2910 = vpow2.f32 %v1010_v40  ;;  %2661 = vmatpush3.bf16.msra.mxu0 %v2808_v35  ;;  %v2833_v35 = vld [vmem:[%s3873_s8 + $0x6c] ss:$16 sps:$4 sm:$0xff]  }
 0x672   : > { %v2903_v43 = vpop.eup %2902  ;;  %2912 = vpow2.f32 %v1012_v41  ;;  %2662 = vmatprep.subr.bf16.mxu0 %v3177_v4 }
 0x673   : > { %v1136_v44 = vsel %vm881_vm2, %v2903_v43, 0.0 }
 0x674   : > { %1137 = vadd.xlane.f32.xlu0 %v1136_v44 }
 0x675   : > { %2663 = vmatpush3.bf16.msra.mxu0 %v2809_v17  ;;  %v2836_v17 = vld [vmem:[%s3873_s8 + $0x84] ss:$16 sps:$4 sm:$0xff]  }
 0x676   : > { %v2905_v45 = vpop.eup %2904 }
 0x677   : > { %v1139_v46 = vsel %vm881_vm2, %v2905_v45, 0.0  ;;  %v2907_v47 = vpop.eup %2906 }
 0x678   : > { %1140 = vadd.xlane.f32.xlu1 %v1139_v46  ;;  %v1260_v51 = vsel %vm881_vm2, %v2907_v47, 0.0 }
 0x67a   : > { %v2909_v48 = vpop.eup %2908 }
 0x67b   : > { %v2911_v49 = vpop.eup %2910  ;;  %v1257_v50 = vsel %vm881_vm2, %v2909_v48, 0.0 }
 0x67c   : > { %v2913_v52 = vpop.eup %2912  ;;  %1258 = vadd.xlane.f32.xlu0 %v1257_v50  ;;  %1261 = vadd.xlane.f32.xlu1 %v1260_v51  ;;  %v1014_v53 = vsel %vm881_vm2, %v2911_v49, 0.0 }
 0x67d   : > { %v1017_v59 = vsel %vm881_vm2, %v2913_v52, 0.0 }
 0x680   : > { %1015 = vadd.xlane.f32.xlu0 %v1014_v53  ;;  %1018 = vadd.xlane.f32.xlu1 %v1017_v59 }
 0x691   : > { %1147 = vrot.lane.b32.xlu1 %v3574_v14, %s3181_s30 }
 0x695   : > { %1268 = vrot.lane.b32.xlu1 %v3574_v14, %s3182_s14 }
 0x696   : > { %1026 = vrot.lane.b32.xlu0 %v3574_v14, %s3180_s16 }
 0x701   : > { %v1138_v60 = vpop.xlane.xlu0 %1137 }
 0x705   : > { %v1141_v62 = vpop.xlane.xlu1 %1140 }
 0x709   : > { %v1259_v63 = vpop.xlane.xlu0 %1258  ;;  %v1262_v0 = vpop.xlane.xlu1 %1261 }
 0x70d   : > { %v1016_v1 = vpop.xlane.xlu0 %1015  ;;  %v1019_v2 = vpop.xlane.xlu1 %1018 }
 0x70e   : > { %2914 = vrcp.f32 %v1016_v1 }
 0x70f   : > { %2916 = vrcp.f32 %v1019_v2 }
 0x710   : > { %2918 = vrcp.f32 %v1141_v62 }
 0x711   : > { %v1027_v3 = vpop.permute.xlu0 %1026  ;;  %2920 = vrcp.f32 %v1138_v60  ;;  %v1148_v10 = vpop.permute.xlu1 %1147 }
 0x712   : > { %2619 = vmatpush3.bf16.msra.mxu1 %v1027_v3  ;;  %2922 = vrcp.f32 %v1259_v63 }
 0x713   : > { %2630 = vmatprep.subr.bf16.mxu1 %v3177_v4  ;;  %2924 = vrcp.f32 %v1262_v0 }
 0x715   : > { %v1269_v20 = vpop.permute.xlu1 %1268 }
 0x718   : > { %v2915_v5 = vpop.eup %2914 }
 0x719   : > { %v2917_v6 = vpop.eup %2916  ;;  %v1022_v7 = vmul.f32 %v2915_v5, %v2911_v49  ;;  %v2429_v5 = vld [vmem:[%s3871_s6] ss:$0 sm:$0xff] }
 0x71a   : > { %v1023_v8 = vmul.f32 %v2917_v6, %v2913_v52  ;;  %v2919_v9 = vpop.eup %2918 }
 0x71b   : > { %v2921_v11 = vpop.eup %2920  ;;  %v1145_v12 = vmul.f32 %v2919_v9, %v2905_v45 }
 0x71c   : > { %v1024_v14 = vpack.c.bf16 %v1023_v8, %v1022_v7  ;;  %v1144_v13 = vmul.f32 %v2921_v11, %v2903_v43  ;;  %v2923_v15 = vpop.eup %2922 }
 0x71d   : > { %v2925_v18 = vpop.eup %2924  ;;  %v1265_v21 = vmul.f32 %v2923_v15, %v2909_v48  ;;  %v2815_v15 = vld [vmem:[%s3873_s8 + $0xc] ss:$16 sps:$4 sm:$0xff]  }
 0x71e   : > { %2621 = vmatmul.mubr.msk.bf16.vlgmr.msra.gmra.mrb[16].mxu1 %vm881_vm2, %v1024_v14  ;;  %v1146_v16 = vpack.c.bf16 %v1145_v12, %v1144_v13  ;;  %v1266_v22 = vmul.f32 %v2925_v18, %v2907_v47  ;;  %v2947_v14 = vld [vmem:[%s3460_s17 + $0x8] sm:$0xff]  ;;  %v2812_v12 = vld [vmem:[%s3873_s8 + $0x4] ss:$16 sps:$4 sm:$0xff]   ;;  %1758 = vmatprep.subr.bf16.mxu0 %v2815_v15 }
 0x71f   : > { %2631 = vmatpush3.bf16.msra.mxu1 %v1148_v10  ;;  %2632 = vmatprep.mubr.msk.bf16.mxu1 %vm3179_vm0, %v3177_v4  ;;  %v2813_v13 = vld [vmem:[%s3873_s8 + $0x8] ss:$16 sps:$4 sm:$0xff]   ;;  %v2821_v18 = vld [vmem:[%s3873_s8 + $0x2c] ss:$16 sps:$4 sm:$0xff]  }
 0x720   : > { %2642 = vmatprep.subr.bf16.mxu1 %v3177_v4  ;;  %v1267_v23 = vpack.c.bf16 %v1266_v22, %v1265_v21  ;;  %v2819_v21 = vld [vmem:[%s3873_s8 + $0x28] ss:$16 sps:$4 sm:$0xff]  }
 0x721   : > { %v2862_v15 = vld [vmem:[#allocation10 + $0x48] sm:$0xff]  }
 0x726   : > { %2633 = vmatmul.mubr.msk.bf16.vlgmr.msra.gmra.mrb[20].mxu1 %vm881_vm2, %v1146_v16  ;;  %v2818_v16 = vld [vmem:[%s3873_s8 + $0x24] ss:$16 sps:$4 sm:$0xff]  }
 0x727   : > { %2643 = vmatpush3.bf16.msra.mxu1 %v1269_v20  ;;  %2644 = vmatprep.mubr.msk.bf16.mxu1 %vm3179_vm0, %v3177_v4  ;;  %v2816_v20 = vld [vmem:[%s3873_s8 + $0x20] ss:$16 sps:$4 sm:$0xff]  }
 0x728   : > { %1715 = vmatprep.subr.bf16.mxu1 %v2812_v12  ;;  %v2860_v12 = vld [vmem:[#allocation10] sm:$0xff]  }
 0x72e   : > { %2645 = vmatmul.mubr.msk.bf16.vlgmr.msra.gmra.mrb[24].mxu1 %vm881_vm2, %v1267_v23 }
 0x72f   : > { %1747 = vmatprep.mubr.bf16.mxu1 %v3178_v30 }
 0x7f1   : > { %v1066_v29 = vpop.f32.mrb[16].mxu1 }
 0x7f2   : > { %v2622_v31 = vpop.f32.mrb[17].mxu1 }
 0x7f3   : > { %v1069_v32 = vpop.f32.mrb[18].mxu1  ;;  %v2824_v31 = vld [vmem:[%s3873_s8 + $0x44] ss:$16 sps:$4 sm:$0xff]  }
 0x7f4   : > { %v2755_v33 = vpack.i.bf16 %v1069_v32, %v1066_v29  ;;  %v2623_v34 = vpop.f32.mrb[19].mxu1  ;;  %v2822_v32 = vld [vmem:[%s3873_s8 + $0x40] ss:$16 sps:$4 sm:$0xff]  }
 0x7f5   : > { %v2830_v34 = vld [vmem:[%s3873_s8 + $0x64] ss:$16 sps:$4 sm:$0xff]  }
 0x7f6   : > { %2756 = vrot.lane.b32.xlu1 %v2755_v33, %s3182_s14  ;;  %v2825_v33 = vld [vmem:[%s3873_s8 + $0x48] ss:$16 sps:$4 sm:$0xff]  }
 0x7f9   : > { %v1187_v36 = vpop.f32.mrb[20].mxu1 }
 0x7fa   : > { %v2634_v37 = vpop.f32.mrb[21].mxu1 }
 0x7fb   : > { %v1190_v38 = vpop.f32.mrb[22].mxu1  ;;  %v2831_v37 = vld [vmem:[%s3873_s8 + $0x68] ss:$16 sps:$4 sm:$0xff]  }
 0x7fc   : > { %v2760_v39 = vpack.i.bf16 %v1190_v38, %v1187_v36  ;;  %v2635_v40 = vpop.f32.mrb[23].mxu1  ;;  %v2828_v36 = vld [vmem:[%s3873_s8 + $0x60] ss:$16 sps:$4 sm:$0xff]   ;;  %v2839_v38 = vld [vmem:[%s3873_s8 + $0x8c] ss:$16 sps:$4 sm:$0xff]  }
 0x7fd   : > { %v2837_v40 = vld [vmem:[%s3873_s8 + $0x88] ss:$16 sps:$4 sm:$0xff]  }
 0x7fe   : > { %2761 = vrot.lane.b32.xlu0 %v2760_v39, %s3181_s30  ;;  %v2834_v39 = vld [vmem:[%s3873_s8 + $0x80] ss:$16 sps:$4 sm:$0xff]  }
 0x801   : > { %v1308_v41 = vpop.f32.mrb[24].mxu1 }
 0x802   : > { %v2646_v42 = vpop.f32.mrb[25].mxu1 }
 0x803   : > { %v1311_v43 = vpop.f32.mrb[26].mxu1  ;;  %v2845_v42 = vld [vmem:[%s3873_s8 + $0xac] ss:$16 sps:$4 sm:$0xff]  }
 0x804   : > { %v2765_v44 = vpack.i.bf16 %v1311_v43, %v1308_v41  ;;  %v2647_v45 = vpop.f32.mrb[27].mxu1  ;;  %v2842_v41 = vld [vmem:[%s3873_s8 + $0xa4] ss:$16 sps:$4 sm:$0xff]   ;;  %v2840_v43 = vld [vmem:[%s3873_s8 + $0xa0] ss:$16 sps:$4 sm:$0xff]  }
 0x805   : > { %v2848_v45 = vld [vmem:[%s3873_s8 + $0xc4] ss:$16 sps:$4 sm:$0xff]  }
 0x806   : > { %2766 = vrot.lane.b32.xlu1 %v2765_v44, %s3180_s16  ;;  %v2843_v44 = vld [vmem:[%s3873_s8 + $0xa8] ss:$16 sps:$4 sm:$0xff]  }
 0x868   : > { %v2757_v46 = vpop.permute.xlu1 %2756 }
 0x869   : > { %v2759_v48 = vunpack.i.h.bf16 %v2757_v46  ;;  %v2758_v49 = vunpack.i.l.bf16 %v2757_v46  ;;  %v2851_v46 = vld [vmem:[%s3873_s8 + $0xcc] ss:$16 sps:$4 sm:$0xff]  }
 0x86b   : > { %v1340_v52 = vsel %vm833_vm1, %v3623_v61, %v2759_v48  ;;  %v1339_v53 = vsel %vm833_vm1, %v3621_v57, %v2758_v49  ;;  %v2946_v61 = vld [vmem:[%s3460_s17] sm:$0xff]  ;;  %v2849_v48 = vld [vmem:[%s3873_s8 + $0xc8] ss:$16 sps:$4 sm:$0xff]  }
 0x86c   : > { %v2854_v49 = vld [vmem:[%s3873_s8 + $0xe4] ss:$16 sps:$4 sm:$0xff]  }
 0x870   : > { %v2762_v47 = vpop.permute.xlu0 %2761 }
 0x871   : > { %v2764_v4 = vunpack.i.h.bf16 %v2762_v47  ;;  %v2763_v50 = vunpack.i.l.bf16 %v2762_v47  ;;  %v2846_v47 = vld [vmem:[%s3873_s8 + $0xc0] ss:$16 sps:$4 sm:$0xff]  }
 0x873   : > { %v1343_v62 = vsel %vm1341_vm3, %v1340_v52, %v2764_v4  ;;  %v1342_v63 = vsel %vm1341_vm3, %v1339_v53, %v2763_v50  ;;  %v2857_v4 = vld [vmem:[%s3873_s8 + $0xec] ss:$16 sps:$4 sm:$0xff]   ;;  %v2852_v50 = vld [vmem:[%s3873_s8 + $0xe0] ss:$16 sps:$4 sm:$0xff]  }
 0x878   : > { %v2767_v51 = vpop.permute.xlu1 %2766 }
 0x879   : > { %v2769_v59 = vunpack.i.h.bf16 %v2767_v51  ;;  %v2768_v60 = vunpack.i.l.bf16 %v2767_v51  ;;  %v2855_v51 = vld [vmem:[%s3873_s8 + $0xe8] ss:$16 sps:$4 sm:$0xff]  }
 0x87b   : > { %v1346_v0 = vsel %vm1344_vm4, %v1343_v62, %v2769_v59  ;;  %v1345_v1 = vsel %vm1344_vm4, %v1342_v63, %v2768_v60 }
 0x87c   : > { %v1347_v2 = vpack.c.bf16 %v1346_v0, %v1345_v1 }
 0x87e   : > { %2665 = vmatmul.mubr.bf16.vlgmr.msra.gmra.mrb[12].mxu0 %v1347_v2  ;;  %v2430_v2 = vld [vmem:[#allocation7] ss:$0 sm:$0xff] }
 0x87f   : > { %1790 = vmatprep.mubr.bf16.mxu0 %v3178_v30  ;;  %v2810_v30 = vld [vmem:[%s3873_s8] ss:$16 sps:$4 sm:$0xff]   ;;  %1759 = vmatpush1.bf16.msra.mxu0 %v2813_v13 }
 0x880   : > { %1716 = vmatpush1.bf16.msra.mxu1 %v2810_v30  ;;  %1760 = vmatprep.subr.bf16.mxu0 %v2821_v18  ;;  %v2859_v30 = vld [vmem:[#allocation10 + $0xc0] sm:$0xff]   ;;  %v2864_v18 = vld [vmem:[#allocation10 + $0x8] sm:$0xff]  }
 0x881   : > { %1717 = vmatprep.subr.bf16.mxu1 %v2818_v16  ;;  %v2861_v13 = vld [vmem:[#allocation10 + $0x80] sm:$0xff]   ;;  %v2863_v16 = vld [vmem:[#allocation10 + $0xc8] sm:$0xff]  }
 0x883   : > { %1761 = vmatpush1.bf16.msra.mxu0 %v2819_v21  ;;  %v2866_v21 = vld [vmem:[#allocation10 + $0x50] sm:$0xff]  }
 0x884   : > { %1718 = vmatpush1.bf16.msra.mxu1 %v2816_v20  ;;  %1762 = vmatprep.subr.bf16.mxu0 %v2827_v19  ;;  %v2865_v20 = vld [vmem:[#allocation10 + $0x88] sm:$0xff]   ;;  %v2876_v19 = vld [vmem:[#allocation10 + $0x20] sm:$0xff]  }
 0x885   : > { %1719 = vmatprep.subr.bf16.mxu1 %v2824_v31  ;;  %v2875_v31 = vld [vmem:[#allocation10 + $0xe0] sm:$0xff]  }
 0x887   : > { %1763 = vmatpush1.bf16.msra.mxu0 %v2825_v33  ;;  %v2878_v33 = vld [vmem:[#allocation10 + $0x68] sm:$0xff]  }
 0x888   : > { %1720 = vmatpush1.bf16.msra.mxu1 %v2822_v32  ;;  %1764 = vmatprep.subr.bf16.mxu0 %v2833_v35  ;;  %v2877_v32 = vld [vmem:[#allocation10 + $0xa0] sm:$0xff]   ;;  %v2880_v35 = vld [vmem:[#allocation10 + $0x28] sm:$0xff]  }
 0x889   : > { %1721 = vmatprep.subr.bf16.mxu1 %v2830_v34  ;;  %v2879_v34 = vld [vmem:[#allocation10 + $0xe8] sm:$0xff]  }
 0x88b   : > { %1765 = vmatpush1.bf16.msra.mxu0 %v2831_v37  ;;  %v2882_v37 = vld [vmem:[#allocation10 + $0x70] sm:$0xff]  }
 0x88c   : > { %1722 = vmatpush1.bf16.msra.mxu1 %v2828_v36  ;;  %1766 = vmatprep.subr.bf16.mxu0 %v2839_v38  ;;  %v2881_v36 = vld [vmem:[#allocation10 + $0xa8] sm:$0xff]   ;;  %v2884_v38 = vld [vmem:[#allocation10 + $0x30] sm:$0xff]  }
 0x88d   : > { %1723 = vmatprep.subr.bf16.mxu1 %v2836_v17  ;;  %v2883_v17 = vld [vmem:[#allocation10 + $0xf0] sm:$0xff]  }
 0x88f   : > { %1767 = vmatpush1.bf16.msra.mxu0 %v2837_v40  ;;  %v2886_v40 = vld [vmem:[#allocation10 + $0x78] sm:$0xff]  }
 0x890   : > { %1724 = vmatpush1.bf16.msra.mxu1 %v2834_v39  ;;  %1768 = vmatprep.subr.bf16.mxu0 %v2845_v42  ;;  %v2885_v39 = vld [vmem:[#allocation10 + $0xb0] sm:$0xff]   ;;  %v2888_v42 = vld [vmem:[#allocation10 + $0x38] sm:$0xff]  }
 0x891   : > { %1725 = vmatprep.subr.bf16.mxu1 %v2842_v41  ;;  %v2887_v41 = vld [vmem:[#allocation10 + $0xf8] sm:$0xff]  }
 0x893   : > { %1769 = vmatpush1.bf16.msra.mxu0 %v2843_v44  ;;  %v1533_v44 = vld [vmem:[#allocation9] sm:$0xf] }
 0x894   : > { %1726 = vmatpush1.bf16.msra.mxu1 %v2840_v43  ;;  %1770 = vmatprep.subr.bf16.mxu0 %v2851_v46  ;;  %v2889_v43 = vld [vmem:[#allocation10 + $0xb8] sm:$0xff]   ;;  %v1538_v46 = vrot.slane %v1533_v44, %v603_v55 }
 0x895   : > { %1727 = vmatprep.subr.bf16.mxu1 %v2848_v45  ;;  %v1549_v45 = vsub.s32 3, %v3563_v54 }
 0x897   : > { %1771 = vmatpush1.bf16.msra.mxu0 %v2849_v48  ;;  %v1542_v48 = vrot.slane %v1533_v44, %v607_v58 }
 0x898   : > { %1728 = vmatpush1.bf16.msra.mxu1 %v2846_v47  ;;  %1772 = vmatprep.subr.bf16.mxu0 %v2857_v4  ;;  %v1546_v47 = vrot.slane %v1533_v44, %v611_v56 }
 0x899   : > { %1729 = vmatprep.subr.bf16.mxu1 %v2854_v49  ;;  %v1550_v49 = vrot.slane %v1533_v44, %v1549_v45 }
 0x89b   : > { %1773 = vmatpush1.bf16.msra.mxu0 %v2855_v51 }
 0x89c   : > { %1730 = vmatpush1.bf16.msra.mxu1 %v2852_v50  ;;  %2558 = vmatprep.subr.bf16.mxu0 %v2859_v30 }
 0x951   : > { %v1446_v3 = vpop.f32.mrb[12].mxu0 }
 0x952   : > { %v1453_v6 = vadd.f32 %v2946_v61, %v1446_v3  ;;  %v2666_v7 = vpop.f32.mrb[13].mxu0 }
 0x953   : > { %v1449_v57 = vpop.f32.mrb[14].mxu0 }
 0x954   : > { %v3678_v8 = vadd.f32 %v2429_v5, %v1453_v6  ;;  %v1454_v9 = vadd.f32 %v2947_v14, %v1449_v57  ;;  %v2667_v10 = vpop.f32.mrb[15].mxu0  ;;  %v2431_v6 = vld [vmem:[#allocation7 + $0x1] ss:$0 sm:$0xff] }
 0x955   : > { %v2858_v10 = vld [vmem:[#allocation10 + $0x40] sm:$0xff]  }
 0x956   : > { %v3681_v11 = vadd.f32 %v2429_v5, %v1454_v9  ;;  %1466 = vadd.xlane.f32.xlu0 %v3678_v8  ;;  %2536 = vmatprep.subr.bf16.mxu1 %v2858_v10 }
 0x958   : > { %1468 = vadd.xlane.f32.xlu1 %v3681_v11 }
 0x9e3   : > { %v1467_v22 = vpop.xlane.xlu0 %1466 }
 0x9e4   : > { %v1470_v23 = vmul.f32 0.0078125, %v1467_v22  ;;  %v2867_v22 = vld [vmem:[#allocation10 + $0xd0] sm:$0xff]  }
 0x9e5   : > { %v1469_v24 = vpop.xlane.xlu1 %1468 }
 0x9e6   : > { %v3710_v25 = vsub.f32 %v3678_v8, %v1470_v23  ;;  %v1471_v26 = vmul.f32 0.0078125, %v1469_v24  ;;  %v2868_v23 = vld [vmem:[#allocation10 + $0x10] sm:$0xff]  }
 0x9e7   : > { %v2869_v24 = vld [vmem:[#allocation10 + $0x90] sm:$0xff]  }
 0x9e8   : > { %v3713_v27 = vsub.f32 %v3681_v11, %v1471_v26  ;;  %v1474_v28 = vmul.f32 %v3710_v25, %v3710_v25  ;;  %v2871_v26 = vld [vmem:[#allocation10 + $0xd8] sm:$0xff]  }
 0x9ea   : > { %1476 = vadd.xlane.f32.xlu0 %v1474_v28  ;;  %v1475_v29 = vmul.f32 %v3713_v27, %v3713_v27  ;;  %v2873_v28 = vld [vmem:[#allocation10 + $0x98] sm:$0xff]  }
 0x9ee   : > { %1478 = vadd.xlane.f32.xlu0 %v1475_v29  ;;  %v2874_v29 = vld [vmem:[#allocation10 + $0x60] sm:$0xff]  }
 0xa77   : > { %v1477_v52 = vpop.xlane.xlu0 %1476 }
 0xa78   : > { %v1480_v53 = vmul.f32 0.0078125, %v1477_v52 }
 0xa7a   : > { %v1482_v59 = vadd.f32 1e-05, %v1480_v53 }
 0xa7b   : > { %v1479_v60 = vpop.xlane.xlu0 %1478 }
 0xa7c   : > { %2926 = vrsqrt.f32 %v1482_v59  ;;  %v1481_v62 = vmul.f32 0.0078125, %v1479_v60 }
 0xa7e   : > { %v1483_v63 = vadd.f32 1e-05, %v1481_v62 }
 0xa80   : > { %2928 = vrsqrt.f32 %v1483_v63 }
 0xa86   : > { %v2927_v0 = vpop.eup %2926 }
 0xa87   : > { %v1486_v1 = vmul.f32 %v2927_v0, %v3710_v25  ;;  %v2870_v25 = vld [vmem:[#allocation10 + $0x58] sm:$0xff]  }
 0xa89   : > { %v1492_v61 = vmul.f32 %v2430_v2, %v1486_v1 }
 0xa8a   : > { %v2929_v3 = vpop.eup %2928 }
 0xa8b   : > { %v1487_v5 = vmul.f32 %v2929_v3, %v3713_v27  ;;  %v1498_v57 = vadd.f32 %v2431_v6, %v1492_v61  ;;  %v2872_v27 = vld [vmem:[#allocation10 + $0x18] sm:$0xff]  }
 0xa8d   : > { %v1493_v7 = vmul.f32 %v2430_v2, %v1487_v5 }
 0xa8f   : > { %v1499_v14 = vadd.f32 %v2431_v6, %v1493_v7 }
 0xa91   : > { %v1500_v9 = vpack.c.bf16 %v1499_v14, %v1498_v57 }
 0xa93   : > { %1748 = vmatmul.mubr.bf16.vlgmr.msra.gmra.mrb[28].mxu1 %v1500_v9  ;;  %1791 = vmatmul.mubr.bf16.vlgmr.msra.gmra.mrb[16].mxu0 %v1500_v9 }
 0xa94   : > { %2537 = vmatpush3.bf16.msra.mxu1 %v2860_v12  ;;  %2559 = vmatpush3.bf16.msra.mxu0 %v2861_v13 }
 0xa95   : > { %2538 = vmatprep.subr.bf16.mxu1 %v2862_v15  ;;  %2560 = vmatprep.subr.bf16.mxu0 %v2863_v16 }
 0xa98   : > { %2539 = vmatpush3.bf16.msra.mxu1 %v2864_v18  ;;  %2561 = vmatpush3.bf16.msra.mxu0 %v2865_v20 }
 0xa99   : > { %2540 = vmatprep.subr.bf16.mxu1 %v2866_v21  ;;  %2562 = vmatprep.subr.bf16.mxu0 %v2867_v22 }
 0xa9c   : > { %2541 = vmatpush3.bf16.msra.mxu1 %v2868_v23  ;;  %2563 = vmatpush3.bf16.msra.mxu0 %v2869_v24 }
 0xa9d   : > { %2542 = vmatprep.subr.bf16.mxu1 %v2870_v25  ;;  %2564 = vmatprep.subr.bf16.mxu0 %v2871_v26 }
 0xaa0   : > { %2543 = vmatpush3.bf16.msra.mxu1 %v2872_v27  ;;  %2565 = vmatpush3.bf16.msra.mxu0 %v2873_v28 }
 0xaa1   : > { %2544 = vmatprep.subr.bf16.mxu1 %v2874_v29  ;;  %2566 = vmatprep.subr.bf16.mxu0 %v2875_v31 }
 0xaa4   : > { %2545 = vmatpush3.bf16.msra.mxu1 %v2876_v19  ;;  %2567 = vmatpush3.bf16.msra.mxu0 %v2877_v32 }
 0xaa5   : > { %2546 = vmatprep.subr.bf16.mxu1 %v2878_v33  ;;  %2568 = vmatprep.subr.bf16.mxu0 %v2879_v34 }
 0xaa8   : > { %2547 = vmatpush3.bf16.msra.mxu1 %v2880_v35  ;;  %2569 = vmatpush3.bf16.msra.mxu0 %v2881_v36 }
 0xaa9   : > { %2548 = vmatprep.subr.bf16.mxu1 %v2882_v37  ;;  %2570 = vmatprep.subr.bf16.mxu0 %v2883_v17 }
 0xaac   : > { %2549 = vmatpush3.bf16.msra.mxu1 %v2884_v38  ;;  %2571 = vmatpush3.bf16.msra.mxu0 %v2885_v39 }
 0xaad   : > { %2550 = vmatprep.subr.bf16.mxu1 %v2886_v40  ;;  %2572 = vmatprep.subr.bf16.mxu0 %v2887_v41 }
 0xab0   : > { %2551 = vmatpush3.bf16.msra.mxu1 %v2888_v42  ;;  %2573 = vmatpush3.bf16.msra.mxu0 %v2889_v43 }
 0xb66   : > { %v1749_v4 = vpop.f32.mrb[28].mxu1  ;;  %v1792_v50 = vpop.f32.mrb[16].mxu0 }
 0xb67   : > { %v3800_v51 = vadd.f32 %v1749_v4, %v1538_v46  ;;  %v3802_v52 = vadd.f32 %v1792_v50, %v1546_v47  ;;  %v1751_v53 = vpop.f32.mrb[29].mxu1  ;;  %v1794_v59 = vpop.f32.mrb[17].mxu0 }
 0xb68   : > { %v3804_v60 = vadd.f32 %v1751_v53, %v1542_v48  ;;  %v3806_v62 = vadd.f32 %v1794_v59, %v1550_v49  ;;  %v1753_v55 = vpop.f32.mrb[30].mxu1  ;;  %v1796_v63 = vpop.f32.mrb[18].mxu0 }
 0xb69   : > { %v1801_v56 = vmul.f32 %v3800_v51, %v3800_v51  ;;  %v1803_v54 = vmul.f32 %v3802_v52, %v3802_v52  ;;  %v3812_v58 = vadd.f32 %v1753_v55, %v1538_v46  ;;  %v3814_v0 = vadd.f32 %v1796_v63, %v1546_v47  ;;  %v1755_v1 = vpop.f32.mrb[31].mxu1  ;;  %v1798_v2 = vpop.f32.mrb[19].mxu0 }
 0xb6a   : > { %v1802_v3 = vmul.f32 %v3804_v60, %v3804_v60  ;;  %v1804_v5 = vmul.f32 %v3806_v62, %v3806_v62  ;;  %v3820_v61 = vadd.f32 %v1755_v1, %v1542_v48  ;;  %v3822_v6 = vadd.f32 %v1798_v2, %v1550_v49 }
 0xb6b   : > { %v1809_v7 = vmul.f32 %v1801_v56, %v3800_v51  ;;  %v1811_v57 = vmul.f32 %v1803_v54, %v3802_v52  ;;  %v1805_v14 = vmul.f32 %v3812_v58, %v3812_v58  ;;  %v1807_v9 = vmul.f32 %v3814_v0, %v3814_v0 }
 0xb6c   : > { %v1810_v10 = vmul.f32 %v1802_v3, %v3804_v60  ;;  %v1812_v30 = vmul.f32 %v1804_v5, %v3806_v62  ;;  %v1806_v12 = vmul.f32 %v3820_v61, %v3820_v61  ;;  %v1808_v13 = vmul.f32 %v3822_v6, %v3822_v6 }
 0xb6d   : > { %v1817_v15 = vmul.f32 0.044715, %v1809_v7  ;;  %v1819_v16 = vmul.f32 0.044715, %v1811_v57  ;;  %v1813_v18 = vmul.f32 %v1805_v14, %v3812_v58  ;;  %v1815_v20 = vmul.f32 %v1807_v9, %v3814_v0 }
 0xb6e   : > { %v1818_v21 = vmul.f32 0.044715, %v1810_v10  ;;  %v1820_v22 = vmul.f32 0.044715, %v1812_v30  ;;  %v1814_v23 = vmul.f32 %v1806_v12, %v3820_v61  ;;  %v1816_v24 = vmul.f32 %v1808_v13, %v3822_v6 }
 0xb6f   : > { %v1825_v25 = vadd.f32 %v1817_v15, %v3800_v51  ;;  %v1827_v26 = vadd.f32 %v1819_v16, %v3802_v52  ;;  %v1821_v27 = vmul.f32 0.044715, %v1813_v18  ;;  %v1823_v28 = vmul.f32 0.044715, %v1815_v20 }
 0xb70   : > { %v1826_v29 = vadd.f32 %v1818_v21, %v3804_v60  ;;  %v1828_v31 = vadd.f32 %v1820_v22, %v3806_v62  ;;  %v1822_v19 = vmul.f32 0.044715, %v1814_v23  ;;  %v1824_v32 = vmul.f32 0.044715, %v1816_v24 }
 0xb71   : > { %v1833_v33 = vmul.f32 0.7978846, %v1825_v25  ;;  %v1835_v34 = vmul.f32 0.7978846, %v1827_v26  ;;  %v1829_v35 = vadd.f32 %v1821_v27, %v3812_v58  ;;  %v1831_v36 = vadd.f32 %v1823_v28, %v3814_v0 }
 0xb72   : > { %v1834_v37 = vmul.f32 0.7978846, %v1826_v29  ;;  %v1836_v17 = vmul.f32 0.7978846, %v1828_v31  ;;  %v1830_v38 = vadd.f32 %v1822_v19, %v3820_v61  ;;  %v1832_v39 = vadd.f32 %v1824_v32, %v3822_v6 }
 0xb73   : > { %2930 = vtanh.f32 %v1833_v33  ;;  %v1837_v40 = vmul.f32 0.7978846, %v1829_v35  ;;  %v1839_v41 = vmul.f32 0.7978846, %v1831_v36 }
 0xb74   : > { %2932 = vtanh.f32 %v1835_v34  ;;  %v1838_v42 = vmul.f32 0.7978846, %v1830_v38  ;;  %v1840_v43 = vmul.f32 0.7978846, %v1832_v39 }
 0xb75   : > { %2934 = vtanh.f32 %v1834_v37 }
 0xb76   : > { %2936 = vtanh.f32 %v1836_v17 }
 0xb77   : > { %2938 = vtanh.f32 %v1837_v40 }
 0xb78   : > { %2940 = vtanh.f32 %v1839_v41 }
 0xb79   : > { %2942 = vtanh.f32 %v1838_v42 }
 0xb7a   : > { %2944 = vtanh.f32 %v1840_v43 }
 0xb7d   : > { %v2931_v44 = vpop.eup %2930 }
 0xb7e   : > { %v2933_v45 = vpop.eup %2932  ;;  %v1849_v46 = vadd.f32 1.0, %v2931_v44 }
 0xb7f   : > { %v2935_v47 = vpop.eup %2934  ;;  %v1851_v48 = vadd.f32 1.0, %v2933_v45 }
 0xb80   : > { %v2937_v49 = vpop.eup %2936  ;;  %v1850_v4 = vadd.f32 1.0, %v2935_v47  ;;  %v1857_v55 = vmul.f32 0.5, %v1849_v46 }
 0xb81   : > { %v2939_v50 = vpop.eup %2938  ;;  %v1852_v53 = vadd.f32 1.0, %v2937_v49  ;;  %v1859_v54 = vmul.f32 0.5, %v1851_v48 }
 0xb82   : > { %v2941_v59 = vpop.eup %2940  ;;  %v1853_v63 = vadd.f32 1.0, %v2939_v50  ;;  %v1858_v7 = vmul.f32 0.5, %v1850_v4  ;;  %v1865_v10 = vmul.f32 %v1857_v55, %v3800_v51 }
 0xb83   : > { %v2943_v56 = vpop.eup %2942  ;;  %v1855_v1 = vadd.f32 1.0, %v2941_v59  ;;  %v1860_v9 = vmul.f32 0.5, %v1852_v53  ;;  %v1867_v13 = vmul.f32 %v1859_v54, %v3802_v52 }
 0xb84   : > { %v2945_v2 = vpop.eup %2944  ;;  %v1861_v3 = vmul.f32 0.5, %v1853_v63  ;;  %v1854_v5 = vadd.f32 1.0, %v2943_v56  ;;  %v1866_v18 = vmul.f32 %v1858_v7, %v3804_v60 }
 0xb85   : > { %v1863_v57 = vmul.f32 0.5, %v1855_v1  ;;  %v1856_v14 = vadd.f32 1.0, %v2945_v2  ;;  %v1868_v22 = vmul.f32 %v1860_v9, %v3806_v62 }
 0xb86   : > { %v1869_v30 = vmul.f32 %v1861_v3, %v3812_v58  ;;  %v1862_v12 = vmul.f32 0.5, %v1854_v5 }
 0xb87   : > { %v1871_v15 = vmul.f32 %v1863_v57, %v3814_v0  ;;  %v1864_v16 = vmul.f32 0.5, %v1856_v14  ;;  %v2464_v0 = vld [vmem:[#allocation12] ss:$0 sm:$0xff] }
 0xb88   : > { %v1870_v20 = vmul.f32 %v1862_v12, %v3820_v61  ;;  %v1873_v21 = vpack.c.bf16 %v1869_v30, %v1865_v10 }
 0xb89   : > { %v1872_v23 = vmul.f32 %v1864_v16, %v3822_v6  ;;  %v1875_v24 = vpack.c.bf16 %v1871_v15, %v1867_v13 }
 0xb8a   : > { %v1874_v25 = vpack.c.bf16 %v1870_v20, %v1866_v18 }
 0xb8b   : > { %v1876_v51 = vpack.c.bf16 %v1872_v23, %v1868_v22 }
 0xb8c   : > { %2172 = vmatprep.mubr.bf16.mxu1 %v1874_v25 }
 0xb8d   : > { %2213 = vmatprep.mubr.bf16.mxu0 %v1876_v51  ;;  %2173 = vmatmul.mubr.bf16.vlgmr.msra.gmra.mrb[32].mxu1 %v1873_v21 }
 0xb8e   : > { %2214 = vmatmul.mubr.bf16.vlgmr.msra.gmra.mrb[20].mxu0 %v1875_v24 }
 0xc60   : > { %v2552_v52 = vpop.f32.mrb[32].mxu1 }
 0xc61   : > { %v2574_v58 = vpop.f32.mrb[20].mxu0  ;;  %v2553_v26 = vpop.f32.mrb[33].mxu1 }
 0xc62   : > { %v2554_v60 = vadd.f32 %v2553_v26, %v2552_v52  ;;  %v2575_v27 = vpop.f32.mrb[21].mxu0  ;;  %v2555_v61 = vpop.f32.mrb[34].mxu1 }
 0xc63   : > { %v2576_v28 = vadd.f32 %v2575_v27, %v2574_v58  ;;  %v2577_v29 = vpop.f32.mrb[22].mxu0  ;;  %v2556_v62 = vpop.f32.mrb[35].mxu1 }
 0xc64   : > { %v2175_v31 = vadd.f32 %v2554_v60, %v2464_v0  ;;  %v2557_v6 = vadd.f32 %v2556_v62, %v2555_v61  ;;  %v2578_v19 = vpop.f32.mrb[23].mxu0 }
 0xc65   : > { %v2579_v32 = vadd.f32 %v2578_v19, %v2577_v29 }
 0xc66   : > { %v2216_v33 = vadd.f32 %v2576_v28, %v2175_v31  ;;  %v2178_v34 = vadd.f32 %v2557_v6, %v2464_v0 }
 0xc68   : > { %v2222_v35 = vadd.f32 %v2216_v33, %v3678_v8  ;;  %v2219_v36 = vadd.f32 %v2579_v32, %v2178_v34 }
 0xc6a   : > { %2224 = vst [vmem:[%s525_s28] sm:$0xff] %v2222_v35  ;;  %v2223_v37 = vadd.f32 %v2219_v36, %v3681_v11 }
 0xc6c   : > { %2225 = vst [vmem:[%s525_s28 + $0x8] sm:$0xff] %v2223_v37 }
 0xc6d PF: > { %s26_s21 = sadd.s32 1, %s3166_s21  }
 0xc6e   : > { %p23_p9 = scmp.ge.s32.totalorder %s26_s21, 4  }
 0xc70   :  { %25 = sbr.rel (!%p23_p9) target bundleno = 4 (0x4), region = 130 }
 0xc77   :  { %2247 = vsyncpa [#allocation3], 1 }
 0xc78   :  { %2249 = vsyncpa [#allocation3 + $0x1], 1 }
 0xc79   :  { %2250 = vsyncpa [#allocation5], 1 }
 0xc7a   :  { %2251 = vsyncpa [#allocation8], 1 }
 0xc7b   :  { %2252 = vsyncpa [#allocation11], 1 }

</bundles_post_ra>
